<compile_context>
chip_gen: v5e
topology: v5e:2x2
jax: 0.10.0
libtpu: 0.0.40
codegen_flags: <defaults>
</compile_context>

<pallas_src>
import functools

import jax
import jax.numpy as jnp
from jax.experimental import pallas as pl
from jax.experimental.pallas import tpu as pltpu

LN_EPS = 1e-5   # torch.nn.LayerNorm default


def _elu(x):
    # ELU with alpha=1.0 (torch default): x if x > 0 else exp(x) - 1
    return jnp.where(x > 0, x, jnp.exp(jnp.minimum(x, 0.0)) - 1.0)


def _layernorm(x, gamma, beta):
    # Two-pass (centered) variance: numerically safer than E[x^2]-mu^2.
    mu = jnp.mean(x, axis=-1, keepdims=True)
    xc = x - mu
    var = jnp.mean(xc * xc, axis=-1, keepdims=True)
    inv = jax.lax.rsqrt(var + LN_EPS)
    return xc * inv * gamma + beta


def policy_fwd_kernel(
    x_ref,        # (b_tile, d_in)      batch tile
    eps_ref,      # (dsub, b_tile)      N(0,1) noise, batch on lanes
    w1_ref,       # (d_in, h1)          resident
    w2_ref,       # (h1, h2)            resident
    w3t_ref,      # (dsub, h2)          resident (w3^T, zero-padded rows)
    vec_ref,      # (8, hmax)           rows: b1,g1,be1,b2,g2,be2,0,0
    head_ref,     # (dsub, 2)           col 0 = b3^T, col 1 = exp(log_std)^T
    out_ref,      # (2*dsub, b_tile)    rows [0:dsub)=tanh(action), [dsub:2dsub)=mean
):
    h1 = w1_ref.shape[1]
    h2 = w2_ref.shape[1]
    dsub = w3t_ref.shape[0]

    vp = vec_ref[...]
    b1, g1, be1 = vp[0:1, :h1], vp[1:2, :h1], vp[2:3, :h1]
    b2, g2, be2 = vp[3:4, :h2], vp[4:5, :h2], vp[5:6, :h2]

    # hidden block 1: Linear -> ELU -> LayerNorm
    h = jnp.dot(x_ref[...], w1_ref[...], preferred_element_type=jnp.float32) + b1
    h = _layernorm(_elu(h), g1, be1)
    # hidden block 2: Linear -> ELU -> LayerNorm
    h = jnp.dot(h, w2_ref[...], preferred_element_type=jnp.float32) + b2
    h = _layernorm(_elu(h), g2, be2)

    # Transposed output head: (dsub, b_tile), batch on the lane axis.
    mean_t = jax.lax.dot_general(
        w3t_ref[...], h, (((1,), (1,)), ((), ())),
        preferred_element_type=jnp.float32)
    hp = head_ref[...]                      # (dsub, 2)
    mean_t = mean_t + hp[:, 0:1]            # + b3 (zero in padded rows)
    act_t = jnp.tanh(mean_t + hp[:, 1:2] * eps_ref[...])   # std is zero in padded rows

    out_ref[0:dsub, :] = act_t
    out_ref[dsub:2 * dsub, :] = mean_t


@functools.partial(jax.jit, static_argnames=("b_tile",))
def policy_forward(x, params, key, *, b_tile=256):
    """x: (B, d_in) f32; key: jax PRNG key. Returns (tanh(action), mean), each (B, d_out)."""
    if b_tile % 128 != 0:
        raise ValueError("b_tile must be a multiple of 128 (lane-dense transposed head)")

    B, d_in = x.shape
    h1 = params["w1"].shape[1]
    h2 = params["w2"].shape[1]
    d_out = params["w3"].shape[1]
    hmax = max(h1, h2)
    dsub = 8 * pl.cdiv(d_out, 8)             # sublane-aligned head rows

    n_tiles = pl.cdiv(B, b_tile)
    b_padded = n_tiles * b_tile
    if b_padded != B:
        # Prefer choosing b_tile to divide B for production batches; this pad is a
        # fallback for ragged batches (extra columns are sliced off below).
        x = jnp.pad(x, ((0, b_padded - B), (0, 0)))

    # --- consolidated parameter blocks (built once per trace, tiny) ---------
    def _row(v, width):
        v = v.reshape(1, -1)
        return jnp.pad(v, ((0, 0), (0, width - v.shape[1])))

    vecs = jnp.concatenate(
        [_row(params["b1"], hmax), _row(params["g1"], hmax), _row(params["be1"], hmax),
         _row(params["b2"], hmax), _row(params["g2"], hmax), _row(params["be2"], hmax),
         jnp.zeros((2, hmax), jnp.float32)],
        axis=0)                                                    # (8, hmax)

    w3t = jnp.pad(params["w3"].T, ((0, dsub - d_out), (0, 0)))     # (dsub, h2)
    b3t = jnp.pad(params["b3"].reshape(-1, 1), ((0, dsub - d_out), (0, 0)))
    stdt = jnp.pad(jnp.exp(params["log_std"]).reshape(-1, 1),
                   ((0, dsub - d_out), (0, 0)))
    head = jnp.concatenate([b3t, stdt], axis=1)                    # (dsub, 2)

    # Noise drawn in the wrapper (portable; also reproducible independent of b_tile).
    eps = jax.random.normal(key, (dsub, B), jnp.float32)
    if b_padded != B:
        eps = jnp.pad(eps, ((0, 0), (0, b_padded - B)))

    row = lambda i: (i, 0)        # batch-tiled (sublane axis)
    col = lambda i: (0, i)        # batch-tiled (lane axis, transposed head)
    const = lambda i: (0, 0)      # block-resident parameters (DMA'd once)

    in_specs = [
        pl.BlockSpec((b_tile, d_in), row),
        pl.BlockSpec((dsub, b_tile), col),
        pl.BlockSpec((d_in, h1), const),
        pl.BlockSpec((h1, h2), const),
        pl.BlockSpec((dsub, h2), const),
        pl.BlockSpec((8, hmax), const),
        pl.BlockSpec((dsub, 2), const),
    ]
    out_specs = pl.BlockSpec((2 * dsub, b_tile), col)
    out_shape = jax.ShapeDtypeStruct((2 * dsub, b_padded), jnp.float32)

    out_t = pl.pallas_call(
        policy_fwd_kernel,
        out_shape=out_shape,
        grid=(n_tiles,),
        in_specs=in_specs,
        out_specs=out_specs,
        compiler_params=pltpu.CompilerParams(
            dimension_semantics=("parallel",),   # shard batch tiles across v7x TCs
        ),
    )(x, eps, params["w1"], params["w2"], w3t, vecs, head)

    action = out_t[:d_out, :B].T        # tiny (d_out x B) transpose in XLA
    mean = out_t[dsub:dsub + d_out, :B].T
    return action, mean


def init_params(key, input_dim, hidden, output_dim):
    """Deterministic synthetic init matching the module's parameter shapes."""
    ks = jax.random.split(key, 3)
    h1, h2 = hidden

    def lin(k, fan_in, fan_out):
        bound = 1.0 / jnp.sqrt(fan_in)
        kw, kb = jax.random.split(k)
        w = jax.random.uniform(kw, (fan_in, fan_out), jnp.float32, -bound, bound)
        b = jax.random.uniform(kb, (1, fan_out), jnp.float32, -bound, bound)
        return w, b

    w1, b1 = lin(ks[0], input_dim, h1)
    w2, b2 = lin(ks[1], h1, h2)
    w3, b3 = lin(ks[2], h2, output_dim)

    return {
        "w1": w1, "b1": b1,
        "g1": jnp.ones((1, h1), jnp.float32), "be1": jnp.zeros((1, h1), jnp.float32),
        "w2": w2, "b2": b2,
        "g2": jnp.ones((1, h2), jnp.float32), "be2": jnp.zeros((1, h2), jnp.float32),
        "w3": w3, "b3": b3,
        # log_std initialized to -1.0 as in the module
        "log_std": jnp.full((1, output_dim), -1.0, jnp.float32),
    }


if __name__ == "__main__":
    batch, input_dim, output_dim = 512, 16, 4     # 2 batch tiles of 256 rows
    hidden = [64, 64]                             # default net_arch
    b_tile = 256

    root = jax.random.PRNGKey(0)
    k_param, k_x, k_noise = jax.random.split(root, 3)

    params = init_params(k_param, input_dim, hidden, output_dim)
    x = jax.random.normal(k_x, (batch, input_dim), jnp.float32)

    action, mean = policy_forward(x, params, k_noise, b_tile=b_tile)
    action, mean = jax.block_until_ready((action, mean))

    # ---------------- reference forward in plain JAX (f32) -------------------
    def ref_forward(xx, eps):
        h = xx
        for w, b, g, be in [
            (params["w1"], params["b1"], params["g1"], params["be1"]),
            (params["w2"], params["b2"], params["g2"], params["be2"]),
        ]:
            h = h @ w + b
            h = jnp.where(h > 0, h, jnp.exp(jnp.minimum(h, 0.0)) - 1.0)
            mu = h.mean(-1, keepdims=True)
            var = ((h - mu) ** 2).mean(-1, keepdims=True)
            h = (h - mu) / jnp.sqrt(var + LN_EPS) * g + be
        m = h @ params["w3"] + params["b3"]
        a = jnp.tanh(m + jnp.exp(params["log_std"]) * eps)
        return a, m

    # Regenerate the exact noise the wrapper drew (pure function of key/shape).
    dsub = 8 * pl.cdiv(output_dim, 8)
    eps_used = jax.random.normal(k_noise, (dsub, batch), jnp.float32)[:output_dim, :].T
    a_ref, m_ref = ref_forward(x, eps_used)

    assert action.shape == (batch, output_dim)
    assert mean.shape == (batch, output_dim)
    assert bool(jnp.all(jnp.isfinite(action))) and bool(jnp.all(jnp.isfinite(mean)))
    assert jnp.allclose(mean, m_ref, atol=5e-5), "mean mismatch vs reference"
    assert jnp.allclose(action, a_ref, atol=5e-5), "action mismatch vs reference"
    assert float(jnp.max(jnp.abs(action))) < 1.0, "tanh output out of range"

    print("KERNEL_OK")
</pallas_src>

<mosaic_0001>
module attributes {stable_mosaic.version = 11 : i64} {
  func.func @policy_fwd_kernel(%arg0: i32, %arg1: memref<256x16xf32, #tpu.memory_space<vmem>>, %arg2: memref<8x256xf32, #tpu.memory_space<vmem>>, %arg3: memref<16x64xf32, #tpu.memory_space<vmem>>, %arg4: memref<64x64xf32, #tpu.memory_space<vmem>>, %arg5: memref<8x64xf32, #tpu.memory_space<vmem>>, %arg6: memref<8x64xf32, #tpu.memory_space<vmem>>, %arg7: memref<8x2xf32, #tpu.memory_space<vmem>>, %arg8: memref<16x256xf32, #tpu.memory_space<vmem>>) attributes {dimension_semantics = [#tpu.dimension_semantics<parallel>], iteration_bounds = array<i64: 2>, scalar_prefetch = 0 : i64, scratch_operands = 0 : i64, tpu.core_type = #tpu.core_type<tc>, window_params = [{transform_indices = @transform_0, window_bounds = array<i64: 256, 16>}, {transform_indices = @transform_1, window_bounds = array<i64: 8, 256>}, {pipeline_mode = #tpu.pipeline_mode<synchronous>, transform_indices = @transform_2, window_bounds = array<i64: 16, 64>}, {pipeline_mode = #tpu.pipeline_mode<synchronous>, transform_indices = @transform_3, window_bounds = array<i64: 64, 64>}, {pipeline_mode = #tpu.pipeline_mode<synchronous>, transform_indices = @transform_4, window_bounds = array<i64: 8, 64>}, {pipeline_mode = #tpu.pipeline_mode<synchronous>, transform_indices = @transform_5, window_bounds = array<i64: 8, 64>}, {pipeline_mode = #tpu.pipeline_mode<synchronous>, transform_indices = @transform_6, window_bounds = array<i64: 8, 2>}, {transform_indices = @transform_7, window_bounds = array<i64: 16, 256>}]} {
    %c0 = arith.constant 0 : index
    %c0_0 = arith.constant 0 : index
    %0 = vector.load %arg6[%c0, %c0_0] : memref<8x64xf32, #tpu.memory_space<vmem>>, vector<8x64xf32>
    %1 = vector.extract_strided_slice %0 {offsets = [0, 0], sizes = [1, 64], strides = [1, 1]} : vector<8x64xf32> to vector<1x64xf32>
    %2 = vector.extract_strided_slice %0 {offsets = [1, 0], sizes = [1, 64], strides = [1, 1]} : vector<8x64xf32> to vector<1x64xf32>
    %3 = vector.extract_strided_slice %0 {offsets = [2, 0], sizes = [1, 64], strides = [1, 1]} : vector<8x64xf32> to vector<1x64xf32>
    %4 = vector.extract_strided_slice %0 {offsets = [3, 0], sizes = [1, 64], strides = [1, 1]} : vector<8x64xf32> to vector<1x64xf32>
    %5 = vector.extract_strided_slice %0 {offsets = [4, 0], sizes = [1, 64], strides = [1, 1]} : vector<8x64xf32> to vector<1x64xf32>
    %6 = vector.extract_strided_slice %0 {offsets = [5, 0], sizes = [1, 64], strides = [1, 1]} : vector<8x64xf32> to vector<1x64xf32>
    %c0_1 = arith.constant 0 : index
    %c0_2 = arith.constant 0 : index
    %7 = vector.load %arg1[%c0_1, %c0_2] : memref<256x16xf32, #tpu.memory_space<vmem>>, vector<256x16xf32>
    %c0_3 = arith.constant 0 : index
    %c0_4 = arith.constant 0 : index
    %8 = vector.load %arg3[%c0_3, %c0_4] : memref<16x64xf32, #tpu.memory_space<vmem>>, vector<16x64xf32>
    %cst = arith.constant dense<0.000000e+00> : vector<256x64xf32>
    %9 = tpu.matmul %7, %8, %cst {dimension_numbers = #tpu.dot_dimension_numbers<[1], [0], [0], [1], [0, 0, 1, 1], [], []>} : vector<256x16xf32>, vector<16x64xf32>, vector<256x64xf32> -> vector<256x64xf32>
    %10 = vector.broadcast %1 : vector<1x64xf32> to vector<256x64xf32>
    %11 = arith.addf %9, %10 : vector<256x64xf32>
    %cst_5 = arith.constant 0.000000e+00 : f32
    %12 = vector.broadcast %cst_5 : f32 to vector<256x64xf32>
    %13 = arith.cmpf ogt, %11, %12 : vector<256x64xf32>
    %cst_6 = arith.constant 0.000000e+00 : f32
    %14 = vector.broadcast %cst_6 : f32 to vector<256x64xf32>
    %15 = arith.minimumf %11, %14 : vector<256x64xf32>
    %16 = math.exp %15 : vector<256x64xf32>
    %cst_7 = arith.constant 1.000000e+00 : f32
    %17 = vector.broadcast %cst_7 : f32 to vector<256x64xf32>
    %18 = arith.subf %16, %17 : vector<256x64xf32>
    %19 = arith.select %13, %11, %18 : vector<256x64xi1>, vector<256x64xf32>
    %cst_8 = arith.constant dense<0.000000e+00> : vector<256xf32>
    %20 = vector.multi_reduction <add>, %19, %cst_8 [1] : vector<256x64xf32> to vector<256xf32>
    %21 = vector.shape_cast %20 : vector<256xf32> to vector<256x1xf32>
    %cst_9 = arith.constant 6.400000e+01 : f32
    %22 = vector.broadcast %cst_9 : f32 to vector<256x1xf32>
    %23 = arith.divf %21, %22 : vector<256x1xf32>
    %24 = vector.broadcast %23 : vector<256x1xf32> to vector<256x64xf32>
    %25 = arith.subf %19, %24 : vector<256x64xf32>
    %26 = arith.mulf %25, %25 : vector<256x64xf32>
    %cst_10 = arith.constant dense<0.000000e+00> : vector<256xf32>
    %27 = vector.multi_reduction <add>, %26, %cst_10 [1] : vector<256x64xf32> to vector<256xf32>
    %28 = vector.shape_cast %27 : vector<256xf32> to vector<256x1xf32>
    %cst_11 = arith.constant 6.400000e+01 : f32
    %29 = vector.broadcast %cst_11 : f32 to vector<256x1xf32>
    %30 = arith.divf %28, %29 : vector<256x1xf32>
    %cst_12 = arith.constant 9.99999974E-6 : f32
    %31 = vector.broadcast %cst_12 : f32 to vector<256x1xf32>
    %32 = arith.addf %30, %31 : vector<256x1xf32>
    %33 = math.rsqrt %32 : vector<256x1xf32>
    %34 = vector.broadcast %33 : vector<256x1xf32> to vector<256x64xf32>
    %35 = arith.mulf %25, %34 : vector<256x64xf32>
    %36 = vector.broadcast %2 : vector<1x64xf32> to vector<256x64xf32>
    %37 = arith.mulf %35, %36 : vector<256x64xf32>
    %38 = vector.broadcast %3 : vector<1x64xf32> to vector<256x64xf32>
    %39 = arith.addf %37, %38 : vector<256x64xf32>
    %c0_13 = arith.constant 0 : index
    %c0_14 = arith.constant 0 : index
    %40 = vector.load %arg4[%c0_13, %c0_14] : memref<64x64xf32, #tpu.memory_space<vmem>>, vector<64x64xf32>
    %cst_15 = arith.constant dense<0.000000e+00> : vector<256x64xf32>
    %41 = tpu.matmul %39, %40, %cst_15 {dimension_numbers = #tpu.dot_dimension_numbers<[1], [0], [0], [1], [0, 0, 1, 1], [], []>} : vector<256x64xf32>, vector<64x64xf32>, vector<256x64xf32> -> vector<256x64xf32>
    %42 = vector.broadcast %4 : vector<1x64xf32> to vector<256x64xf32>
    %43 = arith.addf %41, %42 : vector<256x64xf32>
    %cst_16 = arith.constant 0.000000e+00 : f32
    %44 = vector.broadcast %cst_16 : f32 to vector<256x64xf32>
    %45 = arith.cmpf ogt, %43, %44 : vector<256x64xf32>
    %cst_17 = arith.constant 0.000000e+00 : f32
    %46 = vector.broadcast %cst_17 : f32 to vector<256x64xf32>
    %47 = arith.minimumf %43, %46 : vector<256x64xf32>
    %48 = math.exp %47 : vector<256x64xf32>
    %cst_18 = arith.constant 1.000000e+00 : f32
    %49 = vector.broadcast %cst_18 : f32 to vector<256x64xf32>
    %50 = arith.subf %48, %49 : vector<256x64xf32>
    %51 = arith.select %45, %43, %50 : vector<256x64xi1>, vector<256x64xf32>
    %cst_19 = arith.constant dense<0.000000e+00> : vector<256xf32>
    %52 = vector.multi_reduction <add>, %51, %cst_19 [1] : vector<256x64xf32> to vector<256xf32>
    %53 = vector.shape_cast %52 : vector<256xf32> to vector<256x1xf32>
    %cst_20 = arith.constant 6.400000e+01 : f32
    %54 = vector.broadcast %cst_20 : f32 to vector<256x1xf32>
    %55 = arith.divf %53, %54 : vector<256x1xf32>
    %56 = vector.broadcast %55 : vector<256x1xf32> to vector<256x64xf32>
    %57 = arith.subf %51, %56 : vector<256x64xf32>
    %58 = arith.mulf %57, %57 : vector<256x64xf32>
    %cst_21 = arith.constant dense<0.000000e+00> : vector<256xf32>
    %59 = vector.multi_reduction <add>, %58, %cst_21 [1] : vector<256x64xf32> to vector<256xf32>
    %60 = vector.shape_cast %59 : vector<256xf32> to vector<256x1xf32>
    %cst_22 = arith.constant 6.400000e+01 : f32
    %61 = vector.broadcast %cst_22 : f32 to vector<256x1xf32>
    %62 = arith.divf %60, %61 : vector<256x1xf32>
    %cst_23 = arith.constant 9.99999974E-6 : f32
    %63 = vector.broadcast %cst_23 : f32 to vector<256x1xf32>
    %64 = arith.addf %62, %63 : vector<256x1xf32>
    %65 = math.rsqrt %64 : vector<256x1xf32>
    %66 = vector.broadcast %65 : vector<256x1xf32> to vector<256x64xf32>
    %67 = arith.mulf %57, %66 : vector<256x64xf32>
    %68 = vector.broadcast %5 : vector<1x64xf32> to vector<256x64xf32>
    %69 = arith.mulf %67, %68 : vector<256x64xf32>
    %70 = vector.broadcast %6 : vector<1x64xf32> to vector<256x64xf32>
    %71 = arith.addf %69, %70 : vector<256x64xf32>
    %c0_24 = arith.constant 0 : index
    %c0_25 = arith.constant 0 : index
    %72 = vector.load %arg5[%c0_24, %c0_25] : memref<8x64xf32, #tpu.memory_space<vmem>>, vector<8x64xf32>
    %cst_26 = arith.constant dense<0.000000e+00> : vector<8x256xf32>
    %73 = tpu.matmul %72, %71, %cst_26 {dimension_numbers = #tpu.dot_dimension_numbers<[1], [1], [0], [0], [0, 0, 1, 0], [], []>} : vector<8x64xf32>, vector<256x64xf32>, vector<8x256xf32> -> vector<8x256xf32>
    %c0_27 = arith.constant 0 : index
    %c0_28 = arith.constant 0 : index
    %74 = vector.load %arg7[%c0_27, %c0_28] : memref<8x2xf32, #tpu.memory_space<vmem>>, vector<8x2xf32>
    %75 = vector.extract_strided_slice %74 {offsets = [0, 0], sizes = [8, 1], strides = [1, 1]} : vector<8x2xf32> to vector<8x1xf32>
    %76 = vector.broadcast %75 : vector<8x1xf32> to vector<8x256xf32>
    %77 = arith.addf %73, %76 : vector<8x256xf32>
    %78 = vector.extract_strided_slice %74 {offsets = [0, 1], sizes = [8, 1], strides = [1, 1]} : vector<8x2xf32> to vector<8x1xf32>
    %c0_29 = arith.constant 0 : index
    %c0_30 = arith.constant 0 : index
    %79 = vector.load %arg2[%c0_29, %c0_30] : memref<8x256xf32, #tpu.memory_space<vmem>>, vector<8x256xf32>
    %80 = vector.broadcast %78 : vector<8x1xf32> to vector<8x256xf32>
    %81 = arith.mulf %80, %79 : vector<8x256xf32>
    %82 = arith.addf %77, %81 : vector<8x256xf32>
    %83 = math.tanh %82 : vector<8x256xf32>
    %c0_31 = arith.constant 0 : index
    %c0_32 = arith.constant 0 : index
    %84 = vector.load %arg8[%c0_31, %c0_32] : memref<16x256xf32, #tpu.memory_space<vmem>>, vector<8x256xf32>
    tpu.vector_store %arg8[%c0_31, %c0_32], %83 {strides = array<i32>} : memref<16x256xf32, #tpu.memory_space<vmem>>, vector<8x256xf32>,
    %c8 = arith.constant 8 : index
    %c0_33 = arith.constant 0 : index
    %85 = vector.load %arg8[%c8, %c0_33] : memref<16x256xf32, #tpu.memory_space<vmem>>, vector<8x256xf32>
    tpu.vector_store %arg8[%c8, %c0_33], %77 {strides = array<i32>} : memref<16x256xf32, #tpu.memory_space<vmem>>, vector<8x256xf32>,
    return
  }
  func.func @transform_0(%arg0: i32) -> (i32, i32) {
    %c0_i32 = arith.constant 0 : i32
    %c0_i32_0 = arith.constant 0 : i32
    return %arg0, %c0_i32 : i32, i32
  }
  func.func @transform_1(%arg0: i32) -> (i32, i32) {
    %c0_i32 = arith.constant 0 : i32
    %c0_i32_0 = arith.constant 0 : i32
    return %c0_i32, %arg0 : i32, i32
  }
  func.func @transform_2(%arg0: i32) -> (i32, i32) {
    %c0_i32 = arith.constant 0 : i32
    %c0_i32_0 = arith.constant 0 : i32
    %c0_i32_1 = arith.constant 0 : i32
    return %c0_i32, %c0_i32_0 : i32, i32
  }
  func.func @transform_3(%arg0: i32) -> (i32, i32) {
    %c0_i32 = arith.constant 0 : i32
    %c0_i32_0 = arith.constant 0 : i32
    %c0_i32_1 = arith.constant 0 : i32
    return %c0_i32, %c0_i32_0 : i32, i32
  }
  func.func @transform_4(%arg0: i32) -> (i32, i32) {
    %c0_i32 = arith.constant 0 : i32
    %c0_i32_0 = arith.constant 0 : i32
    %c0_i32_1 = arith.constant 0 : i32
    return %c0_i32, %c0_i32_0 : i32, i32
  }
  func.func @transform_5(%arg0: i32) -> (i32, i32) {
    %c0_i32 = arith.constant 0 : i32
    %c0_i32_0 = arith.constant 0 : i32
    %c0_i32_1 = arith.constant 0 : i32
    return %c0_i32, %c0_i32_0 : i32, i32
  }
  func.func @transform_6(%arg0: i32) -> (i32, i32) {
    %c0_i32 = arith.constant 0 : i32
    %c0_i32_0 = arith.constant 0 : i32
    %c0_i32_1 = arith.constant 0 : i32
    return %c0_i32, %c0_i32_0 : i32, i32
  }
  func.func @transform_7(%arg0: i32) -> (i32, i32) {
    %c0_i32 = arith.constant 0 : i32
    %c0_i32_0 = arith.constant 0 : i32
    return %c0_i32, %arg0 : i32, i32
  }
}

</mosaic_0001>

<bundles_post_ra>
// kernel: policy_forward.1
= control target key start
LH: loop header
LB: loop body
LE: loop exit
PB: predicated region body
PF: predicated region fallthrough
CT: control target
= control target key end

     0   :  { %s3499_s24 = smov 0   ;;  %s3501_s25 = smov 0   ;;  %s5957_s0 = inlined_call_operand.vmem [shape: f32[512,16], index: 0, kind: input, shape index: {}]   ;;  %s5958_s1 = inlined_call_operand.vmem [shape: f32[8,512], index: 1, kind: input, shape index: {}]   ;;  %s5959_s2 = inlined_call_operand.vmem [shape: f32[16,64], index: 2, kind: input, shape index: {}]   ;;  %s5960_s3 = inlined_call_operand.vmem [shape: f32[64,64], index: 3, kind: input, shape index: {}]   ;;  %s5961_s4 = inlined_call_operand.vmem [shape: f32[8,64], index: 4, kind: input, shape index: {}]   ;;  %s5962_s5 = inlined_call_operand.vmem [shape: f32[8,64], index: 5, kind: input, shape index: {}]   ;;  %s5963_s6 = inlined_call_operand.vmem [shape: f32[8,2], index: 6, kind: input, shape index: {}]   ;;  %s5964_s7 = inlined_call_operand.vmem [shape: f32[16,512], index: 7, kind: output, shape index: {}]  }
   0x1   :  { %s3503_s26 = smov 0  }
   0x2 LB: > { %s3512_s27 = sadd.s32 4294967295, %s3454_s26   ;;  %s3514_s28 = sadd.s32 1, %s3454_s26   ;;  %s3454_s26 = sphi %s3503_s26, %s6115_s26   ;;  %s3450_s25 = sphi %s3501_s25, %s6114_s25   ;;  %s3446_s24 = sphi %s3499_s24, %s6113_s24  }
   0x3   : > { %s178_s29 = ssub.s32 %s3454_s26, %s3514_s28  ;;  %s181_s30 = sadd.s32 1, %s3450_s25 }
   0x4   : > { %p179_p0 = scmp.eq.s32.totalorder %s178_s29, 0  ;;  %p191_p1 = scmp.ne.s32.totalorder %s3450_s25, %s3446_s24 }
   0x5   : > { %p192_p2 = scmp.eq.s32.totalorder %s3512_s27, 1  ;;  %p2955_p3 = scmp.ge.s32.totalorder %s3454_s26, 1 }
   0x6   : > { %s3522_s8 = scalar_select %p179_p0, %s3450_s25, %s181_s30  }
   0x7   : > { %p3524_p4 = por %p192_p2, %p191_p1  ;;  %p249_p5 = scmp.lt.s32.totalorder %s3454_s26, 3 }
   0x9   : > { %p250_p6 = pnand %p2955_p3, %p249_p5 }
   0xb   : > { %253 = sbr.rel (%p250_p6) target bundleno = 1333 (0x535), region = 48 }
  0x10   : > { %v332_v0 = vld [vmem:[%s5959_s2 + $0x8] sm:$0xff]  ;;  %v331_v1 = vld [vmem:[%s5959_s2] sm:$0xff]  ;;  %s2957_s14 = sshll.u32 %s3512_s27, 5  ;;  %vm334_vm0 = vcmask 130048   ;;  %vm736_vm1 = vcmask 523264   ;;  %s2959_s11 = sshll.u32 %s3512_s27, 1 }
  0x11   : > { %445 = vmatpush.msra.mxu0 %v332_v0  ;;  %3129 = vmatpush.msra.mxu3 %v332_v0  ;;  %p286_p7 = scmp.lt.s32.totalorder %s2957_s14, 63  ;;  %v298_v27 = vld [vmem:[%s5962_s5] sm:$0xff]  ;;  %p292_p8 = scmp.lt.s32.totalorder %s2959_s11, 3 }
  0x12   : > { %v3593_v28 = vperm.slane %v298_v27, 0  ;;  %s282_s12 = sand.u32 1, %s3446_s24   ;;  %s3128_s24 = sshll.u32 (%p3524_p4), %s3512_s27, 4 }
  0x13   : > { %446 = vmatpush.msra.mxu0 %v331_v1  ;;  %3130 = vmatpush.msra.mxu3 %v331_v1  ;;  %s6117_s14 = smov (!%p286_p7, %s2957_s14), 63  ;;  %s6119_s11 = smov (!%p292_p8, %s2959_s11), 3 }
  0x14   : > { %s2958_s15 = sshll.u32 %s6117_s14, 3  ;;  %s2956_s13 = sshll.u32 %s282_s12, 5 }
  0x15   : > { %s3538_s18 = scalar_lea.vmem %s5957_s0, %s2958_s15  ;;  %s2960_s14 = sshll.u32 %s6119_s11, 3 }
  0x16   : > { %v299_v2 = vld [vmem:[%s3538_s18] sm:$0xff]  ;;  %v317_v3 = vld [vmem:[%s3538_s18 + $0x90] sm:$0xff]  ;;  %v300_v4 = vld [vmem:[%s3538_s18 + $0x8] sm:$0xff]  ;;  %s295_s17 = scalar_lea.vmem %s5958_s1, %s2960_s14  ;;  %s2865_s21 = scalar_lea.vmem (%p3524_p4), %s5964_s7, %s3128_s24 }
  0x17   : > { %2961 = vmatmul.msk.f32.vlgmr.msra.gmra.mxu0 %vm334_vm0, %v299_v2  ;;  %2979 = vmatmul.msk.f32.vlgmr.msra.gmra.mxu3 %vm334_vm0, %v317_v3  ;;  %v318_v5 = vld [vmem:[%s3538_s18 + $0x98] sm:$0xff]  ;;  %v301_v6 = vld [vmem:[%s3538_s18 + $0x10] sm:$0xff]  ;;  %v319_v7 = vld [vmem:[%s3538_s18 + $0xa0] sm:$0xff] }
  0x18   : > { %v302_v8 = vld [vmem:[%s3538_s18 + $0x18] sm:$0xff]  ;;  %v320_v9 = vld [vmem:[%s3538_s18 + $0xa8] sm:$0xff]  ;;  %v303_v10 = vld [vmem:[%s3538_s18 + $0x20] sm:$0xff] }
  0x19   : > { %v321_v11 = vld [vmem:[%s3538_s18 + $0xb0] sm:$0xff]  ;;  %v304_v12 = vld [vmem:[%s3538_s18 + $0x28] sm:$0xff]  ;;  %v322_v13 = vld [vmem:[%s3538_s18 + $0xb8] sm:$0xff] }
  0x1a   : > { %v305_v14 = vld [vmem:[%s3538_s18 + $0x30] sm:$0xff]  ;;  %v323_v15 = vld [vmem:[%s3538_s18 + $0xc0] sm:$0xff]  ;;  %v306_v16 = vld [vmem:[%s3538_s18 + $0x38] sm:$0xff] }
  0x1b   : > { %v324_v17 = vld [vmem:[%s3538_s18 + $0xc8] sm:$0xff]  ;;  %v307_v18 = vld [vmem:[%s3538_s18 + $0x40] sm:$0xff]  ;;  %v325_v19 = vld [vmem:[%s3538_s18 + $0xd0] sm:$0xff] }
  0x1c   : > { %v308_v20 = vld [vmem:[%s3538_s18 + $0x48] sm:$0xff]  ;;  %v326_v21 = vld [vmem:[%s3538_s18 + $0xd8] sm:$0xff]  ;;  %v309_v22 = vld [vmem:[%s3538_s18 + $0x50] sm:$0xff] }
  0x1d   : > { %v310_v23 = vld [vmem:[%s3538_s18 + $0x58] sm:$0xff]  ;;  %v327_v24 = vld [vmem:[%s3538_s18 + $0xe0] sm:$0xff]  ;;  %v328_v25 = vld [vmem:[%s3538_s18 + $0xe8] sm:$0xff] }
  0x1e   : > { %v311_v26 = vld [vmem:[%s3538_s18 + $0x60] sm:$0xff]  ;;  %v312_v30 = vld [vmem:[%s3538_s18 + $0x68] sm:$0xff]  ;;  %v329_v39 = vld [vmem:[%s3538_s18 + $0xf0] sm:$0xff] }
  0x1f   : > { %2962 = vmatmul.msk.f32.gmra.mxu0 %vm334_vm0, %v300_v4  ;;  %2980 = vmatmul.msk.f32.gmra.mxu3 %vm334_vm0, %v318_v5  ;;  %v313_v49 = vld [vmem:[%s3538_s18 + $0x70] sm:$0xff]  ;;  %v330_v53 = vld [vmem:[%s3538_s18 + $0xf8] sm:$0xff] }
  0x27   : > { %2963 = vmatmul.msk.f32.gmra.mxu0 %vm334_vm0, %v301_v6  ;;  %2981 = vmatmul.msk.f32.gmra.mxu3 %vm334_vm0, %v319_v7 }
  0x2f   : > { %2964 = vmatmul.msk.f32.gmra.mxu0 %vm334_vm0, %v302_v8  ;;  %2982 = vmatmul.msk.f32.gmra.mxu3 %vm334_vm0, %v320_v9 }
  0x37   : > { %2965 = vmatmul.msk.f32.gmra.mxu0 %vm334_vm0, %v303_v10  ;;  %2983 = vmatmul.msk.f32.gmra.mxu3 %vm334_vm0, %v321_v11 }
  0x3f   : > { %2966 = vmatmul.msk.f32.gmra.mxu0 %vm334_vm0, %v304_v12  ;;  %2984 = vmatmul.msk.f32.gmra.mxu3 %vm334_vm0, %v322_v13 }
  0x47   : > { %2967 = vmatmul.msk.f32.gmra.mxu0 %vm334_vm0, %v305_v14  ;;  %2985 = vmatmul.msk.f32.gmra.mxu3 %vm334_vm0, %v323_v15 }
  0x4f   : > { %2968 = vmatmul.msk.f32.gmra.mxu0 %vm334_vm0, %v306_v16  ;;  %2986 = vmatmul.msk.f32.gmra.mxu3 %vm334_vm0, %v324_v17 }
  0x57   : > { %2969 = vmatmul.msk.f32.gmra.mxu0 %vm334_vm0, %v307_v18  ;;  %2987 = vmatmul.msk.f32.gmra.mxu3 %vm334_vm0, %v325_v19 }
  0x5f   : > { %2970 = vmatmul.msk.f32.gmra.mxu0 %vm334_vm0, %v308_v20  ;;  %2988 = vmatmul.msk.f32.gmra.mxu3 %vm334_vm0, %v326_v21 }
  0x67   : > { %2971 = vmatmul.msk.f32.gmra.mxu0 %vm334_vm0, %v309_v22  ;;  %2989 = vmatmul.msk.f32.gmra.mxu3 %vm334_vm0, %v327_v24 }
  0x6f   : > { %2972 = vmatmul.msk.f32.gmra.mxu0 %vm334_vm0, %v310_v23  ;;  %2990 = vmatmul.msk.f32.gmra.mxu3 %vm334_vm0, %v328_v25 }
  0x77   : > { %2973 = vmatmul.msk.f32.gmra.mxu0 %vm334_vm0, %v311_v26  ;;  %2991 = vmatmul.msk.f32.gmra.mxu3 %vm334_vm0, %v329_v39 }
  0x7f   : > { %2974 = vmatmul.msk.f32.gmra.mxu0 %vm334_vm0, %v312_v30  ;;  %2992 = vmatmul.msk.f32.gmra.mxu3 %vm334_vm0, %v330_v53 }
  0x87   : > { %2975 = vmatmul.msk.f32.gmra.mxu0 %vm334_vm0, %v313_v49 }
  0x94   : > { %v448_v29 = vpop.f32.mrf.mxu0 }
  0x95   : > { %v449_v31 = vadd.f32 %v448_v29, %v3593_v28 }
  0x97   : > { %v576_v32 = vmin.f32 %v449_v31, 0.0  ;;  %vm544_vm2 = vcmp.gt.f32.partialorder %v449_v31, 0.0 }
  0x99   : > { %v608_v33 = vmul.f32 1.442695, %v576_v32 }
  0x9a   : > { %v502_v34 = vpop.f32.mrf.mxu3 }
  0x9b   : > { %3168 = vpow2.f32 %v608_v33  ;;  %v503_v35 = vadd.f32 %v502_v34, %v3593_v28 }
  0x9c   : > { %v451_v36 = vpop.f32.mrf.mxu0 }
  0x9d   : > { %v594_v37 = vmin.f32 %v503_v35, 0.0  ;;  %v452_v38 = vadd.f32 %v451_v36, %v3593_v28  ;;  %vm562_vm3 = vcmp.gt.f32.partialorder %v503_v35, 0.0 }
  0x9f   : > { %v644_v40 = vmul.f32 1.442695, %v594_v37  ;;  %v577_v41 = vmin.f32 %v452_v38, 0.0  ;;  %vm545_vm4 = vcmp.gt.f32.partialorder %v452_v38, 0.0 }
  0xa1   : > { %v3169_v42 = vpop.eup %3168  ;;  %3170 = vpow2.f32 %v644_v40  ;;  %v610_v43 = vmul.f32 1.442695, %v577_v41 }
  0xa2   : > { %v505_v44 = vpop.f32.mrf.mxu3  ;;  %v2993_v45 = vadd.f32 -1.0, %v3169_v42 }
  0xa3   : > { %3172 = vpow2.f32 %v610_v43  ;;  %v506_v46 = vadd.f32 %v505_v44, %v3593_v28 }
  0xa4   : > { %v454_v47 = vpop.f32.mrf.mxu0  ;;  %v3603_v48 = vsel %vm544_vm2, %v449_v31, %v2993_v45  ;;  %v314_v45 = vld [vmem:[%s3538_s18 + $0x78] sm:$0xff] }
  0xa5   : > { %v595_v50 = vmin.f32 %v506_v46, 0.0  ;;  %v455_v51 = vadd.f32 %v454_v47, %v3593_v28  ;;  %v737_v52 = vsel %vm736_vm1, %v3603_v48, 0.0  ;;  %vm563_vm5 = vcmp.gt.f32.partialorder %v506_v46, 0.0  ;;  %2976 = vmatmul.msk.f32.gmra.mxu0 %vm334_vm0, %v314_v45 }
  0xa6   : > { %738 = vadd.xlane.f32.xlu0 %v737_v52 }
  0xa7   : > { %v3171_v54 = vpop.eup %3170  ;;  %v646_v55 = vmul.f32 1.442695, %v595_v50  ;;  %v578_v56 = vmin.f32 %v455_v51, 0.0  ;;  %vm546_vm6 = vcmp.gt.f32.partialorder %v455_v51, 0.0 }
  0xa8   : > { %v3011_v57 = vadd.f32 -1.0, %v3171_v54 }
  0xa9   : > { %v3173_v58 = vpop.eup %3172  ;;  %3174 = vpow2.f32 %v646_v55  ;;  %v612_v59 = vmul.f32 1.442695, %v578_v56 }
  0xaa   : > { %v508_v60 = vpop.f32.mrf.mxu3  ;;  %v3612_v61 = vsel %vm562_vm3, %v503_v35, %v3011_v57  ;;  %v2994_v62 = vadd.f32 -1.0, %v3173_v58 }
  0xab   : > { %3176 = vpow2.f32 %v612_v59  ;;  %v509_v63 = vadd.f32 %v508_v60, %v3593_v28  ;;  %v791_v0 = vsel %vm736_vm1, %v3612_v61, 0.0 }
  0xac   : > { %792 = vadd.xlane.f32.xlu1 %v791_v0  ;;  %v457_v1 = vpop.f32.mrf.mxu0  ;;  %v3617_v2 = vsel %vm545_vm4, %v452_v38, %v2994_v62 }
  0xad   : > { %v596_v3 = vmin.f32 %v509_v63, 0.0  ;;  %v458_v4 = vadd.f32 %v457_v1, %v3593_v28  ;;  %v740_v5 = vsel %vm736_vm1, %v3617_v2, 0.0  ;;  %vm564_vm7 = vcmp.gt.f32.partialorder %v509_v63, 0.0 }
  0xae   : > { %741 = vadd.xlane.f32.xlu0 %v740_v5 }
  0xaf   : > { %v3175_v6 = vpop.eup %3174  ;;  %v648_v7 = vmul.f32 1.442695, %v596_v3  ;;  %v579_v8 = vmin.f32 %v458_v4, 0.0  ;;  %vm547_vm8 = vcmp.gt.f32.partialorder %v458_v4, 0.0 }
  0xb0   : > { %v3012_v9 = vadd.f32 -1.0, %v3175_v6 }
  0xb1   : > { %v3177_v10 = vpop.eup %3176  ;;  %3178 = vpow2.f32 %v648_v7  ;;  %v614_v11 = vmul.f32 1.442695, %v579_v8 }
  0xb2   : > { %v511_v12 = vpop.f32.mrf.mxu3  ;;  %v3622_v13 = vsel %vm563_vm5, %v506_v46, %v3012_v9  ;;  %v2995_v14 = vadd.f32 -1.0, %v3177_v10 }
  0xb3   : > { %3180 = vpow2.f32 %v614_v11  ;;  %v512_v15 = vadd.f32 %v511_v12, %v3593_v28  ;;  %v794_v16 = vsel %vm736_vm1, %v3622_v13, 0.0 }
  0xb4   : > { %795 = vadd.xlane.f32.xlu2 %v794_v16  ;;  %v460_v17 = vpop.f32.mrf.mxu0  ;;  %v3627_v18 = vsel %vm546_vm6, %v455_v51, %v2995_v14 }
  0xb5   : > { %v597_v19 = vmin.f32 %v512_v15, 0.0  ;;  %v461_v20 = vadd.f32 %v460_v17, %v3593_v28  ;;  %v743_v21 = vsel %vm736_vm1, %v3627_v18, 0.0  ;;  %vm565_vm9 = vcmp.gt.f32.partialorder %v512_v15, 0.0 }
  0xb6   : > { %744 = vadd.xlane.f32.xlu1 %v743_v21 }
  0xb7   : > { %v3179_v22 = vpop.eup %3178  ;;  %v650_v23 = vmul.f32 1.442695, %v597_v19  ;;  %v580_v24 = vmin.f32 %v461_v20, 0.0  ;;  %vm548_vm10 = vcmp.gt.f32.partialorder %v461_v20, 0.0 }
  0xb8   : > { %v3013_v25 = vadd.f32 -1.0, %v3179_v22 }
  0xb9   : > { %v3181_v26 = vpop.eup %3180  ;;  %3182 = vpow2.f32 %v650_v23  ;;  %v616_v27 = vmul.f32 1.442695, %v580_v24 }
  0xba   : > { %v514_v29 = vpop.f32.mrf.mxu3  ;;  %v3632_v30 = vsel %vm564_vm7, %v509_v63, %v3013_v25  ;;  %v2996_v31 = vadd.f32 -1.0, %v3181_v26 }
  0xbb   : > { %3184 = vpow2.f32 %v616_v27  ;;  %v515_v32 = vadd.f32 %v514_v29, %v3593_v28  ;;  %v797_v33 = vsel %vm736_vm1, %v3632_v30, 0.0 }
  0xbc   : > { %v463_v34 = vpop.f32.mrf.mxu0  ;;  %798 = vadd.xlane.f32.xlu0 %v797_v33  ;;  %v3637_v35 = vsel %vm547_vm8, %v458_v4, %v2996_v31 }
  0xbd   : > { %v598_v36 = vmin.f32 %v515_v32, 0.0  ;;  %v464_v37 = vadd.f32 %v463_v34, %v3593_v28  ;;  %v746_v38 = vsel %vm736_vm1, %v3637_v35, 0.0  ;;  %vm566_vm11 = vcmp.gt.f32.partialorder %v515_v32, 0.0 }
  0xbe   : > { %747 = vadd.xlane.f32.xlu2 %v746_v38 }
  0xbf   : > { %v3183_v39 = vpop.eup %3182  ;;  %v652_v40 = vmul.f32 1.442695, %v598_v36  ;;  %v581_v41 = vmin.f32 %v464_v37, 0.0  ;;  %vm549_vm12 = vcmp.gt.f32.partialorder %v464_v37, 0.0 }
  0xc0   : > { %v3014_v42 = vadd.f32 -1.0, %v3183_v39 }
  0xc1   : > { %v3185_v43 = vpop.eup %3184  ;;  %3186 = vpow2.f32 %v652_v40  ;;  %v618_v44 = vmul.f32 1.442695, %v581_v41 }
  0xc2   : > { %v517_v46 = vpop.f32.mrf.mxu3  ;;  %v3643_v47 = vsel %vm565_vm9, %v512_v15, %v3014_v42  ;;  %v2997_v49 = vadd.f32 -1.0, %v3185_v43 }
  0xc3   : > { %3188 = vpow2.f32 %v618_v44  ;;  %v518_v50 = vadd.f32 %v517_v46, %v3593_v28  ;;  %v800_v55 = vsel %vm736_vm1, %v3643_v47, 0.0 }
  0xc4   : > { %v466_v51 = vpop.f32.mrf.mxu0  ;;  %v3647_v52 = vsel %vm548_vm10, %v461_v20, %v2997_v49 }
  0xc5   : > { %v599_v53 = vmin.f32 %v518_v50, 0.0  ;;  %v467_v54 = vadd.f32 %v466_v51, %v3593_v28  ;;  %v749_v56 = vsel %vm736_vm1, %v3647_v52, 0.0  ;;  %vm567_vm13 = vcmp.gt.f32.partialorder %v518_v50, 0.0 }
  0xc6   : > { %801 = vadd.xlane.f32.xlu2 %v800_v55  ;;  %750 = vadd.xlane.f32.xlu1 %v749_v56 }
  0xc7   : > { %v3187_v57 = vpop.eup %3186  ;;  %v654_v58 = vmul.f32 1.442695, %v599_v53  ;;  %v582_v59 = vmin.f32 %v467_v54, 0.0  ;;  %vm550_vm14 = vcmp.gt.f32.partialorder %v467_v54, 0.0 }
  0xc8   : > { %v3015_v60 = vadd.f32 -1.0, %v3187_v57 }
  0xc9   : > { %v3189_v62 = vpop.eup %3188  ;;  %3190 = vpow2.f32 %v654_v58  ;;  %v620_v63 = vmul.f32 1.442695, %v582_v59 }
  0xca   : > { %v520_v0 = vpop.f32.mrf.mxu3  ;;  %v3654_v1 = vsel %vm566_vm11, %v515_v32, %v3015_v60  ;;  %v2998_v3 = vadd.f32 -1.0, %v3189_v62 }
  0xcb   : > { %3192 = vpow2.f32 %v620_v63  ;;  %v521_v4 = vadd.f32 %v520_v0, %v3593_v28  ;;  %v803_v9 = vsel %vm736_vm1, %v3654_v1, 0.0 }
  0xcc   : > { %v469_v5 = vpop.f32.mrf.mxu0  ;;  %v3657_v6 = vsel %vm549_vm12, %v464_v37, %v2998_v3 }
  0xcd   : > { %v600_v7 = vmin.f32 %v521_v4, 0.0  ;;  %v470_v8 = vadd.f32 %v469_v5, %v3593_v28  ;;  %v752_v10 = vsel %vm736_vm1, %v3657_v6, 0.0  ;;  %vm568_vm15 = vcmp.gt.f32.partialorder %v521_v4, 0.0 }
  0xce   : > { %804 = vadd.xlane.f32.xlu1 %v803_v9  ;;  %753 = vadd.xlane.f32.xlu0 %v752_v10 }
  0xcf   : > { %v3191_v11 = vpop.eup %3190  ;;  %v656_v12 = vmul.f32 1.442695, %v600_v7  ;;  %v583_v14 = vmin.f32 %v470_v8, 0.0  ;;  %vm551_vm2 = vcmp.gt.f32.partialorder %v470_v8, 0.0 }
  0xd0   : > { %v3016_v15 = vadd.f32 -1.0, %v3191_v11 }
  0xd1   : > { %v3193_v16 = vpop.eup %3192  ;;  %3194 = vpow2.f32 %v656_v12  ;;  %v622_v17 = vmul.f32 1.442695, %v583_v14 }
  0xd2   : > { %v523_v19 = vpop.f32.mrf.mxu3  ;;  %v3664_v20 = vsel %vm567_vm13, %v518_v50, %v3016_v15  ;;  %v2999_v21 = vadd.f32 -1.0, %v3193_v16 }
  0xd3   : > { %3196 = vpow2.f32 %v622_v17  ;;  %v524_v22 = vadd.f32 %v523_v19, %v3593_v28  ;;  %v806_v27 = vsel %vm736_vm1, %v3664_v20, 0.0 }
  0xd4   : > { %v472_v23 = vpop.f32.mrf.mxu0  ;;  %v3667_v24 = vsel %vm550_vm14, %v467_v54, %v2999_v21  ;;  %v3456_v21 = vmov 64.0  }
  0xd5   : > { %v473_v25 = vadd.f32 %v472_v23, %v3593_v28  ;;  %v601_v26 = vmin.f32 %v524_v22, 0.0  ;;  %v755_v29 = vsel %vm736_vm1, %v3667_v24, 0.0  ;;  %vm569_vm3 = vcmp.gt.f32.partialorder %v524_v22, 0.0 }
  0xd6   : > { %807 = vadd.xlane.f32.xlu1 %v806_v27  ;;  %756 = vadd.xlane.f32.xlu0 %v755_v29 }
  0xd7   : > { %v3195_v31 = vpop.eup %3194  ;;  %v584_v32 = vmin.f32 %v473_v25, 0.0  ;;  %v658_v33 = vmul.f32 1.442695, %v601_v26  ;;  %vm552_vm4 = vcmp.gt.f32.partialorder %v473_v25, 0.0 }
  0xd8   : > { %v3017_v34 = vadd.f32 -1.0, %v3195_v31 }
  0xd9   : > { %v3197_v36 = vpop.eup %3196  ;;  %v624_v37 = vmul.f32 1.442695, %v584_v32  ;;  %3198 = vpow2.f32 %v658_v33 }
  0xda   : > { %v526_v38 = vpop.f32.mrf.mxu3  ;;  %v3674_v39 = vsel %vm568_vm15, %v521_v4, %v3017_v34  ;;  %v3000_v40 = vadd.f32 -1.0, %v3197_v36 }
  0xdb   : > { %3200 = vpow2.f32 %v624_v37  ;;  %v527_v41 = vadd.f32 %v526_v38, %v3593_v28  ;;  %v809_v42 = vsel %vm736_vm1, %v3674_v39, 0.0 }
  0xdc   : > { %v475_v43 = vpop.f32.mrf.mxu0  ;;  %810 = vadd.xlane.f32.xlu2 %v809_v42  ;;  %v3679_v44 = vsel %vm551_vm2, %v470_v8, %v3000_v40 }
  0xdd   : > { %v476_v45 = vadd.f32 %v475_v43, %v3593_v28  ;;  %v602_v46 = vmin.f32 %v527_v41, 0.0  ;;  %v758_v49 = vsel %vm736_vm1, %v3679_v44, 0.0  ;;  %vm570_vm5 = vcmp.gt.f32.partialorder %v527_v41, 0.0 }
  0xde   : > { %759 = vadd.xlane.f32.xlu0 %v758_v49 }
  0xdf   : > { %v3199_v50 = vpop.eup %3198  ;;  %v585_v51 = vmin.f32 %v476_v45, 0.0  ;;  %v660_v53 = vmul.f32 1.442695, %v602_v46  ;;  %vm553_vm6 = vcmp.gt.f32.partialorder %v476_v45, 0.0 }
  0xe0   : > { %v3018_v54 = vadd.f32 -1.0, %v3199_v50 }
  0xe1   : > { %v3201_v55 = vpop.eup %3200  ;;  %v626_v56 = vmul.f32 1.442695, %v585_v51  ;;  %3202 = vpow2.f32 %v660_v53 }
  0xe2   : > { %v3001_v57 = vadd.f32 -1.0, %v3201_v55  ;;  %v3684_v58 = vsel %vm569_vm3, %v524_v22, %v3018_v54  ;;  %v529_v27 = vpop.f32.mrf.mxu3 }
  0xe3   : > { %3204 = vpow2.f32 %v626_v56  ;;  %v812_v59 = vsel %vm736_vm1, %v3684_v58, 0.0  ;;  %v530_v33 = vadd.f32 %v529_v27, %v3593_v28 }
  0xe4   : > { %v478_v60 = vpop.f32.mrf.mxu0  ;;  %v3688_v62 = vsel %vm552_vm4, %v473_v25, %v3001_v57 }
  0xe5   : > { %v479_v63 = vadd.f32 %v478_v60, %v3593_v28  ;;  %v761_v0 = vsel %vm736_vm1, %v3688_v62, 0.0  ;;  %v603_v37 = vmin.f32 %v530_v33, 0.0  ;;  %vm571_vm10 = vcmp.gt.f32.partialorder %v530_v33, 0.0 }
  0xe6   : > { %762 = vadd.xlane.f32.xlu1 %v761_v0  ;;  %813 = vadd.xlane.f32.xlu0 %v812_v59  ;;  %v315_v0 = vld [vmem:[%s3538_s18 + $0x80] sm:$0xff] }
  0xe7   : > { %v3203_v3 = vpop.eup %3202  ;;  %v586_v4 = vmin.f32 %v479_v63, 0.0  ;;  %vm554_vm7 = vcmp.gt.f32.partialorder %v479_v63, 0.0  ;;  %v662_v43 = vmul.f32 1.442695, %v603_v37  ;;  %2977 = vmatmul.msk.f32.gmra.mxu0 %vm334_vm0, %v315_v0  ;;  %v316_v37 = vld [vmem:[%s3538_s18 + $0x88] sm:$0xff]  ;;  %s284_s18 = scalar_lea.vmem [#allocation2], %s2956_s13 }
  0xe8   : > { %v3019_v5 = vadd.f32 -1.0, %v3203_v3 }
  0xe9   : > { %v3205_v7 = vpop.eup %3204  ;;  %v628_v8 = vmul.f32 1.442695, %v586_v4 }
  0xea   : > { %v3002_v9 = vadd.f32 -1.0, %v3205_v7  ;;  %v3693_v10 = vsel %vm570_vm5, %v527_v41, %v3019_v5  ;;  %v532_v40 = vpop.f32.mrf.mxu3 }
  0xeb   : > { %3206 = vpow2.f32 %v628_v8  ;;  %v815_v11 = vsel %vm736_vm1, %v3693_v10, 0.0  ;;  %v3714_v46 = vadd.f32 %v532_v40, %v3593_v28 }
  0xec   : > { %v3697_v12 = vsel %vm553_vm6, %v476_v45, %v3002_v9  ;;  %3208 = vrcp.f32 %v3456_v21  ;;  %v481_v26 = vpop.f32.mrf.mxu0 }
  0xed   : > { %v764_v14 = vsel %vm736_vm1, %v3697_v12, 0.0  ;;  %v482_v31 = vadd.f32 %v481_v26, %v3593_v28  ;;  %v604_v51 = vmin.f32 %v3714_v46, 0.0  ;;  %vm572_vm11 = vcmp.gt.f32.partialorder %v3714_v46, 0.0 }
  0xee   : > { %765 = vadd.xlane.f32.xlu2 %v764_v14  ;;  %816 = vadd.xlane.f32.xlu1 %v815_v11 }
  0xef   : > { %v587_v34 = vmin.f32 %v482_v31, 0.0  ;;  %v664_v59 = vmul.f32 1.442695, %v604_v51  ;;  %vm555_vm9 = vcmp.gt.f32.partialorder %v482_v31, 0.0  ;;  %2978 = vmatmul.msk.f32.gmra.mxu0 %vm334_vm0, %v316_v37 }
  0xf1   : > { %v3207_v15 = vpop.eup %3206  ;;  %v630_v41 = vmul.f32 1.442695, %v587_v34 }
  0xf2   : > { %v3003_v16 = vadd.f32 -1.0, %v3207_v15  ;;  %v3209_v22 = vpop.eup %3208 }
  0xf3   : > { %v834_v23 = vmul.f32 64.0, %v3209_v22  ;;  %vm838_vm8 = vweird.f32 %v3209_v22  ;;  %3210 = vpow2.f32 %v630_v41 }
  0xf4   : > { %v3701_v17 = vsel %vm554_vm7, %v479_v63, %v3003_v16  ;;  %3212 = vpow2.f32 %v662_v43  ;;  %v484_v5 = vpop.f32.mrf.mxu0 }
  0xf5   : > { %v767_v19 = vsel %vm736_vm1, %v3701_v17, 0.0  ;;  %v835_v25 = vsub.f32 1.0, %v834_v23  ;;  %3214 = vpow2.f32 %v664_v59  ;;  %v3747_v23 = vadd.f32 %v484_v5, %v3593_v28 }
  0xf6   : > { %768 = vadd.xlane.f32.xlu0 %v767_v19 }
  0xf7   : > { %v836_v29 = vmul.f32 %v3209_v22, %v835_v25  ;;  %vm556_vm12 = vcmp.gt.f32.partialorder %v3747_v23, 0.0 }
  0xf9   : > { %v837_v32 = vadd.f32 %v3209_v22, %v836_v29  ;;  %v3211_v57 = vpop.eup %3210 }
  0xfa   : > { %v3213_v3 = vpop.eup %3212  ;;  %v3004_v7 = vadd.f32 -1.0, %v3211_v57 }
  0xfb   : > { %v3707_v36 = vsel %vm838_vm8, %v3209_v22, %v837_v32  ;;  %v3020_v14 = vadd.f32 -1.0, %v3213_v3  ;;  %v3215_v26 = vpop.eup %3214 }
  0xfc   : > { %v3737_v16 = vsel %vm555_vm9, %v482_v31, %v3004_v7  ;;  %v487_v34 = vpop.f32.mrf.mxu0 }
  0xfd   : > { %v3749_v25 = vsel %vm571_vm10, %v530_v33, %v3020_v14  ;;  %v770_v27 = vsel %vm736_vm1, %v3737_v16, 0.0 }
  0xfe   : > { %v818_v32 = vsel %vm736_vm1, %v3749_v25, 0.0 }
 0x119   : > { %v739_v38 = vpop.xlane.xlu0 %738 }
 0x11a   : > { %v840_v42 = vmul.f32 %v3707_v36, %v739_v38  ;;  %v588_v38 = vmin.f32 %v3747_v23, 0.0 }
 0x11c   : > { %v3711_v45 = vsub.f32 %v3603_v48, %v840_v42  ;;  %v3021_v42 = vadd.f32 -1.0, %v3215_v26  ;;  %v490_v26 = vpop.f32.mrf.mxu0 }
 0x11e   : > { %v904_v49 = vmul.f32 %v3711_v45, %v3711_v45 }
 0x11f   : > { %v793_v50 = vpop.xlane.xlu1 %792 }
 0x120   : > { %v858_v53 = vmul.f32 %v3707_v36, %v793_v50  ;;  %v936_v54 = vsel %vm736_vm1, %v904_v49, 0.0  ;;  %v3768_v49 = vadd.f32 %v487_v34, %v3593_v28  ;;  %v3809_v34 = vadd.f32 %v490_v26, %v3593_v28 }
 0x121   : > { %937 = vadd.xlane.f32.xlu2 %v936_v54  ;;  %v742_v55 = vpop.xlane.xlu0 %741  ;;  %v3775_v54 = vsel %vm572_vm11, %v3714_v46, %v3021_v42 }
 0x122   : > { %v3722_v48 = vsub.f32 %v3612_v61, %v858_v53  ;;  %v841_v56 = vmul.f32 %v3707_v36, %v742_v55  ;;  %v632_v53 = vmul.f32 1.442695, %v588_v38  ;;  %v589_v57 = vmin.f32 %v3768_v49, 0.0 }
 0x123   : > { %vm557_vm13 = vcmp.gt.f32.partialorder %v3768_v49, 0.0  ;;  %vm558_vm14 = vcmp.gt.f32.partialorder %v3809_v34, 0.0 }
 0x124   : > { %v3726_v60 = vsub.f32 %v3617_v2, %v841_v56  ;;  %v922_v63 = vmul.f32 %v3722_v48, %v3722_v48  ;;  %v535_v2 = vpop.f32.mrf.mxu3  ;;  %v634_v5 = vmul.f32 1.442695, %v589_v57 }
 0x125   : > { %v3743_v21 = vadd.f32 %v535_v2, %v3593_v28 }
 0x126   : > { %v990_v4 = vsel %vm736_vm1, %v922_v63, 0.0  ;;  %v905_v61 = vmul.f32 %v3726_v60, %v3726_v60 }
 0x127   : > { %991 = vadd.xlane.f32.xlu1 %v990_v4  ;;  %v796_v9 = vpop.xlane.xlu2 %795  ;;  %vm573_vm0 = vcmp.gt.f32.partialorder %v3743_v21, 0.0 }
 0x128   : > { %v939_v8 = vsel %vm736_vm1, %v905_v61, 0.0  ;;  %v859_v22 = vmul.f32 %v3707_v36, %v796_v9 }
 0x129   : > { %v745_v11 = vpop.xlane.xlu1 %744  ;;  %940 = vadd.xlane.f32.xlu2 %v939_v8 }
 0x12a   : > { %v842_v15 = vmul.f32 %v3707_v36, %v745_v11  ;;  %v3761_v33 = vsub.f32 %v3622_v13, %v859_v22 }
 0x12c   : > { %v3740_v19 = vsub.f32 %v3627_v18, %v842_v15  ;;  %v605_v18 = vmin.f32 %v3743_v21, 0.0  ;;  %v923_v55 = vmul.f32 %v3761_v33, %v3761_v33  ;;  %v538_v14 = vpop.f32.mrf.mxu3 }
 0x12e   : > { %v906_v29 = vmul.f32 %v3740_v19, %v3740_v19  ;;  %v666_v50 = vmul.f32 1.442695, %v605_v18  ;;  %v993_v3 = vsel %vm736_vm1, %v923_v55, 0.0 }
 0x12f   : > { %771 = vadd.xlane.f32.xlu1 %v770_v27  ;;  %v799_v40 = vpop.xlane.xlu0 %798 }
 0x130   : > { %v942_v31 = vsel %vm736_vm1, %v906_v29, 0.0  ;;  %v860_v13 = vmul.f32 %v3707_v36, %v799_v40  ;;  %3216 = vpow2.f32 %v666_v50 }
 0x131   : > { %v748_v41 = vpop.xlane.xlu2 %747  ;;  %943 = vadd.xlane.f32.xlu0 %v942_v31  ;;  %819 = vadd.xlane.f32.xlu2 %v818_v32  ;;  %3218 = vpow2.f32 %v632_v53 }
 0x132   : > { %v843_v43 = vmul.f32 %v3707_v36, %v748_v41  ;;  %v3783_v59 = vsub.f32 %v3632_v30, %v860_v13  ;;  %3220 = vpow2.f32 %v634_v5  ;;  %v3817_v41 = vadd.f32 %v538_v14, %v3593_v28 }
 0x133   : > { %v590_v13 = vmin.f32 %v3809_v34, 0.0 }
 0x134   : > { %v3772_v51 = vsub.f32 %v3637_v35, %v843_v43  ;;  %v821_v35 = vsel %vm736_vm1, %v3775_v54, 0.0  ;;  %v924_v8 = vmul.f32 %v3783_v59, %v3783_v59  ;;  %v541_v55 = vpop.f32.mrf.mxu3  ;;  %vm574_vm15 = vcmp.gt.f32.partialorder %v3817_v41, 0.0 }
 0x136   : > { %v907_v56 = vmul.f32 %v3772_v51, %v3772_v51  ;;  %v3217_v2 = vpop.eup %3216 }
 0x137   : > { %v3219_v15 = vpop.eup %3218  ;;  %v3022_v18 = vadd.f32 -1.0, %v3217_v2 }
 0x138   : > { %v945_v63 = vsel %vm736_vm1, %v907_v56, 0.0  ;;  %v3005_v32 = vadd.f32 -1.0, %v3219_v15  ;;  %v3221_v38 = vpop.eup %3220 }
 0x139   : > { %v802_v46 = vpop.xlane.xlu2 %801  ;;  %946 = vadd.xlane.f32.xlu1 %v945_v63  ;;  %v751_v0 = vpop.xlane.xlu1 %750  ;;  %822 = vadd.xlane.f32.xlu0 %v821_v35  ;;  %v3820_v42 = vsel %vm573_vm0, %v3743_v21, %v3022_v18  ;;  %v3006_v56 = vadd.f32 -1.0, %v3221_v38  ;;  %v606_v21 = vmin.f32 %v3817_v41, 0.0 }
 0x13a   : > { %v861_v4 = vmul.f32 %v3707_v36, %v802_v46  ;;  %v844_v61 = vmul.f32 %v3707_v36, %v751_v0  ;;  %994 = vadd.xlane.f32.xlu2 %v993_v3  ;;  %v3823_v43 = vsel %vm556_vm12, %v3747_v23, %v3005_v32  ;;  %v636_v0 = vmul.f32 1.442695, %v590_v13 }
 0x13b   : > { %v773_v63 = vsel %vm736_vm1, %v3823_v43, 0.0  ;;  %v668_v5 = vmul.f32 1.442695, %v606_v21 }
 0x13c   : > { %v3792_v30 = vsub.f32 %v3643_v47, %v861_v4  ;;  %v3795_v7 = vsub.f32 %v3647_v52, %v844_v61  ;;  %v996_v52 = vsel %vm736_vm1, %v924_v8, 0.0  ;;  %v3844_v4 = vadd.f32 %v541_v55, %v3593_v28 }
 0x13d   : > { %v3847_v61 = vsel %vm557_vm13, %v3768_v49, %v3006_v56  ;;  %3222 = vpow2.f32 %v636_v0 }
 0x13e   : > { %v925_v9 = vmul.f32 %v3792_v30, %v3792_v30  ;;  %v908_v11 = vmul.f32 %v3795_v7, %v3795_v7  ;;  %v607_v14 = vmin.f32 %v3844_v4, 0.0  ;;  %3224 = vpow2.f32 %v668_v5 }
 0x13f   : > { %vm575_vm2 = vcmp.gt.f32.partialorder %v3844_v4, 0.0 }
 0x140   : > { %v999_v22 = vsel %vm736_vm1, %v925_v9, 0.0  ;;  %v948_v47 = vsel %vm736_vm1, %v908_v11, 0.0  ;;  %v776_v11 = vsel %vm736_vm1, %v3847_v61, 0.0 }
 0x141   : > { %1000 = vadd.xlane.f32.xlu1 %v999_v22  ;;  %v805_v27 = vpop.xlane.xlu1 %804  ;;  %997 = vadd.xlane.f32.xlu0 %v996_v52  ;;  %v754_v29 = vpop.xlane.xlu0 %753 }
 0x142   : > { %949 = vadd.xlane.f32.xlu2 %v948_v47  ;;  %v845_v31 = vmul.f32 %v3707_v36, %v754_v29  ;;  %v862_v40 = vmul.f32 %v3707_v36, %v805_v27  ;;  %v493_v22 = vpop.f32.mrf.mxu0  ;;  %v670_v29 = vmul.f32 1.442695, %v607_v14 }
 0x143   : > { %v3867_v27 = vadd.f32 %v493_v22, %v3593_v28  ;;  %v3223_v38 = vpop.eup %3222 }
 0x144   : > { %v3813_v37 = vsub.f32 %v3657_v6, %v845_v31  ;;  %v824_v6 = vsel %vm736_vm1, %v3820_v42, 0.0  ;;  %v3832_v57 = vsub.f32 %v3654_v1, %v862_v40  ;;  %v3225_v40 = vpop.eup %3224  ;;  %3226 = vpow2.f32 %v670_v29 }
 0x145   : > { %v3007_v55 = vadd.f32 -1.0, %v3223_v38  ;;  %vm559_vm3 = vcmp.gt.f32.partialorder %v3867_v27, 0.0 }
 0x146   : > { %v909_v50 = vmul.f32 %v3813_v37, %v3813_v37  ;;  %v926_v8 = vmul.f32 %v3832_v57, %v3832_v57 }
 0x147   : > { %v3890_v0 = vsel %vm558_vm14, %v3809_v34, %v3007_v55  ;;  %v1519_v55 = vld [vmem:[%s5960_s3 + $0x28] sm:$0xff] }
 0x148   : > { %v951_v53 = vsel %vm736_vm1, %v909_v50, 0.0  ;;  %v1002_v47 = vsel %vm736_vm1, %v926_v8, 0.0  ;;  %v591_v50 = vmin.f32 %v3867_v27, 0.0 }
 0x149   : > { %825 = vadd.xlane.f32.xlu1 %v824_v6  ;;  %v808_v23 = vpop.xlane.xlu1 %807  ;;  %952 = vadd.xlane.f32.xlu0 %v951_v53  ;;  %v757_v35 = vpop.xlane.xlu0 %756 }
 0x14a   : > { %774 = vadd.xlane.f32.xlu2 %v773_v63  ;;  %v846_v46 = vmul.f32 %v3707_v36, %v757_v35  ;;  %v863_v3 = vmul.f32 %v3707_v36, %v808_v23  ;;  %v3023_v23 = vadd.f32 -1.0, %v3225_v40  ;;  %v638_v63 = vmul.f32 1.442695, %v591_v50 }
 0x14c   : > { %v3841_v1 = vsub.f32 %v3667_v24, %v846_v46  ;;  %v3856_v24 = vsub.f32 %v3664_v20, %v863_v3  ;;  %v3227_v3 = vpop.eup %3226  ;;  %v3895_v8 = vsel %vm574_vm15, %v3817_v41, %v3023_v23  ;;  %3228 = vpow2.f32 %v638_v63  ;;  %v1516_v23 = vld [vmem:[%s5960_s3 + $0x10] sm:$0xff]  ;;  %v1515_v63 = vld [vmem:[%s5960_s3 + $0x8] sm:$0xff] }
 0x14d   : > { %v827_v34 = vsel %vm736_vm1, %v3895_v8, 0.0 }
 0x14e   : > { %v910_v2 = vmul.f32 %v3841_v1, %v3841_v1  ;;  %v927_v31 = vmul.f32 %v3856_v24, %v3856_v24 }
 0x14f   : > { %v811_v9 = vpop.xlane.xlu2 %810 }
 0x150   : > { %v864_v49 = vmul.f32 %v3707_v36, %v811_v9  ;;  %v954_v15 = vsel %vm736_vm1, %v910_v2, 0.0  ;;  %v1005_v13 = vsel %vm736_vm1, %v927_v31, 0.0  ;;  %v779_v9 = vsel %vm736_vm1, %v3890_v0, 0.0 }
 0x151   : > { %777 = vadd.xlane.f32.xlu0 %v776_v11  ;;  %955 = vadd.xlane.f32.xlu1 %v954_v15  ;;  %v760_v52 = vpop.xlane.xlu0 %759 }
 0x152   : > { %v3863_v26 = vsub.f32 %v3674_v39, %v864_v49  ;;  %1003 = vadd.xlane.f32.xlu2 %v1002_v47  ;;  %v847_v20 = vmul.f32 %v3707_v36, %v760_v52  ;;  %v3024_v49 = vadd.f32 -1.0, %v3227_v3 }
 0x154   : > { %v3870_v18 = vsub.f32 %v3679_v44, %v847_v20  ;;  %v928_v32 = vmul.f32 %v3863_v26, %v3863_v26  ;;  %v3912_v47 = vsel %vm575_vm2, %v3844_v4, %v3024_v49 }
 0x155   : > { %v830_v31 = vsel %vm736_vm1, %v3912_v47, 0.0 }
 0x156   : > { %v911_v39 = vmul.f32 %v3870_v18, %v3870_v18  ;;  %v1008_v6 = vsel %vm736_vm1, %v928_v32, 0.0 }
 0x158   : > { %v957_v44 = vsel %vm736_vm1, %v911_v39, 0.0 }
 0x159   : > { %v763_v53 = vpop.xlane.xlu1 %762  ;;  %1006 = vadd.xlane.f32.xlu0 %v1005_v13  ;;  %1009 = vadd.xlane.f32.xlu1 %v1008_v6  ;;  %v814_v21 = vpop.xlane.xlu0 %813 }
 0x15a   : > { %v848_v56 = vmul.f32 %v3707_v36, %v763_v53  ;;  %958 = vadd.xlane.f32.xlu2 %v957_v44  ;;  %v865_v46 = vmul.f32 %v3707_v36, %v814_v21  ;;  %v1517_v21 = vld [vmem:[%s5960_s3 + $0x18] sm:$0xff] }
 0x15c   : > { %v3886_v35 = vsub.f32 %v3688_v62, %v848_v56  ;;  %v3901_v62 = vsub.f32 %v3684_v58, %v865_v46  ;;  %v3229_v58 = vpop.eup %3228  ;;  %v1518_v56 = vld [vmem:[%s5960_s3 + $0x20] sm:$0xff] }
 0x15d   : > { %v3008_v32 = vadd.f32 -1.0, %v3229_v58  ;;  %v1514_v46 = vld [vmem:[%s5960_s3] sm:$0xff] }
 0x15e   : > { %v912_v5 = vmul.f32 %v3886_v35, %v3886_v35  ;;  %v929_v52 = vmul.f32 %v3901_v62, %v3901_v62 }
 0x15f   : > { %v3933_v50 = vsel %vm559_vm3, %v3867_v27, %v3008_v32  ;;  %v1520_v27 = vld [vmem:[%s5960_s3 + $0x30] sm:$0xff] }
 0x160   : > { %v960_v2 = vsel %vm736_vm1, %v912_v5, 0.0  ;;  %v1011_v4 = vsel %vm736_vm1, %v929_v52, 0.0  ;;  %v782_v6 = vsel %vm736_vm1, %v3933_v50, 0.0 }
 0x161   : > { %v766_v11 = vpop.xlane.xlu2 %765  ;;  %v817_v14 = vpop.xlane.xlu1 %816  ;;  %961 = vadd.xlane.f32.xlu0 %v960_v2  ;;  %780 = vadd.xlane.f32.xlu1 %v779_v9 }
 0x162   : > { %v849_v41 = vmul.f32 %v3707_v36, %v766_v11  ;;  %828 = vadd.xlane.f32.xlu2 %v827_v34  ;;  %v866_v22 = vmul.f32 %v3707_v36, %v817_v14 }
 0x164   : > { %v3908_v15 = vsub.f32 %v3697_v12, %v849_v41  ;;  %v3919_v29 = vsub.f32 %v3693_v10, %v866_v22 }
 0x166   : > { %v913_v20 = vmul.f32 %v3908_v15, %v3908_v15  ;;  %v930_v10 = vmul.f32 %v3919_v29, %v3919_v29 }
 0x168   : > { %v963_v12 = vsel %vm736_vm1, %v913_v20, 0.0  ;;  %v1014_v44 = vsel %vm736_vm1, %v930_v10, 0.0 }
 0x169   : > { %831 = vadd.xlane.f32.xlu0 %v830_v31  ;;  %964 = vadd.xlane.f32.xlu1 %v963_v12  ;;  %v769_v38 = vpop.xlane.xlu0 %768 }
 0x16a   : > { %1012 = vadd.xlane.f32.xlu2 %v1011_v4  ;;  %v850_v39 = vmul.f32 %v3707_v36, %v769_v38 }
 0x16c   : > { %v3928_v40 = vsub.f32 %v3701_v17, %v850_v39  ;;  %v1521_v17 = vld [vmem:[%s5960_s3 + $0x38] sm:$0xff] }
 0x16d   : > { %1627 = vmatpush.msra.mxu1 %v1521_v17  ;;  %3131 = vmatpush.msra.mxu2 %v1521_v17 }
 0x16e   : > { %v914_v13 = vmul.f32 %v3928_v40, %v3928_v40 }
 0x16f   : > { %1628 = vmatpush.msra.mxu1 %v1520_v27  ;;  %3132 = vmatpush.msra.mxu2 %v1520_v27 }
 0x170   : > { %v966_v53 = vsel %vm736_vm1, %v914_v13, 0.0 }
 0x171   : > { %1015 = vadd.xlane.f32.xlu0 %v1014_v44  ;;  %967 = vadd.xlane.f32.xlu1 %v966_v53 }
 0x172   : > { %783 = vadd.xlane.f32.xlu2 %v782_v6  ;;  %1629 = vmatpush.msra.mxu1 %v1519_v55 }
 0x173   : > { %3133 = vmatpush.msra.mxu2 %v1519_v55 }
 0x174   : > { %1630 = vmatpush.msra.mxu1 %v1518_v56 }
 0x175   : > { %3134 = vmatpush.msra.mxu2 %v1518_v56 }
 0x176   : > { %1631 = vmatpush.msra.mxu1 %v1517_v21 }
 0x177   : > { %3135 = vmatpush.msra.mxu2 %v1517_v21 }
 0x178   : > { %1632 = vmatpush.msra.mxu1 %v1516_v23 }
 0x179   : > { %3136 = vmatpush.msra.mxu2 %v1516_v23 }
 0x17a   : > { %1633 = vmatpush.msra.mxu1 %v1515_v63 }
 0x17b   : > { %3137 = vmatpush.msra.mxu2 %v1515_v63 }
 0x17c   : > { %1634 = vmatpush.msra.mxu1 %v1514_v46 }
 0x17d   : > { %3138 = vmatpush.msra.mxu2 %v1514_v46 }
 0x194   : > { %v938_v3 = vpop.xlane.xlu2 %937 }
 0x195   : > { %v1032_v5 = vmul.f32 %v938_v3, %v3707_v36 }
 0x197   : > { %v1064_v2 = vadd.f32 1e-05, %v1032_v5 }
 0x199   : > { %3230 = vrsqrt.f32 %v1064_v2  ;;  %vm1102_vm5 = vweird.f32 %v1064_v2 }
 0x19a   : > { %v992_v9 = vpop.xlane.xlu1 %991 }
 0x19b   : > { %v1050_v11 = vmul.f32 %v992_v9, %v3707_v36 }
 0x19c   : > { %v941_v14 = vpop.xlane.xlu2 %940 }
 0x19d   : > { %v1082_v34 = vadd.f32 1e-05, %v1050_v11  ;;  %v1033_v49 = vmul.f32 %v941_v14, %v3707_v36 }
 0x19f   : > { %v3231_v41 = vpop.eup %3230  ;;  %3232 = vrsqrt.f32 %v1082_v34  ;;  %v1065_v22 = vadd.f32 1e-05, %v1033_v49  ;;  %vm1282_vm8 = vweird.f32 %v1082_v34 }
 0x1a0   : > { %v1097_v58 = vmul.f32 %v3231_v41, %v1064_v2  ;;  %vm1103_vm4 = vweird.f32 %v3231_v41 }
 0x1a1   : > { %3234 = vrsqrt.f32 %v1065_v22  ;;  %vm1104_vm6 = vmor %vm1102_vm5, %vm1103_vm4  ;;  %vm1112_vm11 = vweird.f32 %v1065_v22 }
 0x1a2   : > { %v1098_v52 = vmul.f32 %v3231_v41, %v1097_v58  ;;  %v772_v20 = vpop.xlane.xlu1 %771 }
 0x1a3   : > { %v851_v31 = vmul.f32 %v3707_v36, %v772_v20 }
 0x1a4   : > { %v1099_v12 = vmul.f32 0.5, %v1098_v52  ;;  %v820_v32 = vpop.xlane.xlu2 %819  ;;  %v944_v4 = vpop.xlane.xlu0 %943 }
 0x1a5   : > { %v3233_v38 = vpop.eup %3232  ;;  %v3970_v39 = vsub.f32 %v3737_v16, %v851_v31  ;;  %v867_v10 = vmul.f32 %v3707_v36, %v820_v32  ;;  %v1034_v13 = vmul.f32 %v944_v4, %v3707_v36 }
 0x1a6   : > { %v1100_v6 = vsub.f32 1.5, %v1099_v12  ;;  %v1277_v44 = vmul.f32 %v3233_v38, %v1082_v34  ;;  %vm1283_vm7 = vweird.f32 %v3233_v38 }
 0x1a7   : > { %v3235_v53 = vpop.eup %3234  ;;  %v3975_v17 = vsub.f32 %v3749_v25, %v867_v10  ;;  %v3977_v27 = vadd.f32 1e-05, %v1034_v13  ;;  %v915_v55 = vmul.f32 %v3970_v39, %v3970_v39  ;;  %v3988_v25 = vld [vmem:[%s5962_s5] sm:$0xff]  ;;  %v496_v13 = vpop.f32.mrf.mxu0  ;;  %vm4003_vm10 = vmor %vm1282_vm8, %vm1283_vm7 }
 0x1a8   : > { %v1101_v56 = vmul.f32 %v3231_v41, %v1100_v6  ;;  %v1278_v16 = vmul.f32 %v3233_v38, %v1277_v44  ;;  %v1107_v21 = vmul.f32 %v3235_v53, %v1065_v22  ;;  %v3991_v46 = vperm.slane %v3988_v25, 1 }
 0x1a9   : > { %3236 = vrsqrt.f32 %v3977_v27  ;;  %v969_v23 = vsel %vm736_vm1, %v915_v55, 0.0  ;;  %v931_v63 = vmul.f32 %v3975_v17, %v3975_v17  ;;  %v3996_v14 = vperm.slane %v3988_v25, 2 }
 0x1aa   : > { %v1105_v3 = vsel %vm1104_vm6, %v3231_v41, %v1101_v56  ;;  %v1279_v5 = vmul.f32 0.5, %v1278_v16  ;;  %v1108_v2 = vmul.f32 %v3235_v53, %v1107_v21  ;;  %970 = vadd.xlane.f32.xlu0 %v969_v23  ;;  %vm1113_vm9 = vweird.f32 %v3235_v53 }
 0x1ab   : > { %v1017_v9 = vsel %vm736_vm1, %v931_v63, 0.0  ;;  %v1416_v11 = vmul.f32 %v1105_v3, %v3711_v45  ;;  %vm1114_vm0 = vmor %vm1112_vm11, %vm1113_vm9  ;;  %v4023_v3 = vadd.f32 %v496_v13, %v3593_v28  ;;  %vm1122_vm13 = vweird.f32 %v3977_v27 }
 0x1ac   : > { %v1280_v49 = vsub.f32 1.5, %v1279_v5  ;;  %v1109_v58 = vmul.f32 0.5, %v1108_v2  ;;  %v947_v52 = vpop.xlane.xlu1 %946  ;;  %1018 = vadd.xlane.f32.xlu2 %v1017_v9  ;;  %v823_v20 = vpop.xlane.xlu0 %822 }
 0x1ad   : > { %v1035_v31 = vmul.f32 %v947_v52, %v3707_v36  ;;  %v995_v41 = vpop.xlane.xlu2 %994  ;;  %v868_v12 = vmul.f32 %v3707_v36, %v823_v20  ;;  %v1449_v32 = vmul.f32 %v3991_v46, %v1416_v11 }
 0x1ae   : > { %v1281_v4 = vmul.f32 %v3233_v38, %v1280_v49  ;;  %v1110_v10 = vsub.f32 1.5, %v1109_v58  ;;  %v1051_v45 = vmul.f32 %v995_v41, %v3707_v36 }
 0x1af   : > { %v3237_v6 = vpop.eup %3236  ;;  %v4007_v34 = vadd.f32 1e-05, %v1035_v31  ;;  %v4010_v55 = vsub.f32 %v3775_v54, %v868_v12  ;;  %v1482_v56 = vadd.f32 %v3996_v14, %v1449_v32 }
 0x1b0   : > { %v1285_v16 = vsel %vm4003_vm10, %v3233_v38, %v1281_v4  ;;  %v1111_v21 = vmul.f32 %v3235_v53, %v1110_v10  ;;  %v1117_v23 = vmul.f32 %v3237_v6, %v3977_v27  ;;  %v4017_v63 = vadd.f32 1e-05, %v1051_v45 }
 0x1b1   : > { %3238 = vrsqrt.f32 %v4007_v34  ;;  %3025 = vmatmul.msk.f32.vlgmr.msra.gmra.mxu1 %vm736_vm1, %v1482_v56  ;;  %v932_v54 = vmul.f32 %v4010_v55, %v4010_v55  ;;  %v1434_v38 = vmul.f32 %v1285_v16, %v3722_v48  ;;  %v592_v48 = vmin.f32 %v4023_v3, 0.0 }
 0x1b2   : > { %v1115_v5 = vsel %vm1114_vm0, %v3235_v53, %v1111_v21  ;;  %v1118_v2 = vmul.f32 %v3237_v6, %v1117_v23  ;;  %3240 = vrsqrt.f32 %v4017_v63  ;;  %vm1123_vm12 = vweird.f32 %v3237_v6  ;;  %v499_v23 = vpop.f32.mrf.mxu0 }
 0x1b3   : > { %v1020_v22 = vsel %vm736_vm1, %v932_v54, 0.0  ;;  %v1417_v9 = vmul.f32 %v1115_v5, %v3726_v60  ;;  %v1467_v52 = vmul.f32 %v3991_v46, %v1434_v38  ;;  %vm1124_vm14 = vmor %vm1122_vm13, %vm1123_vm12  ;;  %v640_v27 = vmul.f32 1.442695, %v592_v48 }
 0x1b4   : > { %v1119_v11 = vmul.f32 0.5, %v1118_v2  ;;  %v1001_v49 = vpop.xlane.xlu1 %1000  ;;  %1021 = vadd.xlane.f32.xlu1 %v1020_v22  ;;  %v998_v58 = vpop.xlane.xlu0 %997  ;;  %vm1132_vm15 = vweird.f32 %v4007_v34  ;;  %vm1292_vm3 = vweird.f32 %v4017_v63 }
 0x1b5   : > { %v1053_v20 = vmul.f32 %v1001_v49, %v3707_v36  ;;  %v950_v31 = vpop.xlane.xlu2 %949  ;;  %v1052_v53 = vmul.f32 %v998_v58, %v3707_v36  ;;  %v1450_v41 = vmul.f32 %v3991_v46, %v1417_v9  ;;  %v1500_v60 = vadd.f32 %v3996_v14, %v1467_v52 }
 0x1b6   : > { %v1120_v12 = vsub.f32 1.5, %v1119_v11  ;;  %v1036_v32 = vmul.f32 %v950_v31, %v3707_v36 }
 0x1b7   : > { %v4036_v4 = vpop.eup %3238  ;;  %v4039_v10 = vadd.f32 1e-05, %v1053_v20  ;;  %v1483_v45 = vadd.f32 %v3996_v14, %v1450_v41  ;;  %v4046_v16 = vadd.f32 1e-05, %v1052_v53  ;;  %3043 = vmatmul.msk.f32.vlgmr.msra.gmra.mxu2 %vm736_vm1, %v1500_v60 }
 0x1b8   : > { %v1121_v13 = vmul.f32 %v3237_v6, %v1120_v12  ;;  %v1127_v44 = vmul.f32 %v4036_v4, %v4007_v34  ;;  %v4044_v56 = vadd.f32 1e-05, %v1036_v32  ;;  %v4049_v21 = vpop.eup %3240  ;;  %vm1133_vm2 = vweird.f32 %v4036_v4 }
 0x1b9   : > { %3242 = vrsqrt.f32 %v4039_v10  ;;  %3026 = vmatmul.msk.f32.gmra.mxu1 %vm736_vm1, %v1483_v45  ;;  %v1287_v2 = vmul.f32 %v4049_v21, %v4017_v63  ;;  %vm4086_vm4 = vmor %vm1132_vm15, %vm1133_vm2  ;;  %vm1293_vm5 = vweird.f32 %v4049_v21  ;;  %vm1312_vm6 = vweird.f32 %v4039_v10 }
 0x1ba   : > { %v1125_v54 = vsel %vm1124_vm14, %v3237_v6, %v1121_v13  ;;  %v1128_v5 = vmul.f32 %v4036_v4, %v1127_v44  ;;  %3244 = vrsqrt.f32 %v4044_v56  ;;  %v4062_v6 = vadd.f32 %v499_v23, %v3593_v28  ;;  %vm4128_vm11 = vmor %vm1292_vm3, %vm1293_vm5 }
 0x1bb   : > { %v1418_v38 = vmul.f32 %v1125_v54, %v3740_v19  ;;  %v1288_v9 = vmul.f32 %v4049_v21, %v1287_v2  ;;  %3246 = vrsqrt.f32 %v4046_v16  ;;  %vm1142_vm7 = vweird.f32 %v4044_v56 }
 0x1bc   : > { %v1129_v22 = vmul.f32 0.5, %v1128_v5  ;;  %v826_v11 = vpop.xlane.xlu1 %825  ;;  %v953_v49 = vpop.xlane.xlu0 %952  ;;  %3248 = vpow2.f32 %v640_v27  ;;  %v593_v44 = vmin.f32 %v4062_v6, 0.0  ;;  %vm1302_vm9 = vweird.f32 %v4046_v16 }
 0x1bd   : > { %v869_v58 = vmul.f32 %v3707_v36, %v826_v11  ;;  %v775_v52 = vpop.xlane.xlu2 %774  ;;  %v1037_v20 = vmul.f32 %v953_v49, %v3707_v36  ;;  %v1451_v31 = vmul.f32 %v3991_v46, %v1418_v38  ;;  %v1289_v19 = vmul.f32 0.5, %v1288_v9 }
 0x1be   : > { %v1130_v53 = vsub.f32 1.5, %v1129_v22  ;;  %v852_v41 = vmul.f32 %v3707_v36, %v775_v52 }
 0x1bf   : > { %v4069_v48 = vpop.eup %3242  ;;  %v4073_v28 = vsub.f32 %v3820_v42, %v869_v58  ;;  %v4075_v12 = vadd.f32 1e-05, %v1037_v20  ;;  %v1484_v32 = vadd.f32 %v3996_v14, %v1451_v31  ;;  %v1290_v45 = vsub.f32 1.5, %v1289_v19 }
 0x1c0   : > { %v1131_v60 = vmul.f32 %v4036_v4, %v1130_v53  ;;  %v1307_v13 = vmul.f32 %v4069_v48, %v4039_v10  ;;  %v4082_v27 = vpop.eup %3244  ;;  %v4093_v42 = vsub.f32 %v3823_v43, %v852_v41  ;;  %vm1313_vm8 = vweird.f32 %v4069_v48 }
 0x1c1   : > { %3250 = vrsqrt.f32 %v4075_v12  ;;  %3027 = vmatmul.msk.f32.gmra.mxu1 %vm736_vm1, %v1484_v32  ;;  %v933_v54 = vmul.f32 %v4073_v28, %v4073_v28  ;;  %v4099_v5 = vpop.eup %3246  ;;  %v1137_v38 = vmul.f32 %v4082_v27, %v4044_v56  ;;  %v1291_v22 = vmul.f32 %v4049_v21, %v1290_v45  ;;  %vm4156_vm12 = vmor %vm1312_vm6, %vm1313_vm8 }
 0x1c2   : > { %v1135_v34 = vsel %vm4086_vm4, %v4036_v4, %v1131_v60  ;;  %v1308_v2 = vmul.f32 %v4069_v48, %v1307_v13  ;;  %v4108_v43 = vpop.eup %3248  ;;  %v1297_v9 = vmul.f32 %v4099_v5, %v4046_v16  ;;  %vm1143_vm10 = vweird.f32 %v4082_v27 }
 0x1c3   : > { %v1023_v4 = vsel %vm736_vm1, %v933_v54, 0.0  ;;  %v1138_v49 = vmul.f32 %v4082_v27, %v1137_v38  ;;  %v916_v52 = vmul.f32 %v4093_v42, %v4093_v42  ;;  %v1419_v32 = vmul.f32 %v1135_v34, %v3772_v51  ;;  %vm4167_vm13 = vmor %vm1142_vm7, %vm1143_vm10 }
 0x1c4   : > { %v1309_v11 = vmul.f32 0.5, %v1308_v2  ;;  %1024 = vadd.xlane.f32.xlu0 %v1023_v4  ;;  %v956_v58 = vpop.xlane.xlu1 %955  ;;  %v778_v20 = vpop.xlane.xlu0 %777  ;;  %v1298_v31 = vmul.f32 %v4099_v5, %v1297_v9  ;;  %v1295_v51 = vsel %vm4128_vm11, %v4049_v21, %v1291_v22  ;;  %vm1303_vm0 = vweird.f32 %v4099_v5 }
 0x1c5   : > { %v1004_v53 = vpop.xlane.xlu2 %1003  ;;  %v1038_v19 = vmul.f32 %v956_v58, %v3707_v36  ;;  %v853_v41 = vmul.f32 %v3707_v36, %v778_v20  ;;  %v1139_v13 = vmul.f32 0.5, %v1138_v49  ;;  %v972_v54 = vsel %vm736_vm1, %v916_v52, 0.0  ;;  %vm4185_vm15 = vmor %vm1302_vm9, %vm1303_vm0 }
 0x1c6   : > { %v1310_v45 = vsub.f32 1.5, %v1309_v11  ;;  %v1054_v23 = vmul.f32 %v1004_v53, %v3707_v36  ;;  %v1299_v34 = vmul.f32 0.5, %v1298_v31  ;;  %973 = vadd.xlane.f32.xlu2 %v972_v54  ;;  %v1452_v63 = vmul.f32 %v3991_v46, %v1419_v32 }
 0x1c7   : > { %v4134_v2 = vpop.eup %3250  ;;  %v4139_v38 = vadd.f32 1e-05, %v1038_v19  ;;  %v1140_v4 = vsub.f32 1.5, %v1139_v13  ;;  %v4146_v49 = vsub.f32 %v3847_v61, %v853_v41  ;;  %v642_v31 = vmul.f32 1.442695, %v593_v44 }
 0x1c8   : > { %v1311_v9 = vmul.f32 %v4069_v48, %v1310_v45  ;;  %v1147_v11 = vmul.f32 %v4134_v2, %v4075_v12  ;;  %v1300_v58 = vsub.f32 1.5, %v1299_v34  ;;  %v4149_v52 = vadd.f32 1e-05, %v1054_v23 }
 0x1c9   : > { %3252 = vrsqrt.f32 %v4139_v38  ;;  %v1141_v22 = vmul.f32 %v4082_v27, %v1140_v4  ;;  %v1485_v20 = vadd.f32 %v3996_v14, %v1452_v63  ;;  %vm1153_vm14 = vweird.f32 %v4134_v2 }
 0x1ca   : > { %v1148_v61 = vmul.f32 %v4134_v2, %v1147_v11  ;;  %v1301_v10 = vmul.f32 %v4099_v5, %v1300_v58  ;;  %3254 = vrsqrt.f32 %v4149_v52  ;;  %v1435_v19 = vmul.f32 %v1295_v51, %v3761_v33 }
 0x1cb   : > { %v1315_v44 = vsel %vm4156_vm12, %v4069_v48, %v1311_v9  ;;  %v1145_v56 = vsel %vm4167_vm13, %v4082_v27, %v1141_v22  ;;  %3028 = vmatmul.msk.f32.gmra.mxu1 %vm736_vm1, %v1485_v20  ;;  %v917_v60 = vmul.f32 %v4146_v49, %v4146_v49  ;;  %vm1152_vm2 = vweird.f32 %v4075_v12 }
 0x1cc   : > { %v1149_v32 = vmul.f32 0.5, %v1148_v61  ;;  %v1010_v33 = vpop.xlane.xlu1 %1009  ;;  %v1007_v48 = vpop.xlane.xlu0 %1006  ;;  %v1305_v27 = vsel %vm4185_vm15, %v4099_v5, %v1301_v10  ;;  %v1468_v45 = vmul.f32 %v3991_v46, %v1435_v19  ;;  %v1420_v63 = vmul.f32 %v1145_v56, %v3795_v7  ;;  %vm4219_vm3 = vmor %vm1152_vm2, %vm1153_vm14 }
 0x1cd   : > { %v1056_v16 = vmul.f32 %v1010_v33, %v3707_v36  ;;  %v959_v13 = vpop.xlane.xlu2 %958  ;;  %v1055_v23 = vmul.f32 %v1007_v48, %v3707_v36  ;;  %v975_v34 = vsel %vm736_vm1, %v917_v60, 0.0  ;;  %v1436_v11 = vmul.f32 %v1305_v27, %v3783_v59 }
 0x1ce   : > { %v1150_v54 = vsub.f32 1.5, %v1149_v32  ;;  %v1039_v51 = vmul.f32 %v959_v13, %v3707_v36  ;;  %v1501_v5 = vadd.f32 %v3996_v14, %v1468_v45  ;;  %976 = vadd.xlane.f32.xlu1 %v975_v34  ;;  %v1453_v59 = vmul.f32 %v3991_v46, %v1420_v63 }
 0x1cf   : > { %v4201_v9 = vpop.eup %3252  ;;  %v4205_v4 = vadd.f32 1e-05, %v1056_v16  ;;  %v4213_v61 = vadd.f32 1e-05, %v1055_v23  ;;  %v1437_v20 = vmul.f32 %v1315_v44, %v3792_v30  ;;  %vm560_vm4 = vcmp.gt.f32.partialorder %v4023_v3, 0.0 }
 0x1d0   : > { %v1151_v58 = vmul.f32 %v4134_v2, %v1150_v54  ;;  %v1157_v21 = vmul.f32 %v4201_v9, %v4139_v38  ;;  %v4211_v22 = vadd.f32 1e-05, %v1039_v51  ;;  %v4215_v7 = vpop.eup %3254  ;;  %3044 = vmatmul.msk.f32.gmra.mxu2 %vm736_vm1, %v1501_v5  ;;  %v1486_v56 = vadd.f32 %v3996_v14, %v1453_v59 }
 0x1d1   : > { %3256 = vrsqrt.f32 %v4205_v4  ;;  %v1317_v10 = vmul.f32 %v4215_v7, %v4149_v52  ;;  %v1469_v41 = vmul.f32 %v3991_v46, %v1436_v11  ;;  %v3009_v30 = vadd.f32 -1.0, %v4108_v43 }
 0x1d2   : > { %v1155_v53 = vsel %vm4219_vm3, %v4134_v2, %v1151_v58  ;;  %v1158_v19 = vmul.f32 %v4201_v9, %v1157_v21  ;;  %3258 = vpow2.f32 %v642_v31  ;;  %v1470_v43 = vmul.f32 %v3991_v46, %v1437_v20 }
 0x1d3   : > { %3260 = vrsqrt.f32 %v4211_v22  ;;  %v1318_v44 = vmul.f32 %v4215_v7, %v1317_v10  ;;  %v1421_v60 = vmul.f32 %v1155_v53, %v3813_v37  ;;  %3029 = vmatmul.msk.f32.gmra.mxu1 %vm736_vm1, %v1486_v56  ;;  %v1502_v31 = vadd.f32 %v3996_v14, %v1469_v41 }
 0x1d4   : > { %v1159_v32 = vmul.f32 0.5, %v1158_v19  ;;  %3262 = vrsqrt.f32 %v4213_v61  ;;  %v781_v2 = vpop.xlane.xlu1 %780  ;;  %v962_v33 = vpop.xlane.xlu0 %961  ;;  %vm1322_vm5 = vweird.f32 %v4149_v52  ;;  %vm1162_vm6 = vweird.f32 %v4139_v38 }
 0x1d5   : > { %v854_v48 = vmul.f32 %v3707_v36, %v781_v2  ;;  %v829_v27 = vpop.xlane.xlu2 %828  ;;  %v1040_v45 = vmul.f32 %v962_v33, %v3707_v36  ;;  %v1319_v16 = vmul.f32 0.5, %v1318_v44  ;;  %v1454_v54 = vmul.f32 %v3991_v46, %v1421_v60 }
 0x1d6   : > { %v1160_v13 = vsub.f32 1.5, %v1159_v32  ;;  %v870_v23 = vmul.f32 %v3707_v36, %v829_v27  ;;  %vm1163_vm7 = vweird.f32 %v4201_v9  ;;  %vm1323_vm8 = vweird.f32 %v4215_v7 }
 0x1d7   : > { %v4248_v51 = vpop.eup %3256  ;;  %v4253_v37 = vsub.f32 %v3890_v0, %v854_v48  ;;  %v4255_v34 = vadd.f32 1e-05, %v1040_v45  ;;  %v1320_v5 = vsub.f32 1.5, %v1319_v16  ;;  %v1487_v12 = vadd.f32 %v3996_v14, %v1454_v54  ;;  %vm4282_vm10 = vmor %vm1162_vm6, %vm1163_vm7 }
 0x1d8   : > { %v4257_v63 = vpop.eup %3258  ;;  %v1161_v11 = vmul.f32 %v4201_v9, %v1160_v13  ;;  %v1337_v58 = vmul.f32 %v4248_v51, %v4205_v4  ;;  %3045 = vmatmul.msk.f32.gmra.mxu2 %vm736_vm1, %v1502_v31  ;;  %v4268_v0 = vsub.f32 %v3895_v8, %v870_v23  ;;  %vm1172_vm9 = vweird.f32 %v4211_v22  ;;  %vm4315_vm0 = vmor %vm1322_vm5, %vm1323_vm8 }
 0x1d9   : > { %v4263_v21 = vpop.eup %3260  ;;  %3264 = vrsqrt.f32 %v4255_v34  ;;  %v1503_v10 = vadd.f32 %v3996_v14, %v1470_v43  ;;  %v1321_v19 = vmul.f32 %v4215_v7, %v1320_v5  ;;  %vm1332_vm11 = vweird.f32 %v4213_v61 }
 0x1da   : > { %v4272_v59 = vpop.eup %3262  ;;  %v1338_v20 = vmul.f32 %v4248_v51, %v1337_v58  ;;  %v1167_v53 = vmul.f32 %v4263_v21, %v4211_v22  ;;  %v918_v41 = vmul.f32 %v4253_v37, %v4253_v37  ;;  %v4294_v44 = vsel %vm560_vm4, %v4023_v3, %v3009_v30 }
 0x1db   : > { %v1327_v56 = vmul.f32 %v4272_v59, %v4213_v61  ;;  %v1165_v38 = vsel %vm4282_vm10, %v4201_v9, %v1161_v11  ;;  %v934_v60 = vmul.f32 %v4268_v0, %v4268_v0  ;;  %3030 = vmatmul.msk.f32.gmra.mxu1 %vm736_vm1, %v1487_v12  ;;  %vm1343_vm12 = vweird.f32 %v4248_v51 }
 0x1dc   : > { %v1339_v32 = vmul.f32 0.5, %v1338_v20  ;;  %v1168_v2 = vmul.f32 %v4263_v21, %v1167_v53  ;;  %v965_v33 = vpop.xlane.xlu1 %964  ;;  %v832_v31 = vpop.xlane.xlu0 %831  ;;  %v978_v27 = vsel %vm736_vm1, %v918_v41, 0.0  ;;  %vm1173_vm13 = vweird.f32 %v4263_v21 }
 0x1dd   : > { %v1328_v48 = vmul.f32 %v4272_v59, %v1327_v56  ;;  %v1041_v3 = vmul.f32 %v965_v33, %v3707_v36  ;;  %v1013_v30 = vpop.xlane.xlu2 %1012  ;;  %v871_v45 = vmul.f32 %v3707_v36, %v832_v31  ;;  %979 = vadd.xlane.f32.xlu0 %v978_v27  ;;  %v1026_v16 = vsel %vm736_vm1, %v934_v60, 0.0  ;;  %vm4347_vm15 = vmor %vm1172_vm9, %vm1173_vm13 }
 0x1de   : > { %v1340_v9 = vsub.f32 1.5, %v1339_v32  ;;  %v1169_v43 = vmul.f32 0.5, %v1168_v2  ;;  %v1057_v13 = vmul.f32 %v1013_v30, %v3707_v36  ;;  %1027 = vadd.xlane.f32.xlu2 %v1026_v16  ;;  %v1422_v58 = vmul.f32 %v1165_v38, %v3841_v1 }
 0x1df   : > { %v4309_v23 = vpop.eup %3264  ;;  %v1329_v5 = vmul.f32 0.5, %v1328_v48  ;;  %v4321_v11 = vadd.f32 1e-05, %v1041_v3  ;;  %v1325_v12 = vsel %vm4315_vm0, %v4215_v7, %v1321_v19  ;;  %vm1333_vm14 = vweird.f32 %v4272_v59 }
 0x1e0   : > { %v1170_v20 = vsub.f32 1.5, %v1169_v43  ;;  %v1177_v52 = vmul.f32 %v4309_v23, %v4255_v34  ;;  %3046 = vmatmul.msk.f32.gmra.mxu2 %vm736_vm1, %v1503_v10  ;;  %v4332_v8 = vadd.f32 1e-05, %v1057_v13  ;;  %v4335_v56 = vsub.f32 %v3912_v47, %v871_v45  ;;  %vm4362_vm3 = vmor %vm1332_vm11, %vm1333_vm14 }
 0x1e1   : > { %v1330_v53 = vsub.f32 1.5, %v1329_v5  ;;  %3266 = vrsqrt.f32 %v4321_v11  ;;  %v4338_v1 = vmul.f32 %v4248_v51, %v1340_v9  ;;  %v1455_v41 = vmul.f32 %v3991_v46, %v1422_v58 }
 0x1e2   : > { %v1171_v7 = vmul.f32 %v4263_v21, %v1170_v20  ;;  %v1178_v19 = vmul.f32 %v4309_v23, %v1177_v52  ;;  %vm1183_vm2 = vweird.f32 %v4309_v23  ;;  %3268 = vrsqrt.f32 %v4332_v8 }
 0x1e3   : > { %v1331_v47 = vmul.f32 %v4272_v59, %v1330_v53  ;;  %v1438_v38 = vmul.f32 %v1325_v12, %v3832_v57  ;;  %v1488_v33 = vadd.f32 %v3996_v14, %v1455_v41  ;;  %v785_v60 = vsel %vm736_vm1, %v4294_v44, 0.0 }
 0x1e4   : > { %v1175_v32 = vsel %vm4347_vm15, %v4263_v21, %v1171_v7  ;;  %v1179_v2 = vmul.f32 0.5, %v1178_v19  ;;  %v968_v31 = vpop.xlane.xlu1 %967  ;;  %v1016_v57 = vpop.xlane.xlu0 %1015  ;;  %v935_v3 = vmul.f32 %v4335_v56, %v4335_v56  ;;  %vm1182_vm4 = vweird.f32 %v4255_v34 }
 0x1e5   : > { %v1335_v21 = vsel %vm4362_vm3, %v4272_v59, %v1331_v47  ;;  %v1471_v48 = vmul.f32 %v3991_v46, %v1438_v38  ;;  %v784_v27 = vpop.xlane.xlu2 %783  ;;  %v1042_v61 = vmul.f32 %v968_v31, %v3707_v36  ;;  %3031 = vmatmul.msk.f32.gmra.mxu1 %vm736_vm1, %v1488_v33  ;;  %786 = vadd.xlane.f32.xlu0 %v785_v60  ;;  %vm1342_vm5 = vweird.f32 %v4205_v4  ;;  %vm4394_vm6 = vmor %vm1182_vm4, %vm1183_vm2 }
 0x1e6   : > { %v1180_v30 = vsub.f32 1.5, %v1179_v2  ;;  %v855_v45 = vmul.f32 %v3707_v36, %v784_v27  ;;  %v1058_v9 = vmul.f32 %v1016_v57, %v3707_v36  ;;  %v1423_v43 = vmul.f32 %v1175_v32, %v3870_v18  ;;  %vm4405_vm7 = vmor %vm1342_vm5, %vm1343_vm12 }
 0x1e7   : > { %v3267_v16 = vpop.eup %3266  ;;  %v1504_v59 = vadd.f32 %v3996_v14, %v1471_v48  ;;  %v4381_v13 = vadd.f32 1e-05, %v1042_v61  ;;  %v1029_v54 = vsel %vm736_vm1, %v935_v3, 0.0  ;;  %v1439_v5 = vmul.f32 %v1335_v21, %v3856_v24 }
 0x1e8   : > { %v1181_v58 = vmul.f32 %v4309_v23, %v1180_v30  ;;  %v1187_v12 = vmul.f32 %v3267_v16, %v4321_v11  ;;  %v4389_v20 = vsub.f32 %v3933_v50, %v855_v45  ;;  %1030 = vadd.xlane.f32.xlu1 %v1029_v54  ;;  %v3269_v18 = vpop.eup %3268  ;;  %v4400_v24 = vadd.f32 1e-05, %v1058_v9 }
 0x1e9   : > { %3047 = vmatmul.msk.f32.gmra.mxu2 %vm736_vm1, %v1504_v59  ;;  %3270 = vrsqrt.f32 %v4381_v13  ;;  %v1456_v34 = vmul.f32 %v3991_v46, %v1423_v43  ;;  %v1347_v7 = vmul.f32 %v3269_v18, %v4332_v8  ;;  %v1345_v19 = vsel %vm4405_vm7, %v4248_v51, %v4338_v1 }
 0x1ea   : > { %v1185_v4 = vsel %vm4394_vm6, %v4309_v23, %v1181_v58  ;;  %v1188_v53 = vmul.f32 %v3267_v16, %v1187_v12  ;;  %3272 = vrsqrt.f32 %v4400_v24  ;;  %v1472_v10 = vmul.f32 %v3991_v46, %v1439_v5 }
 0x1eb   : > { %v1489_v41 = vadd.f32 %v3996_v14, %v1456_v34  ;;  %v1348_v38 = vmul.f32 %v3269_v18, %v1347_v7  ;;  %v919_v32 = vmul.f32 %v4389_v20, %v4389_v20  ;;  %vm561_vm8 = vcmp.gt.f32.partialorder %v4062_v6, 0.0 }
 0x1ec   : > { %v1189_v47 = vmul.f32 0.5, %v1188_v53  ;;  %v1505_v23 = vadd.f32 %v3996_v14, %v1472_v10  ;;  %v3010_v22 = vadd.f32 -1.0, %v4257_v63  ;;  %v1424_v2 = vmul.f32 %v1185_v4, %v3886_v35 }
 0x1ed   : > { %vm1193_vm9 = vweird.f32 %v3267_v16  ;;  %v1349_v1 = vmul.f32 0.5, %v1348_v38  ;;  %3032 = vmatmul.msk.f32.gmra.mxu1 %vm736_vm1, %v1489_v41  ;;  %v981_v33 = vsel %vm736_vm1, %v919_v32, 0.0  ;;  %vm1192_vm10 = vweird.f32 %v4321_v11 }
 0x1ee   : > { %v1190_v51 = vsub.f32 1.5, %v1189_v47  ;;  %982 = vadd.xlane.f32.xlu2 %v981_v33  ;;  %v4430_v31 = vsel %vm561_vm8, %v4062_v6, %v3010_v22  ;;  %v1457_v57 = vmul.f32 %v3991_v46, %v1424_v2  ;;  %v1440_v63 = vmul.f32 %v1345_v19, %v3863_v26  ;;  %vm1194_vm0 = vmor %vm1192_vm10, %vm1193_vm9 }
 0x1ef   : > { %v3271_v60 = vpop.eup %3270  ;;  %v1350_v35 = vsub.f32 1.5, %v1349_v1  ;;  %vm1353_vm11 = vweird.f32 %v3269_v18  ;;  %vm1352_vm12 = vweird.f32 %v4332_v8  ;;  %v788_v6 = vsel %vm736_vm1, %v4430_v31, 0.0 }
 0x1f0   : > { %v1191_v21 = vmul.f32 %v3267_v16, %v1190_v51  ;;  %v1197_v48 = vmul.f32 %v3271_v60, %v4381_v13  ;;  %v3273_v27 = vpop.eup %3272  ;;  %v1490_v11 = vadd.f32 %v3996_v14, %v1457_v57  ;;  %789 = vadd.xlane.f32.xlu1 %v788_v6  ;;  %vm1354_vm13 = vmor %vm1352_vm12, %vm1353_vm11  ;;  %v1473_v45 = vmul.f32 %v3991_v46, %v1440_v63 }
 0x1f1   : > { %3048 = vmatmul.msk.f32.gmra.mxu2 %vm736_vm1, %v1505_v23  ;;  %v1351_v3 = vmul.f32 %v3269_v18, %v1350_v35  ;;  %v1357_v30 = vmul.f32 %v3273_v27, %v4400_v24  ;;  %vm1203_vm14 = vweird.f32 %v3271_v60  ;;  %vm1202_vm15 = vweird.f32 %v4381_v13 }
 0x1f2   : > { %v1195_v61 = vsel %vm1194_vm0, %v3267_v16, %v1191_v21  ;;  %v1198_v26 = vmul.f32 %v3271_v60, %v1197_v48  ;;  %v1506_v12 = vadd.f32 %v3996_v14, %v1473_v45  ;;  %vm1363_vm2 = vweird.f32 %v3273_v27  ;;  %vm1204_vm3 = vmor %vm1202_vm15, %vm1203_vm14 }
 0x1f3   : > { %v1425_v9 = vmul.f32 %v1195_v61, %v3908_v15  ;;  %v1355_v43 = vsel %vm1354_vm13, %v3269_v18, %v1351_v3  ;;  %v1358_v59 = vmul.f32 %v3273_v27, %v1357_v30  ;;  %vm1362_vm4 = vweird.f32 %v4400_v24 }
 0x1f4   : > { %v1199_v8 = vmul.f32 0.5, %v1198_v26  ;;  %v1441_v54 = vmul.f32 %v1355_v43, %v3901_v62  ;;  %vm1364_vm5 = vmor %vm1362_vm4, %vm1363_vm2 }
 0x1f5   : > { %v1359_v58 = vmul.f32 0.5, %v1358_v59  ;;  %3033 = vmatmul.msk.f32.gmra.mxu1 %vm736_vm1, %v1490_v11  ;;  %v1458_v16 = vmul.f32 %v3991_v46, %v1425_v9 }
 0x1f6   : > { %v1200_v5 = vsub.f32 1.5, %v1199_v8  ;;  %v1474_v15 = vmul.f32 %v3991_v46, %v1441_v54 }
 0x1f7   : > { %v1360_v34 = vsub.f32 1.5, %v1359_v58  ;;  %v1491_v50 = vadd.f32 %v3996_v14, %v1458_v16 }
 0x1f8   : > { %v1201_v52 = vmul.f32 %v3271_v60, %v1200_v5  ;;  %v1507_v7 = vadd.f32 %v3996_v14, %v1474_v15 }
 0x1f9   : > { %3049 = vmatmul.msk.f32.gmra.mxu2 %vm736_vm1, %v1506_v12  ;;  %v1361_v18 = vmul.f32 %v3273_v27, %v1360_v34 }
 0x1fa   : > { %v1205_v62 = vsel %vm1204_vm3, %v3271_v60, %v1201_v52 }
 0x1fb   : > { %v1426_v4 = vmul.f32 %v1205_v62, %v3928_v40  ;;  %v1365_v53 = vsel %vm1364_vm5, %v3273_v27, %v1361_v18 }
 0x1fc   : > { %v1442_v13 = vmul.f32 %v1365_v53, %v3919_v29 }
 0x1fd   : > { %3034 = vmatmul.msk.f32.gmra.mxu1 %vm736_vm1, %v1491_v50  ;;  %v1459_v19 = vmul.f32 %v3991_v46, %v1426_v4 }
 0x1fe   : > { %v1475_v41 = vmul.f32 %v3991_v46, %v1442_v13 }
 0x1ff   : > { %v1492_v24 = vadd.f32 %v3996_v14, %v1459_v19 }
 0x200   : > { %v1508_v10 = vadd.f32 %v3996_v14, %v1475_v41 }
 0x201   : > { %3050 = vmatmul.msk.f32.gmra.mxu2 %vm736_vm1, %v1507_v7 }
 0x205   : > { %3035 = vmatmul.msk.f32.gmra.mxu1 %vm736_vm1, %v1492_v24 }
 0x209   : > { %3051 = vmatmul.msk.f32.gmra.mxu2 %vm736_vm1, %v1508_v10 }
 0x21d   : > { %v971_v40 = vpop.xlane.xlu0 %970 }
 0x21e   : > { %v1043_v47 = vmul.f32 %v971_v40, %v3707_v36 }
 0x21f   : > { %v1019_v29 = vpop.xlane.xlu2 %1018 }
 0x220   : > { %v1075_v38 = vadd.f32 1e-05, %v1043_v47  ;;  %v1059_v32 = vmul.f32 %v1019_v29, %v3707_v36 }
 0x222   : > { %3274 = vrsqrt.f32 %v1075_v38  ;;  %v1091_v23 = vadd.f32 1e-05, %v1059_v32  ;;  %vm1212_vm7 = vweird.f32 %v1075_v38 }
 0x224   : > { %3276 = vrsqrt.f32 %v1091_v23  ;;  %vm1372_vm10 = vweird.f32 %v1091_v23 }
 0x227   : > { %v1022_v22 = vpop.xlane.xlu1 %1021 }
 0x228   : > { %v3275_v2 = vpop.eup %3274  ;;  %v1060_v51 = vmul.f32 %v1022_v22, %v3707_v36 }
 0x229   : > { %v1207_v1 = vmul.f32 %v3275_v2, %v1075_v38  ;;  %vm1213_vm6 = vweird.f32 %v3275_v2 }
 0x22a   : > { %v3277_v33 = vpop.eup %3276  ;;  %v1092_v60 = vadd.f32 1e-05, %v1060_v51  ;;  %vm1214_vm9 = vmor %vm1212_vm7, %vm1213_vm6 }
 0x22b   : > { %v1208_v57 = vmul.f32 %v3275_v2, %v1207_v1  ;;  %v1367_v63 = vmul.f32 %v3277_v33, %v1091_v23  ;;  %vm1373_vm8 = vweird.f32 %v3277_v33 }
 0x22c   : > { %3278 = vrsqrt.f32 %v1092_v60  ;;  %vm1374_vm11 = vmor %vm1372_vm10, %vm1373_vm8  ;;  %vm1382_vm12 = vweird.f32 %v1092_v60 }
 0x22d   : > { %v1209_v21 = vmul.f32 0.5, %v1208_v57  ;;  %v1368_v35 = vmul.f32 %v3277_v33, %v1367_v63 }
 0x22e   : > { %v4467_v48 = vpop.f32.mrf.mxu1 }
 0x22f   : > { %v1210_v27 = vsub.f32 1.5, %v1209_v21  ;;  %v1369_v6 = vmul.f32 0.5, %v1368_v35 }
 0x231   : > { %v1211_v11 = vmul.f32 %v3275_v2, %v1210_v27  ;;  %v1370_v61 = vsub.f32 1.5, %v1369_v6 }
 0x232   : > { %v3279_v3 = vpop.eup %3278 }
 0x233   : > { %v1215_v26 = vsel %vm1214_vm9, %v3275_v2, %v1211_v11  ;;  %v1371_v30 = vmul.f32 %v3277_v33, %v1370_v61  ;;  %v1377_v45 = vmul.f32 %v3279_v3, %v1092_v60  ;;  %vm1383_vm0 = vweird.f32 %v3279_v3 }
 0x234   : > { %v1427_v9 = vmul.f32 %v1215_v26, %v3970_v39  ;;  %vm1384_vm13 = vmor %vm1382_vm12, %vm1383_vm0 }
 0x235   : > { %v1375_v43 = vsel %vm1374_vm11, %v3277_v33, %v1371_v30  ;;  %v1378_v8 = vmul.f32 %v3279_v3, %v1377_v45 }
 0x236   : > { %v4470_v59 = vpop.f32.mrf.mxu1  ;;  %v1460_v54 = vmul.f32 %v3991_v46, %v1427_v9  ;;  %v1443_v5 = vmul.f32 %v1375_v43, %v3975_v17 }
 0x237   : > { %v1379_v58 = vmul.f32 0.5, %v1378_v8  ;;  %v1025_v16 = vpop.xlane.xlu0 %1024 }
 0x238   : > { %v1061_v12 = vmul.f32 %v1025_v16, %v3707_v36  ;;  %v1493_v52 = vadd.f32 %v3996_v14, %v1460_v54  ;;  %v1476_v34 = vmul.f32 %v3991_v46, %v1443_v5 }
 0x239   : > { %v1380_v15 = vsub.f32 1.5, %v1379_v58  ;;  %v974_v62 = vpop.xlane.xlu2 %973 }
 0x23a   : > { %v1093_v39 = vadd.f32 1e-05, %v1061_v12  ;;  %3036 = vmatmul.msk.f32.gmra.mxu1 %vm736_vm1, %v1493_v52  ;;  %v1509_v18 = vadd.f32 %v3996_v14, %v1476_v34  ;;  %v1044_v17 = vmul.f32 %v974_v62, %v3707_v36  ;;  %v4490_v57 = vpop.f32.mrf.mxu2 }
 0x23b   : > { %v1381_v50 = vmul.f32 %v3279_v3, %v1380_v15 }
 0x23c   : > { %3280 = vrsqrt.f32 %v1093_v39  ;;  %3052 = vmatmul.msk.f32.gmra.mxu2 %vm736_vm1, %v1509_v18  ;;  %v1076_v53 = vadd.f32 1e-05, %v1044_v17  ;;  %vm1392_vm15 = vweird.f32 %v1093_v39 }
 0x23d   : > { %v1385_v4 = vsel %vm1384_vm13, %v3279_v3, %v1381_v50  ;;  %v4494_v3 = vperm.slane %v3988_v25, 3 }
 0x23e   : > { %v1444_v7 = vmul.f32 %v1385_v4, %v4010_v55  ;;  %3282 = vrsqrt.f32 %v1076_v53  ;;  %v4482_v13 = vpop.f32.mrf.mxu1  ;;  %vm1222_vm4 = vweird.f32 %v1076_v53 }
 0x240   : > { %v1477_v19 = vmul.f32 %v3991_v46, %v1444_v7 }
 0x241   : > { %v977_v24 = vpop.xlane.xlu1 %976 }
 0x242   : > { %v3281_v41 = vpop.eup %3280  ;;  %v1510_v10 = vadd.f32 %v3996_v14, %v1477_v19  ;;  %v1045_v47 = vmul.f32 %v977_v24, %v3707_v36 }
 0x243   : > { %v1387_v40 = vmul.f32 %v3281_v41, %v1093_v39  ;;  %vm1393_vm14 = vweird.f32 %v3281_v41 }
 0x244   : > { %3053 = vmatmul.msk.f32.gmra.mxu2 %vm736_vm1, %v1510_v10  ;;  %v3283_v29 = vpop.eup %3282  ;;  %v1077_v32 = vadd.f32 1e-05, %v1045_v47  ;;  %vm1394_vm3 = vmor %vm1392_vm15, %vm1393_vm14 }
 0x245   : > { %v1388_v38 = vmul.f32 %v3281_v41, %v1387_v40  ;;  %v1217_v23 = vmul.f32 %v3283_v29, %v1076_v53  ;;  %vm1223_vm2 = vweird.f32 %v3283_v29 }
 0x246   : > { %3284 = vrsqrt.f32 %v1077_v32  ;;  %vm1224_vm5 = vmor %vm1222_vm4, %vm1223_vm2  ;;  %vm1232_vm7 = vweird.f32 %v1077_v32 }
 0x247   : > { %v1389_v22 = vmul.f32 0.5, %v1388_v38  ;;  %v1218_v55 = vmul.f32 %v3283_v29, %v1217_v23 }
 0x248   : > { %v4488_v51 = vpop.f32.mrf.mxu1 }
 0x249   : > { %v1390_v2 = vsub.f32 1.5, %v1389_v22  ;;  %v1219_v1 = vmul.f32 0.5, %v1218_v55 }
 0x24b   : > { %v1391_v33 = vmul.f32 %v3281_v41, %v1390_v2  ;;  %v1220_v60 = vsub.f32 1.5, %v1219_v1 }
 0x24c   : > { %v3285_v63 = vpop.eup %3284 }
 0x24d   : > { %v1395_v21 = vsel %vm1394_vm3, %v3281_v41, %v1391_v33  ;;  %v1221_v35 = vmul.f32 %v3283_v29, %v1220_v60  ;;  %v1227_v27 = vmul.f32 %v3285_v63, %v1077_v32  ;;  %vm1233_vm6 = vweird.f32 %v3285_v63 }
 0x24e   : > { %v1445_v6 = vmul.f32 %v1395_v21, %v4073_v28  ;;  %vm1234_vm8 = vmor %vm1232_vm7, %vm1233_vm6 }
 0x24f   : > { %v1225_v11 = vsel %vm1224_vm5, %v3283_v29, %v1221_v35  ;;  %v1228_v61 = vmul.f32 %v3285_v63, %v1227_v27 }
 0x250   : > { %v980_v26 = vpop.xlane.xlu0 %979  ;;  %v1428_v30 = vmul.f32 %v1225_v11, %v4093_v42  ;;  %v1478_v45 = vmul.f32 %v3991_v46, %v1445_v6  ;;  %v1648_v43 = vpop.f32.mrf.mxu1 }
 0x251   : > { %v1229_v9 = vmul.f32 0.5, %v1228_v61  ;;  %v1028_v8 = vpop.xlane.xlu2 %1027  ;;  %v1046_v54 = vmul.f32 %v980_v26, %v3707_v36  ;;  %v4500_v5 = vadd.f32 %v1648_v43, %v4494_v3 }
 0x252   : > { %v1062_v28 = vmul.f32 %v1028_v8, %v3707_v36  ;;  %v1461_v58 = vmul.f32 %v3991_v46, %v1428_v30  ;;  %v1511_v25 = vadd.f32 %v3996_v14, %v1478_v45 }
 0x253   : > { %v1230_v16 = vsub.f32 1.5, %v1229_v9  ;;  %v4505_v12 = vpop.f32.mrf.mxu2  ;;  %v4507_v42 = vadd.f32 1e-05, %v1046_v54  ;;  %v1768_v52 = vmin.f32 %v4500_v5, 0.0  ;;  %vm1736_vm10 = vcmp.gt.f32.partialorder %v4500_v5, 0.0 }
 0x254   : > { %v4510_v34 = vadd.f32 1e-05, %v1062_v28  ;;  %v1494_v15 = vadd.f32 %v3996_v14, %v1461_v58  ;;  %3054 = vmatmul.msk.f32.gmra.mxu2 %vm736_vm1, %v1511_v25 }
 0x255   : > { %v1231_v62 = vmul.f32 %v3285_v63, %v1230_v16  ;;  %3286 = vrsqrt.f32 %v4507_v42  ;;  %v1804_v39 = vmul.f32 1.442695, %v1768_v52  ;;  %vm1242_vm9 = vweird.f32 %v4507_v42 }
 0x256   : > { %3288 = vrsqrt.f32 %v4510_v34  ;;  %3037 = vmatmul.msk.f32.gmra.mxu1 %vm736_vm1, %v1494_v15  ;;  %vm1402_vm0 = vweird.f32 %v4510_v34 }
 0x257   : > { %v1235_v18 = vsel %vm1234_vm8, %v3285_v63, %v1231_v62  ;;  %3290 = vpow2.f32 %v1804_v39 }
 0x258   : > { %v787_v50 = vpop.xlane.xlu0 %786  ;;  %v1429_v17 = vmul.f32 %v1235_v18, %v4146_v49  ;;  %v1651_v4 = vpop.f32.mrf.mxu1 }
 0x259   : > { %v856_v53 = vmul.f32 %v3707_v36, %v787_v50  ;;  %v4530_v32 = vadd.f32 %v1651_v4, %v4494_v3 }
 0x25a   : > { %v1462_v19 = vmul.f32 %v3991_v46, %v1429_v17 }
 0x25b   : > { %v1031_v7 = vpop.xlane.xlu1 %1030  ;;  %v3287_v41 = vpop.eup %3286  ;;  %v4522_v40 = vsub.f32 %v4294_v44, %v856_v53  ;;  %v1769_v6 = vmin.f32 %v4530_v32, 0.0 }
 0x25c   : > { %v1696_v24 = vpop.f32.mrf.mxu2  ;;  %v1063_v10 = vmul.f32 %v1031_v7, %v3707_v36  ;;  %v3289_v47 = vpop.eup %3288  ;;  %v1237_v29 = vmul.f32 %v3287_v41, %v4507_v42  ;;  %v1495_v22 = vadd.f32 %v3996_v14, %v1462_v19  ;;  %vm1243_vm11 = vweird.f32 %v3287_v41 }
 0x25d   : > { %v4526_v38 = vadd.f32 %v1696_v24, %v4494_v3  ;;  %v1397_v49 = vmul.f32 %v3289_v47, %v4510_v34  ;;  %v3291_v55 = vpop.eup %3290  ;;  %v920_v1 = vmul.f32 %v4522_v40, %v4522_v40  ;;  %vm1403_vm12 = vweird.f32 %v3289_v47  ;;  %vm4560_vm13 = vmor %vm1242_vm9, %vm1243_vm11 }
 0x25e   : > { %v4532_v23 = vadd.f32 1e-05, %v1063_v10  ;;  %v1238_v2 = vmul.f32 %v3287_v41, %v1237_v29  ;;  %3038 = vmatmul.msk.f32.gmra.mxu1 %vm736_vm1, %v1495_v22  ;;  %v3061_v35 = vadd.f32 -1.0, %v3291_v55  ;;  %v1806_v62 = vmul.f32 1.442695, %v1769_v6  ;;  %vm4568_vm14 = vmor %vm1402_vm0, %vm1403_vm12 }
 0x25f   : > { %v1784_v44 = vmin.f32 %v4526_v38, 0.0  ;;  %v1398_v33 = vmul.f32 %v3289_v47, %v1397_v49  ;;  %v984_v21 = vsel %vm736_vm1, %v920_v1, 0.0  ;;  %vm1752_vm3 = vcmp.gt.f32.partialorder %v4526_v38, 0.0 }
 0x260   : > { %3292 = vrsqrt.f32 %v4532_v23  ;;  %v1239_v60 = vmul.f32 0.5, %v1238_v2  ;;  %985 = vadd.xlane.f32.xlu2 %v984_v21  ;;  %v4555_v25 = vsel %vm1736_vm10, %v4500_v5, %v3061_v35  ;;  %vm1412_vm2 = vweird.f32 %v4532_v23 }
 0x261   : > { %v1836_v63 = vmul.f32 1.442695, %v1784_v44  ;;  %v1399_v27 = vmul.f32 0.5, %v1398_v33  ;;  %v983_v11 = vpop.xlane.xlu2 %982  ;;  %v1936_v34 = vsel %vm736_vm1, %v4555_v25, 0.0  ;;  %vm1737_vm9 = vcmp.gt.f32.partialorder %v4530_v32, 0.0 }
 0x262   : > { %v1240_v61 = vsub.f32 1.5, %v1239_v60  ;;  %v1654_v26 = vpop.f32.mrf.mxu1  ;;  %v1047_v30 = vmul.f32 %v983_v11, %v3707_v36 }
 0x263   : > { %3294 = vpow2.f32 %v1836_v63  ;;  %v1400_v45 = vsub.f32 1.5, %v1399_v27  ;;  %v4547_v43 = vadd.f32 %v1654_v26, %v4494_v3  ;;  %v790_v58 = vpop.xlane.xlu1 %789 }
 0x264   : > { %v1699_v9 = vpop.f32.mrf.mxu2  ;;  %v1241_v8 = vmul.f32 %v3287_v41, %v1240_v61  ;;  %v4552_v28 = vadd.f32 1e-05, %v1047_v30  ;;  %v857_v18 = vmul.f32 %v3707_v36, %v790_v58 }
 0x265   : > { %v4550_v54 = vadd.f32 %v1699_v9, %v4494_v3  ;;  %v1401_v52 = vmul.f32 %v3289_v47, %v1400_v45  ;;  %v1770_v39 = vmin.f32 %v4547_v43, 0.0  ;;  %vm1738_vm10 = vcmp.gt.f32.partialorder %v4547_v43, 0.0 }
 0x266   : > { %v3293_v16 = vpop.eup %3292  ;;  %v1245_v5 = vsel %vm4560_vm13, %v3287_v41, %v1241_v8  ;;  %3296 = vrsqrt.f32 %v4552_v28  ;;  %v4582_v10 = vsub.f32 %v4430_v31, %v857_v18  ;;  %vm1252_vm7 = vweird.f32 %v4552_v28 }
 0x267   : > { %v1407_v42 = vmul.f32 %v3293_v16, %v4532_v23  ;;  %v1785_v17 = vmin.f32 %v4550_v54, 0.0  ;;  %v1405_v4 = vsel %vm4568_vm14, %v3289_v47, %v1401_v52  ;;  %v1808_v53 = vmul.f32 1.442695, %v1770_v39 }
 0x268   : > { %v1430_v41 = vmul.f32 %v1245_v5, %v4253_v37  ;;  %3298 = vpow2.f32 %v1806_v62  ;;  %vm1413_vm15 = vweird.f32 %v3293_v16  ;;  %1937 = vadd.xlane.f32.xlu2 %v1936_v34  ;;  %v1446_v29 = vmul.f32 %v1405_v4, %v4268_v0 }
 0x269   : > { %v3295_v7 = vpop.eup %3294  ;;  %v1408_v19 = vmul.f32 %v3293_v16, %v1407_v42  ;;  %v1838_v24 = vmul.f32 1.442695, %v1785_v17  ;;  %v921_v22 = vmul.f32 %v4582_v10, %v4582_v10  ;;  %vm1414_vm4 = vmor %vm1412_vm2, %vm1413_vm15  ;;  %vm1753_vm5 = vcmp.gt.f32.partialorder %v4550_v54, 0.0 }
 0x26a   : > { %v1657_v49 = vpop.f32.mrf.mxu1  ;;  %v1463_v55 = vmul.f32 %v3991_v46, %v1430_v41  ;;  %v1479_v37 = vmul.f32 %v3991_v46, %v1446_v29  ;;  %v3077_v44 = vadd.f32 -1.0, %v3295_v7 }
 0x26b   : > { %v1409_v47 = vmul.f32 0.5, %v1408_v19  ;;  %3300 = vpow2.f32 %v1838_v24  ;;  %v4590_v31 = vadd.f32 %v1657_v49, %v4494_v3  ;;  %v987_v0 = vsel %vm736_vm1, %v921_v22, 0.0 }
 0x26c   : > { %3302 = vpow2.f32 %v1808_v53  ;;  %v1702_v2 = vpop.f32.mrf.mxu2  ;;  %v1496_v60 = vadd.f32 %v3996_v14, %v1463_v55  ;;  %v3297_v63 = vpop.eup %3296  ;;  %988 = vadd.xlane.f32.xlu0 %v987_v0  ;;  %v1512_v35 = vadd.f32 %v3996_v14, %v1479_v37  ;;  %v4608_v23 = vsel %vm1752_vm3, %v4526_v38, %v3077_v44 }
 0x26d   : > { %v1410_v1 = vsub.f32 1.5, %v1409_v47  ;;  %v4594_v33 = vadd.f32 %v1702_v2, %v4494_v3  ;;  %v1771_v21 = vmin.f32 %v4590_v31, 0.0  ;;  %v1247_v6 = vmul.f32 %v3297_v63, %v4552_v28 }
 0x26e   : > { %3039 = vmatmul.msk.f32.gmra.mxu1 %vm736_vm1, %v1496_v60  ;;  %v3299_v61 = vpop.eup %3298  ;;  %3055 = vmatmul.msk.f32.gmra.mxu2 %vm736_vm1, %v1512_v35  ;;  %v1984_v18 = vsel %vm736_vm1, %v4608_v23, 0.0  ;;  %vm1253_vm6 = vweird.f32 %v3297_v63  ;;  %vm1739_vm0 = vcmp.gt.f32.partialorder %v4590_v31, 0.0 }
 0x26f   : > { %v1411_v27 = vmul.f32 %v3293_v16, %v1410_v1  ;;  %v1786_v11 = vmin.f32 %v4594_v33, 0.0  ;;  %v1248_v45 = vmul.f32 %v3297_v63, %v1247_v6  ;;  %v1810_v8 = vmul.f32 1.442695, %v1771_v21  ;;  %vm1254_vm8 = vmor %vm1252_vm7, %vm1253_vm6 }
 0x270   : > { %v3062_v50 = vadd.f32 -1.0, %v3299_v61  ;;  %vm1754_vm11 = vcmp.gt.f32.partialorder %v4594_v33, 0.0 }
 0x271   : > { %v3301_v26 = vpop.eup %3300  ;;  %v1415_v30 = vsel %vm1414_vm4, %v3293_v16, %v1411_v27  ;;  %v1840_v9 = vmul.f32 1.442695, %v1786_v11  ;;  %v1249_v62 = vmul.f32 0.5, %v1248_v45 }
 0x272   : > { %v3303_v58 = vpop.eup %3302  ;;  %v3078_v52 = vadd.f32 -1.0, %v3301_v26  ;;  %v1447_v15 = vmul.f32 %v1415_v30, %v4335_v56  ;;  %v1660_v39 = vpop.f32.mrf.mxu1  ;;  %v4632_v47 = vsel %vm1737_vm9, %v4530_v32, %v3062_v50 }
 0x273   : > { %3304 = vpow2.f32 %v1840_v9  ;;  %v4615_v16 = vadd.f32 %v1660_v39, %v4494_v3  ;;  %v1250_v17 = vsub.f32 1.5, %v1249_v62  ;;  %v3063_v7 = vadd.f32 -1.0, %v3303_v58 }
 0x274   : > { %v1705_v38 = vpop.f32.mrf.mxu2  ;;  %v4618_v5 = vsel %vm1753_vm5, %v4550_v54, %v3078_v52  ;;  %v1480_v42 = vmul.f32 %v3991_v46, %v1447_v15  ;;  %3306 = vpow2.f32 %v1810_v8  ;;  %1985 = vadd.xlane.f32.xlu0 %v1984_v18 }
 0x275   : > { %v1706_v56 = vadd.f32 %v1705_v38, %v4494_v3  ;;  %v1987_v4 = vsel %vm736_vm1, %v4618_v5, 0.0  ;;  %v1772_v53 = vmin.f32 %v4615_v16, 0.0  ;;  %v1251_v19 = vmul.f32 %v3297_v63, %v1250_v17 }
 0x276   : > { %1988 = vadd.xlane.f32.xlu1 %v1987_v4  ;;  %v1513_v34 = vadd.f32 %v3996_v14, %v1480_v42  ;;  %v4635_v22 = vsel %vm1738_vm10, %v4547_v43, %v3063_v7  ;;  %vm1740_vm13 = vcmp.gt.f32.partialorder %v4615_v16, 0.0 }
 0x277   : > { %v1787_v54 = vmin.f32 %v1706_v56, 0.0  ;;  %v1255_v41 = vsel %vm1254_vm8, %v3297_v63, %v1251_v19  ;;  %v1812_v49 = vmul.f32 1.442695, %v1772_v53  ;;  %v1942_v43 = vsel %vm736_vm1, %v4635_v22, 0.0 }
 0x278   : > { %3056 = vmatmul.msk.f32.gmra.mxu2 %vm736_vm1, %v1513_v34  ;;  %v1431_v55 = vmul.f32 %v1255_v41, %v4389_v20  ;;  %v1939_v63 = vsel %vm736_vm1, %v4632_v47, 0.0  ;;  %vm1755_vm12 = vcmp.gt.f32.partialorder %v1706_v56, 0.0 }
 0x279   : > { %v3305_v24 = vpop.eup %3304  ;;  %v1842_v29 = vmul.f32 1.442695, %v1787_v54 }
 0x27a   : > { %v3079_v28 = vadd.f32 -1.0, %v3305_v24  ;;  %v3307_v2 = vpop.eup %3306  ;;  %v1663_v37 = vpop.f32.mrf.mxu1  ;;  %v1464_v32 = vmul.f32 %v3991_v46, %v1431_v55 }
 0x27b   : > { %3308 = vpow2.f32 %v1842_v29  ;;  %v1664_v1 = vadd.f32 %v1663_v37, %v4494_v3  ;;  %v3064_v35 = vadd.f32 -1.0, %v3307_v2 }
 0x27c   : > { %v1708_v44 = vpop.f32.mrf.mxu2  ;;  %v4641_v0 = vsel %vm1754_vm11, %v4594_v33, %v3079_v28  ;;  %3310 = vpow2.f32 %v1812_v49  ;;  %v1497_v33 = vadd.f32 %v3996_v14, %v1464_v32  ;;  %1940 = vadd.xlane.f32.xlu0 %v1939_v63 }
 0x27d   : > { %v1709_v60 = vadd.f32 %v1708_v44, %v4494_v3  ;;  %v1990_v20 = vsel %vm736_vm1, %v4641_v0, 0.0  ;;  %v1773_v21 = vmin.f32 %v1664_v1, 0.0  ;;  %v4655_v26 = vsel %vm1739_vm0, %v4590_v31, %v3064_v35 }
 0x27e   : > { %1943 = vadd.xlane.f32.xlu1 %v1942_v43  ;;  %1991 = vadd.xlane.f32.xlu2 %v1990_v20  ;;  %v1945_v62 = vsel %vm736_vm1, %v4655_v26, 0.0  ;;  %vm1741_vm15 = vcmp.gt.f32.partialorder %v1664_v1, 0.0 }
 0x27f   : > { %v1788_v27 = vmin.f32 %v1709_v60, 0.0  ;;  %3040 = vmatmul.msk.f32.gmra.mxu1 %vm736_vm1, %v1497_v33  ;;  %v1814_v61 = vmul.f32 1.442695, %v1773_v21  ;;  %vm1756_vm14 = vcmp.gt.f32.partialorder %v1709_v60, 0.0 }
 0x281   : > { %v3309_v6 = vpop.eup %3308  ;;  %v1844_v11 = vmul.f32 1.442695, %v1788_v27 }
 0x282   : > { %v3080_v30 = vadd.f32 -1.0, %v3309_v6  ;;  %v1666_v45 = vpop.f32.mrf.mxu1  ;;  %v3311_v9 = vpop.eup %3310 }
 0x283   : > { %3312 = vpow2.f32 %v1844_v11  ;;  %v1667_v58 = vadd.f32 %v1666_v45, %v4494_v3  ;;  %v3065_v50 = vadd.f32 -1.0, %v3311_v9 }
 0x284   : > { %v1711_v8 = vpop.f32.mrf.mxu2  ;;  %v4658_v52 = vsel %vm1755_vm12, %v1706_v56, %v3080_v30  ;;  %3314 = vpow2.f32 %v1814_v61 }
 0x285   : > { %v1712_v15 = vadd.f32 %v1711_v8, %v4494_v3  ;;  %v1993_v31 = vsel %vm736_vm1, %v4658_v52, 0.0  ;;  %v1774_v39 = vmin.f32 %v1667_v58, 0.0  ;;  %v4667_v53 = vsel %vm1740_vm13, %v4615_v16, %v3065_v50 }
 0x286   : > { %1946 = vadd.xlane.f32.xlu2 %v1945_v62  ;;  %1994 = vadd.xlane.f32.xlu0 %v1993_v31  ;;  %v1948_v24 = vsel %vm736_vm1, %v4667_v53, 0.0  ;;  %vm1742_vm3 = vcmp.gt.f32.partialorder %v1667_v58, 0.0 }
 0x287   : > { %v1789_v18 = vmin.f32 %v1712_v15, 0.0  ;;  %v1816_v17 = vmul.f32 1.442695, %v1774_v39  ;;  %vm1757_vm2 = vcmp.gt.f32.partialorder %v1712_v15, 0.0 }
 0x289   : > { %v3313_v38 = vpop.eup %3312  ;;  %v1846_v42 = vmul.f32 1.442695, %v1789_v18 }
 0x28a   : > { %v3081_v4 = vadd.f32 -1.0, %v3313_v38  ;;  %v3315_v56 = vpop.eup %3314 }
 0x28b   : > { %3316 = vpow2.f32 %v1846_v42  ;;  %v3066_v41 = vadd.f32 -1.0, %v3315_v56 }
 0x28c   : > { %v1714_v34 = vpop.f32.mrf.mxu2  ;;  %v4669_v7 = vsel %vm1756_vm14, %v1709_v60, %v3081_v4  ;;  %3318 = vpow2.f32 %v1816_v17 }
 0x28d   : > { %v1715_v19 = vadd.f32 %v1714_v34, %v4494_v3  ;;  %v1996_v54 = vsel %vm736_vm1, %v4669_v7, 0.0  ;;  %v4676_v16 = vsel %vm1741_vm15, %v1664_v1, %v3066_v41 }
 0x28e   : > { %1997 = vadd.xlane.f32.xlu1 %v1996_v54  ;;  %1949 = vadd.xlane.f32.xlu0 %v1948_v24  ;;  %v1951_v44 = vsel %vm736_vm1, %v4676_v16, 0.0 }
 0x28f   : > { %v1790_v29 = vmin.f32 %v1715_v19, 0.0  ;;  %vm1758_vm4 = vcmp.gt.f32.partialorder %v1715_v19, 0.0 }
 0x291   : > { %v3317_v49 = vpop.eup %3316  ;;  %v1848_v28 = vmul.f32 1.442695, %v1790_v29 }
 0x292   : > { %v3082_v55 = vadd.f32 -1.0, %v3317_v49  ;;  %v3319_v2 = vpop.eup %3318 }
 0x293   : > { %3320 = vpow2.f32 %v1848_v28  ;;  %v3067_v60 = vadd.f32 -1.0, %v3319_v2 }
 0x294   : > { %v4678_v37 = vsel %vm1757_vm2, %v1712_v15, %v3082_v55 }
 0x295   : > { %v1999_v32 = vsel %vm736_vm1, %v4678_v37, 0.0  ;;  %v4684_v1 = vsel %vm1742_vm3, %v1667_v58, %v3067_v60 }
 0x296   : > { %1952 = vadd.xlane.f32.xlu1 %v1951_v44  ;;  %2000 = vadd.xlane.f32.xlu2 %v1999_v32  ;;  %v1954_v33 = vsel %vm736_vm1, %v4684_v1, 0.0 }
 0x299   : > { %v3321_v43 = vpop.eup %3320 }
 0x29a   : > { %v3083_v20 = vadd.f32 -1.0, %v3321_v43 }
 0x29c   : > { %v4686_v63 = vsel %vm1758_vm4, %v1715_v19, %v3083_v20 }
 0x29d   : > { %v2002_v21 = vsel %vm736_vm1, %v4686_v63, 0.0 }
 0x29e   : > { %2003 = vadd.xlane.f32.xlu0 %v2002_v21  ;;  %1955 = vadd.xlane.f32.xlu2 %v1954_v33 }
 0x2b7   : > { %v1669_v35 = vpop.f32.mrf.mxu1 }
 0x2b8   : > { %v1670_v27 = vadd.f32 %v1669_v35, %v4494_v3 }
 0x2ba   : > { %v1775_v6 = vmin.f32 %v1670_v27, 0.0  ;;  %vm1743_vm5 = vcmp.gt.f32.partialorder %v1670_v27, 0.0 }
 0x2bc   : > { %v1818_v11 = vmul.f32 1.442695, %v1775_v6 }
 0x2be   : > { %3322 = vpow2.f32 %v1818_v11 }
 0x2bf   : > { %v1717_v61 = vpop.f32.mrf.mxu2 }
 0x2c0   : > { %v1718_v30 = vadd.f32 %v1717_v61, %v4494_v3 }
 0x2c2   : > { %v1791_v45 = vmin.f32 %v1718_v30, 0.0  ;;  %vm1759_vm6 = vcmp.gt.f32.partialorder %v1718_v30, 0.0 }
 0x2c4   : > { %v3323_v9 = vpop.eup %3322  ;;  %v1850_v8 = vmul.f32 1.442695, %v1791_v45 }
 0x2c5   : > { %v3068_v58 = vadd.f32 -1.0, %v3323_v9 }
 0x2c6   : > { %3324 = vpow2.f32 %v1850_v8 }
 0x2c7   : > { %v1720_v15 = vpop.f32.mrf.mxu2  ;;  %v4694_v62 = vsel %vm1743_vm5, %v1670_v27, %v3068_v58 }
 0x2c8   : > { %v1721_v31 = vadd.f32 %v1720_v15, %v4494_v3  ;;  %v1957_v39 = vsel %vm736_vm1, %v4694_v62, 0.0 }
 0x2c9   : > { %1958 = vadd.xlane.f32.xlu0 %v1957_v39 }
 0x2ca   : > { %v1792_v18 = vmin.f32 %v1721_v31, 0.0  ;;  %vm1760_vm7 = vcmp.gt.f32.partialorder %v1721_v31, 0.0 }
 0x2cc   : > { %v3325_v50 = vpop.eup %3324  ;;  %v1852_v38 = vmul.f32 1.442695, %v1792_v18 }
 0x2cd   : > { %v3084_v42 = vadd.f32 -1.0, %v3325_v50 }
 0x2ce   : > { %3326 = vpow2.f32 %v1852_v38 }
 0x2cf   : > { %v4699_v17 = vsel %vm1759_vm6, %v1718_v30, %v3084_v42  ;;  %v4720_v42 = vadd.f32 %v4488_v51, %v4494_v3 }
 0x2d0   : > { %v2005_v4 = vsel %vm736_vm1, %v4699_v17, 0.0 }
 0x2d1   : > { %2006 = vadd.xlane.f32.xlu1 %v2005_v4  ;;  %vm1735_vm3 = vcmp.gt.f32.partialorder %v4720_v42, 0.0 }
 0x2d3   : > { %v1672_v34 = vpop.f32.mrf.mxu1  ;;  %v986_v54 = vpop.xlane.xlu2 %985 }
 0x2d4   : > { %v3327_v56 = vpop.eup %3326  ;;  %v1673_v19 = vadd.f32 %v1672_v34, %v4494_v3  ;;  %v1048_v41 = vmul.f32 %v986_v54, %v3707_v36 }
 0x2d5   : > { %v3085_v24 = vadd.f32 -1.0, %v3327_v56 }
 0x2d6   : > { %v1776_v29 = vmin.f32 %v1673_v19, 0.0  ;;  %v1080_v28 = vadd.f32 1e-05, %v1048_v41  ;;  %vm1744_vm8 = vcmp.gt.f32.partialorder %v1673_v19, 0.0 }
 0x2d7   : > { %v4705_v49 = vsel %vm1760_vm7, %v1721_v31, %v3085_v24  ;;  %v1723_v55 = vpop.f32.mrf.mxu2 }
 0x2d8   : > { %v2008_v2 = vsel %vm736_vm1, %v4705_v49, 0.0  ;;  %v1820_v44 = vmul.f32 1.442695, %v1776_v29  ;;  %v1724_v32 = vadd.f32 %v1723_v55, %v4494_v3  ;;  %3328 = vrsqrt.f32 %v1080_v28 }
 0x2d9   : > { %2009 = vadd.xlane.f32.xlu2 %v2008_v2  ;;  %vm1262_vm11 = vweird.f32 %v1080_v28  ;;  %v1767_v55 = vmin.f32 %v4720_v42, 0.0 }
 0x2da   : > { %3330 = vpow2.f32 %v1820_v44  ;;  %v1793_v60 = vmin.f32 %v1724_v32, 0.0  ;;  %vm1761_vm10 = vcmp.gt.f32.partialorder %v1724_v32, 0.0 }
 0x2db   : > { %v1675_v20 = vpop.f32.mrf.mxu1 }
 0x2dc   : > { %v1854_v43 = vmul.f32 1.442695, %v1793_v60  ;;  %v1676_v21 = vadd.f32 %v1675_v20, %v4494_v3 }
 0x2de   : > { %3332 = vpow2.f32 %v1854_v43  ;;  %v3329_v33 = vpop.eup %3328  ;;  %v1777_v35 = vmin.f32 %v1676_v21, 0.0  ;;  %vm1745_vm12 = vcmp.gt.f32.partialorder %v1676_v21, 0.0 }
 0x2df   : > { %v1257_v6 = vmul.f32 %v3329_v33, %v1080_v28  ;;  %v989_v11 = vpop.xlane.xlu0 %988  ;;  %vm1263_vm9 = vweird.f32 %v3329_v33 }
 0x2e0   : > { %v3331_v27 = vpop.eup %3330  ;;  %v1822_v61 = vmul.f32 1.442695, %v1777_v35  ;;  %v1049_v30 = vmul.f32 %v989_v11, %v3707_v36  ;;  %vm1264_vm0 = vmor %vm1262_vm11, %vm1263_vm9 }
 0x2e1   : > { %v3069_v45 = vadd.f32 -1.0, %v3331_v27  ;;  %v1258_v9 = vmul.f32 %v3329_v33, %v1257_v6 }
 0x2e2   : > { %3334 = vpow2.f32 %v1822_v61  ;;  %v1081_v8 = vadd.f32 1e-05, %v1049_v30 }
 0x2e3   : > { %v4712_v58 = vsel %vm1744_vm8, %v1673_v19, %v3069_v45  ;;  %v1259_v31 = vmul.f32 0.5, %v1258_v9 }
 0x2e4   : > { %v3333_v15 = vpop.eup %3332  ;;  %v1960_v39 = vsel %vm736_vm1, %v4712_v58, 0.0  ;;  %3336 = vrsqrt.f32 %v1081_v8  ;;  %vm1272_vm14 = vweird.f32 %v1081_v8 }
 0x2e5   : > { %1961 = vadd.xlane.f32.xlu1 %v1960_v39  ;;  %v3086_v18 = vadd.f32 -1.0, %v3333_v15  ;;  %v1260_v50 = vsub.f32 1.5, %v1259_v31 }
 0x2e7   : > { %v4716_v38 = vsel %vm1761_vm10, %v1724_v32, %v3086_v18  ;;  %v1261_v4 = vmul.f32 %v3329_v33, %v1260_v50  ;;  %v4747_v50 = vadd.f32 %v4505_v12, %v4494_v3 }
 0x2e8   : > { %v2011_v56 = vsel %vm736_vm1, %v4716_v38, 0.0  ;;  %v3335_v34 = vpop.eup %3334 }
 0x2e9   : > { %2012 = vadd.xlane.f32.xlu0 %v2011_v56  ;;  %v1265_v19 = vsel %vm1264_vm0, %v3329_v33, %v1261_v4  ;;  %v3070_v54 = vadd.f32 -1.0, %v3335_v34  ;;  %v1802_v33 = vmul.f32 1.442695, %v1767_v55  ;;  %vm1751_vm9 = vcmp.gt.f32.partialorder %v4747_v50, 0.0 }
 0x2ea   : > { %v3337_v24 = vpop.eup %3336  ;;  %v1432_v29 = vmul.f32 %v1265_v19, %v4522_v40  ;;  %v4735_v40 = vadd.f32 %v4467_v48, %v4494_v3  ;;  %v4742_v48 = vadd.f32 %v4490_v57, %v4494_v3 }
 0x2eb   : > { %v1678_v41 = vpop.f32.mrf.mxu1  ;;  %v1267_v2 = vmul.f32 %v3337_v24, %v1081_v8  ;;  %v4727_v44 = vsel %vm1745_vm12, %v1676_v21, %v3070_v54  ;;  %vm1273_vm13 = vweird.f32 %v3337_v24 }
 0x2ec   : > { %v1679_v51 = vadd.f32 %v1678_v41, %v4494_v3  ;;  %v1963_v28 = vsel %vm736_vm1, %v4727_v44, 0.0  ;;  %v1465_v32 = vmul.f32 %v3991_v46, %v1432_v29  ;;  %v1764_v61 = vmin.f32 %v4735_v40, 0.0  ;;  %vm1274_vm15 = vmor %vm1272_vm14, %vm1273_vm13 }
 0x2ed   : > { %v1268_v60 = vmul.f32 %v3337_v24, %v1267_v2  ;;  %1964 = vadd.xlane.f32.xlu2 %v1963_v28  ;;  %v1782_v34 = vmin.f32 %v4742_v48, 0.0  ;;  %vm1732_vm5 = vcmp.gt.f32.partialorder %v4735_v40, 0.0  ;;  %vm1750_vm8 = vcmp.gt.f32.partialorder %v4742_v48, 0.0 }
 0x2ee   : > { %v1778_v43 = vmin.f32 %v1679_v51, 0.0  ;;  %v1498_v20 = vadd.f32 %v3996_v14, %v1465_v32  ;;  %v1796_v18 = vmul.f32 1.442695, %v1764_v61  ;;  %vm1746_vm2 = vcmp.gt.f32.partialorder %v1679_v51, 0.0 }
 0x2ef   : > { %v1269_v35 = vmul.f32 0.5, %v1268_v60  ;;  %v1832_v2 = vmul.f32 1.442695, %v1782_v34  ;;  %v1643_v60 = vadd.f32 %v4482_v13, %v4494_v3 }
 0x2f0   : > { %v1824_v27 = vmul.f32 1.442695, %v1778_v43  ;;  %3041 = vmatmul.msk.f32.gmra.mxu1 %vm736_vm1, %v1498_v20 }
 0x2f1   : > { %v1270_v21 = vsub.f32 1.5, %v1269_v35  ;;  %v1726_v6 = vpop.f32.mrf.mxu2  ;;  %v1766_v61 = vmin.f32 %v1643_v60, 0.0  ;;  %vm1734_vm11 = vcmp.gt.f32.partialorder %v1643_v60, 0.0 }
 0x2f2   : > { %3338 = vpow2.f32 %v1824_v27  ;;  %v1727_v11 = vadd.f32 %v1726_v6, %v4494_v3 }
 0x2f3   : > { %3340 = vpow2.f32 %v1802_v33  ;;  %v1271_v30 = vmul.f32 %v3337_v24, %v1270_v21 }
 0x2f4   : > { %v1794_v45 = vmin.f32 %v1727_v11, 0.0  ;;  %vm1762_vm4 = vcmp.gt.f32.partialorder %v1727_v11, 0.0 }
 0x2f5   : > { %v1275_v9 = vsel %vm1274_vm15, %v3337_v24, %v1271_v30  ;;  %v1783_v24 = vmin.f32 %v4747_v50, 0.0 }
 0x2f6   : > { %v1856_v15 = vmul.f32 1.442695, %v1794_v45  ;;  %v1433_v31 = vmul.f32 %v1275_v9, %v4582_v10 }
 0x2f7   : > { %v1834_v43 = vmul.f32 1.442695, %v1783_v24  ;;  %v4789_v24 = vpop.xlane.xlu0 %1985 }
 0x2f8   : > { %v3339_v39 = vpop.eup %3338  ;;  %3342 = vpow2.f32 %v1856_v15  ;;  %v1466_v4 = vmul.f32 %v3991_v46, %v1433_v31  ;;  %v1800_v31 = vmul.f32 1.442695, %v1766_v61 }
 0x2f9   : > { %v3071_v8 = vadd.f32 -1.0, %v3339_v39  ;;  %v3341_v56 = vpop.eup %3340  ;;  %3344 = vpow2.f32 %v1796_v18 }
 0x2fa   : > { %v1499_v57 = vadd.f32 %v3996_v14, %v1466_v4  ;;  %v3060_v55 = vadd.f32 -1.0, %v3341_v56 }
 0x2fb   : > { %v1729_v19 = vpop.f32.mrf.mxu2  ;;  %v4753_v10 = vsel %vm1746_vm2, %v1679_v51, %v3071_v8  ;;  %v4762_v51 = vadd.f32 %v4470_v59, %v4494_v3 }
 0x2fc   : > { %v1730_v54 = vadd.f32 %v1729_v19, %v4494_v3  ;;  %v1681_v12 = vpop.f32.mrf.mxu1  ;;  %v1966_v41 = vsel %vm736_vm1, %v4753_v10, 0.0  ;;  %3042 = vmatmul.msk.f32.gmra.mxu1 %vm736_vm1, %v1499_v57  ;;  %v4768_v35 = vsel %vm1735_vm3, %v4720_v42, %v3060_v55 }
 0x2fd   : > { %v1682_v29 = vadd.f32 %v1681_v12, %v4494_v3  ;;  %1967 = vadd.xlane.f32.xlu0 %v1966_v41  ;;  %v1765_v59 = vmin.f32 %v4762_v51, 0.0  ;;  %v1933_v6 = vsel %vm736_vm1, %v4768_v35, 0.0  ;;  %vm1733_vm10 = vcmp.gt.f32.partialorder %v4762_v51, 0.0 }
 0x2fe   : > { %v1795_v46 = vmin.f32 %v1730_v54, 0.0  ;;  %v3343_v14 = vpop.eup %3342  ;;  %vm1763_vm6 = vcmp.gt.f32.partialorder %v1730_v54, 0.0 }
 0x2ff   : > { %v1779_v32 = vmin.f32 %v1682_v29, 0.0  ;;  %v3087_v20 = vadd.f32 -1.0, %v3343_v14  ;;  %v3345_v27 = vpop.eup %3344  ;;  %v1798_v45 = vmul.f32 1.442695, %v1765_v59  ;;  %vm1747_vm7 = vcmp.gt.f32.partialorder %v1682_v29, 0.0 }
 0x300   : > { %v1858_v28 = vmul.f32 1.442695, %v1795_v46  ;;  %v3057_v30 = vadd.f32 -1.0, %v3345_v27 }
 0x301   : > { %v1826_v33 = vmul.f32 1.442695, %v1779_v32  ;;  %v4770_v21 = vsel %vm1762_vm4, %v1727_v11, %v3087_v20  ;;  %v4805_v32 = vpop.xlane.xlu0 %1940 }
 0x302   : > { %3346 = vpow2.f32 %v1858_v28  ;;  %v2014_v13 = vsel %vm736_vm1, %v4770_v21, 0.0  ;;  %v4779_v39 = vsel %vm1732_vm5, %v4735_v40, %v3057_v30 }
 0x303   : > { %3348 = vpow2.f32 %v1832_v2  ;;  %2015 = vadd.xlane.f32.xlu1 %v2014_v13  ;;  %v1924_v19 = vsel %vm736_vm1, %v4779_v39, 0.0 }
 0x304   : > { %3350 = vpow2.f32 %v1826_v33  ;;  %v4817_v33 = vpop.xlane.xlu2 %1937 }
 0x305   : > { %3352 = vpow2.f32 %v1834_v43  ;;  %1934 = vadd.xlane.f32.xlu0 %v1933_v6 }
 0x306   : > { %3354 = vpow2.f32 %v1798_v45 }
 0x307   : > { %3356 = vpow2.f32 %v1800_v31  ;;  %v4838_v31 = vpop.xlane.xlu1 %1988 }
 0x308   : > { %v3347_v42 = vpop.eup %3346 }
 0x309   : > { %v3349_v9 = vpop.eup %3348  ;;  %v3088_v15 = vadd.f32 -1.0, %v3347_v42  ;;  %v4819_v27 = vpop.xlane.xlu0 %1994 }
 0x30a   : > { %v3351_v11 = vpop.eup %3350  ;;  %v3075_v57 = vadd.f32 -1.0, %v3349_v9 }
 0x30b   : > { %v4781_v18 = vsel %vm1763_vm6, %v1730_v54, %v3088_v15  ;;  %v3072_v4 = vadd.f32 -1.0, %v3351_v11  ;;  %v3353_v8 = vpop.eup %3352 }
 0x30c   : > { %v2017_v56 = vsel %vm736_vm1, %v4781_v18, 0.0  ;;  %v3076_v54 = vadd.f32 -1.0, %v3353_v8  ;;  %v4795_v12 = vsel %vm1750_vm8, %v4742_v48, %v3075_v57  ;;  %v3355_v41 = vpop.eup %3354  ;;  %v4821_v59 = vpop.xlane.xlu2 %1991 }
 0x30d   : > { %2018 = vadd.xlane.f32.xlu2 %v2017_v56  ;;  %v4785_v34 = vsel %vm1747_vm7, %v1682_v29, %v3072_v4  ;;  %1925 = vadd.xlane.f32.xlu0 %v1924_v19  ;;  %v3357_v29 = vpop.eup %3356  ;;  %v1978_v55 = vsel %vm736_vm1, %v4795_v12, 0.0  ;;  %v3058_v2 = vadd.f32 -1.0, %v3355_v41 }
 0x30e   : > { %v1969_v40 = vsel %vm736_vm1, %v4785_v34, 0.0  ;;  %v4799_v46 = vsel %vm1751_vm9, %v4747_v50, %v3076_v54  ;;  %v3059_v28 = vadd.f32 -1.0, %v3357_v29 }
 0x30f   : > { %1970 = vadd.xlane.f32.xlu1 %v1969_v40  ;;  %v1981_v14 = vsel %vm736_vm1, %v4799_v46, 0.0  ;;  %v4809_v48 = vsel %vm1733_vm10, %v4762_v51, %v3058_v2  ;;  %v4847_v19 = vpop.xlane.xlu1 %1943 }
 0x310   : > { %v4811_v50 = vsel %vm1734_vm11, %v1643_v60, %v3059_v28  ;;  %v1927_v43 = vsel %vm736_vm1, %v4809_v48, 0.0 }
 0x311   : > { %v1930_v20 = vsel %vm736_vm1, %v4811_v50, 0.0  ;;  %v4823_v13 = vpop.xlane.xlu0 %1949 }
 0x314   : > { %v4825_v51 = vpop.xlane.xlu2 %1946 }
 0x315   : > { %1979 = vadd.xlane.f32.xlu2 %v1978_v55 }
 0x317   : > { %1982 = vadd.xlane.f32.xlu1 %v1981_v14  ;;  %v4849_v57 = vpop.xlane.xlu1 %1997 }
 0x319   : > { %v2004_v60 = vpop.xlane.xlu0 %2003 }
 0x31c   : > { %v4827_v6 = vpop.xlane.xlu2 %2000 }
 0x31d   : > { %1928 = vadd.xlane.f32.xlu2 %v1927_v43 }
 0x31f   : > { %1931 = vadd.xlane.f32.xlu1 %v1930_v20  ;;  %v4851_v40 = vpop.xlane.xlu1 %1952 }
 0x324   : > { %v4836_v15 = vpop.xlane.xlu2 %1955 }
 0x33c   : > { %v1959_v61 = vpop.xlane.xlu0 %1958 }
 0x33d   : > { %v2031_v30 = vmul.f32 %v1959_v61, %v3707_v36 }
 0x33f   : > { %v4831_v42 = vsub.f32 %v4694_v62, %v2031_v30 }
 0x341   : > { %v2095_v45 = vmul.f32 %v4831_v42, %v4831_v42 }
 0x343   : > { %v2149_v9 = vsel %vm736_vm1, %v2095_v45, 0.0 }
 0x344   : > { %2150 = vadd.xlane.f32.xlu2 %v2149_v9  ;;  %v2007_v55 = vpop.xlane.xlu1 %2006 }
 0x34c   : > { %v2010_v11 = vpop.xlane.xlu2 %2009 }
 0x34d   : > { %v2048_v4 = vmul.f32 %v2010_v11, %v3707_v36 }
 0x34f   : > { %v4842_v8 = vsub.f32 %v4705_v49, %v2048_v4 }
 0x351   : > { %v2112_v62 = vmul.f32 %v4842_v8, %v4842_v8 }
 0x353   : > { %v2200_v56 = vsel %vm736_vm1, %v2112_v62, 0.0 }
 0x354   : > { %2201 = vadd.xlane.f32.xlu2 %v2200_v56 }
 0x358   : > { %v1962_v45 = vpop.xlane.xlu1 %1961 }
 0x359   : > { %v2032_v4 = vmul.f32 %v1962_v45, %v3707_v36 }
 0x35c   : > { %v2013_v54 = vpop.xlane.xlu0 %2012 }
 0x360   : > { %v1965_v61 = vpop.xlane.xlu2 %1964 }
 0x36d   : > { %v1684_v41 = vpop.f32.mrf.mxu1 }
 0x36e   : > { %v1685_v29 = vadd.f32 %v1684_v41, %v4494_v3 }
 0x370   : > { %v1968_v2 = vpop.xlane.xlu0 %1967  ;;  %v1780_v49 = vmin.f32 %v1685_v29, 0.0  ;;  %vm1748_vm0 = vcmp.gt.f32.partialorder %v1685_v29, 0.0 }
 0x371   : > { %v2034_v14 = vmul.f32 %v1968_v2, %v3707_v36  ;;  %v4866_v2 = vsub.f32 %v4712_v58, %v2032_v4 }
 0x372   : > { %v1828_v28 = vmul.f32 1.442695, %v1780_v49 }
 0x373   : > { %v4856_v43 = vsub.f32 %v4753_v10, %v2034_v14  ;;  %v2096_v58 = vmul.f32 %v4866_v2, %v4866_v2 }
 0x374   : > { %3358 = vpow2.f32 %v1828_v28 }
 0x375   : > { %v2098_v20 = vmul.f32 %v4856_v43, %v4856_v43 }
 0x377   : > { %v2158_v30 = vsel %vm736_vm1, %v2098_v20, 0.0  ;;  %v2016_v20 = vpop.xlane.xlu1 %2015 }
 0x378   : > { %2159 = vadd.xlane.f32.xlu2 %v2158_v30 }
 0x379   : > { %v1687_v9 = vpop.f32.mrf.mxu1 }
 0x37a   : > { %v3359_v11 = vpop.eup %3358  ;;  %v1688_v62 = vadd.f32 %v1687_v9, %v4494_v3  ;;  %v2046_v3 = vmul.f32 %v2004_v60, %v3707_v36 }
 0x37b   : > { %v3073_v56 = vadd.f32 -1.0, %v3359_v11 }
 0x37c   : > { %v1781_v41 = vmin.f32 %v1688_v62, 0.0  ;;  %v4881_v11 = vsub.f32 %v4686_v63, %v2046_v3  ;;  %vm1749_vm12 = vcmp.gt.f32.partialorder %v1688_v62, 0.0 }
 0x37d   : > { %v4863_v10 = vsel %vm1748_vm0, %v1685_v29, %v3073_v56  ;;  %v2049_v29 = vmul.f32 %v2013_v54, %v3707_v36 }
 0x37e   : > { %v1830_v49 = vmul.f32 1.442695, %v1781_v41  ;;  %v1972_v28 = vsel %vm736_vm1, %v4863_v10, 0.0  ;;  %v2047_v41 = vmul.f32 %v2007_v55, %v3707_v36 }
 0x37f   : > { %1973 = vadd.xlane.f32.xlu1 %v1972_v28  ;;  %v4886_v60 = vsub.f32 %v4716_v38, %v2049_v29  ;;  %v2110_v28 = vmul.f32 %v4881_v11, %v4881_v11 }
 0x380   : > { %v2019_v14 = vpop.xlane.xlu2 %2018  ;;  %3360 = vpow2.f32 %v1830_v49  ;;  %v4896_v55 = vsub.f32 %v4699_v17, %v2047_v41 }
 0x381   : > { %v2051_v30 = vmul.f32 %v2019_v14, %v3707_v36  ;;  %v2028_v14 = vmul.f32 %v4823_v13, %v3707_v36  ;;  %v2113_v3 = vmul.f32 %v4886_v60, %v4886_v60  ;;  %v2194_v13 = vsel %vm736_vm1, %v2110_v28, 0.0 }
 0x382   : > { %v1971_v54 = vpop.xlane.xlu1 %1970  ;;  %v2111_v17 = vmul.f32 %v4896_v55, %v4896_v55  ;;  %v2045_v28 = vmul.f32 %v4827_v6, %v3707_v36 }
 0x383   : > { %v4873_v45 = vsub.f32 %v4781_v18, %v2051_v30  ;;  %v2152_v18 = vsel %vm736_vm1, %v2096_v58, 0.0  ;;  %v2035_v38 = vmul.f32 %v1971_v54, %v3707_v36  ;;  %v4904_v29 = vsub.f32 %v4667_v53, %v2028_v14 }
 0x384   : > { %v2025_v14 = vmul.f32 %v4805_v32, %v3707_v36  ;;  %v4956_v6 = vsub.f32 %v4678_v37, %v2045_v28 }
 0x385   : > { %v2115_v9 = vmul.f32 %v4873_v45, %v4873_v45  ;;  %v4909_v58 = vsub.f32 %v4785_v34, %v2035_v38  ;;  %v2092_v53 = vmul.f32 %v4904_v29, %v4904_v29  ;;  %v2197_v34 = vsel %vm736_vm1, %v2111_v17, 0.0 }
 0x386   : > { %v3361_v56 = vpop.eup %3360  ;;  %6016 = vst [vmem:[#allocation5_spill] sm:$0xff] %v4956_v6  ;;  %v2040_v17 = vmul.f32 %v4789_v24, %v3707_v36 }
 0x387   : > { %v2209_v4 = vsel %vm736_vm1, %v2115_v9, 0.0  ;;  %2153 = vadd.xlane.f32.xlu1 %v2152_v18  ;;  %v3074_v49 = vadd.f32 -1.0, %v3361_v56  ;;  %v2203_v9 = vsel %vm736_vm1, %v2113_v3, 0.0  ;;  %v2030_v56 = vmul.f32 %v4836_v15, %v3707_v36 }
 0x388   : > { %2210 = vadd.xlane.f32.xlu2 %v2209_v4  ;;  %v2043_v4 = vmul.f32 %v4819_v27, %v3707_v36  ;;  %v2099_v41 = vmul.f32 %v4909_v58, %v4909_v58  ;;  %v2140_v27 = vsel %vm736_vm1, %v2092_v53, 0.0  ;;  %v4950_v3 = vsub.f32 %v4632_v47, %v2025_v14 }
 0x389   : > { %v4891_v63 = vsel %vm1749_vm12, %v1688_v62, %v3074_v49  ;;  %v2033_v62 = vmul.f32 %v1965_v61, %v3707_v36  ;;  %v4931_v54 = vsub.f32 %v4684_v1, %v2030_v56  ;;  %v2050_v49 = vmul.f32 %v2016_v20, %v3707_v36 }
 0x38a   : > { %v1975_v30 = vsel %vm736_vm1, %v4891_v63, 0.0  ;;  %v4927_v18 = vsub.f32 %v4658_v52, %v2043_v4  ;;  %v2161_v15 = vsel %vm736_vm1, %v2099_v41, 0.0  ;;  %6015 = vst [vmem:[#allocation4_spill] sm:$0xff] %v4950_v3  ;;  %v2089_v47 = vmul.f32 %v4950_v3, %v4950_v3 }
 0x38b   : > { %1976 = vadd.xlane.f32.xlu0 %v1975_v30  ;;  %v4921_v61 = vsub.f32 %v4727_v44, %v2033_v62  ;;  %v4944_v1 = vsub.f32 %v4770_v21, %v2050_v49  ;;  %v2094_v38 = vmul.f32 %v4931_v54, %v4931_v54  ;;  %v1983_v30 = vpop.xlane.xlu1 %1982  ;;  %v2109_v4 = vmul.f32 %v4956_v6, %v4956_v6 }
 0x38c   : > { %6014 = vst [vmem:[#allocation3_spill] sm:$0xff] %v4927_v18  ;;  %v2107_v52 = vmul.f32 %v4927_v18, %v4927_v18  ;;  %v4974_v53 = vsub.f32 %v4608_v23, %v2040_v17  ;;  %v2131_v24 = vsel %vm736_vm1, %v2089_v47, 0.0  ;;  %v2039_v47 = vmul.f32 %v1983_v30, %v3707_v36 }
 0x38d   : > { %v2097_v44 = vmul.f32 %v4921_v61, %v4921_v61  ;;  %v2114_v21 = vmul.f32 %v4944_v1, %v4944_v1  ;;  %v2146_v62 = vsel %vm736_vm1, %v2094_v38, 0.0  ;;  %v2191_v41 = vsel %vm736_vm1, %v2109_v4, 0.0 }
 0x38e   : > { %v2185_v32 = vsel %vm736_vm1, %v2107_v52, 0.0  ;;  %6017 = vst [vmem:[#allocation6_spill] sm:$0xff] %v4974_v53  ;;  %v2104_v23 = vmul.f32 %v4974_v53, %v4974_v53  ;;  %v2026_v52 = vmul.f32 %v4847_v19, %v3707_v36  ;;  %v5036_v4 = vsub.f32 %v4799_v46, %v2039_v47 }
 0x38f   : > { %2204 = vadd.xlane.f32.xlu1 %v2203_v9  ;;  %v2155_v20 = vsel %vm736_vm1, %v2097_v44, 0.0  ;;  %v2027_v9 = vmul.f32 %v4825_v51, %v3707_v36  ;;  %v2206_v37 = vsel %vm736_vm1, %v2114_v21, 0.0  ;;  %v2044_v51 = vmul.f32 %v4849_v57, %v3707_v36 }
 0x390   : > { %2195 = vadd.xlane.f32.xlu2 %v2194_v13  ;;  %v2029_v13 = vmul.f32 %v4851_v40, %v3707_v36  ;;  %v2176_v14 = vsel %vm736_vm1, %v2104_v23, 0.0  ;;  %v5013_v38 = vsub.f32 %v4635_v22, %v2026_v52  ;;  %6025 = vst [vmem:[#allocation14_spill] sm:$0xff] %v5036_v4 }
 0x391   : > { %v4978_v56 = vsub.f32 %v4655_v26, %v2027_v9  ;;  %v2042_v26 = vmul.f32 %v4821_v59, %v3707_v36  ;;  %v4991_v49 = vsub.f32 %v4669_v7, %v2044_v51 }
 0x392   : > { %v4968_v40 = vsub.f32 %v4676_v16, %v2029_v13  ;;  %6022 = vst [vmem:[#allocation11_spill] sm:$0xff] %v5013_v38  ;;  %v2090_v22 = vmul.f32 %v5013_v38, %v5013_v38 }
 0x393   : > { %2198 = vadd.xlane.f32.xlu0 %v2197_v34  ;;  %6018 = vst [vmem:[#allocation7_spill] sm:$0xff] %v4978_v56  ;;  %v1932_v34 = vpop.xlane.xlu1 %1931  ;;  %v2091_v44 = vmul.f32 %v4978_v56, %v4978_v56  ;;  %v5003_v28 = vsub.f32 %v4641_v0, %v2042_v26  ;;  %v2108_v7 = vmul.f32 %v4991_v49, %v4991_v49 }
 0x394   : > { %v2093_v16 = vmul.f32 %v4968_v40, %v4968_v40  ;;  %6019 = vst [vmem:[#allocation8_spill] sm:$0xff] %v4991_v49  ;;  %v2134_v9 = vsel %vm736_vm1, %v2090_v22, 0.0 }
 0x395   : > { %6021 = vst [vmem:[#allocation10_spill] sm:$0xff] %v5003_v28  ;;  %v2137_v59 = vsel %vm736_vm1, %v2091_v44, 0.0  ;;  %v2188_v19 = vsel %vm736_vm1, %v2108_v7, 0.0  ;;  %v2106_v0 = vmul.f32 %v5003_v28, %v5003_v28 }
 0x396   : > { %v2143_v57 = vsel %vm736_vm1, %v2093_v16, 0.0 }
 0x397   : > { %2162 = vadd.xlane.f32.xlu1 %v2161_v15 }
 0x398   : > { %2141 = vadd.xlane.f32.xlu2 %v2140_v27  ;;  %v2022_v27 = vmul.f32 %v1932_v34, %v3707_v36 }
 0x39a   : > { %v4997_v15 = vsub.f32 %v4811_v50, %v2022_v27  ;;  %v2024_v50 = vmul.f32 %v4817_v33, %v3707_v36  ;;  %v2182_v33 = vsel %vm736_vm1, %v2106_v0, 0.0 }
 0x39b   : > { %2156 = vadd.xlane.f32.xlu0 %v2155_v20 }
 0x39c   : > { %6020 = vst [vmem:[#allocation9_spill] sm:$0xff] %v4997_v15  ;;  %v2086_v20 = vmul.f32 %v4997_v15, %v4997_v15  ;;  %v5020_v21 = vsub.f32 %v4555_v25, %v2024_v50 }
 0x39e   : > { %v2122_v13 = vsel %vm736_vm1, %v2086_v20, 0.0  ;;  %6023 = vst [vmem:[#allocation12_spill] sm:$0xff] %v5020_v21  ;;  %v2088_v25 = vmul.f32 %v5020_v21, %v5020_v21 }
 0x39f   : > { %2147 = vadd.xlane.f32.xlu1 %v2146_v62  ;;  %v2041_v62 = vmul.f32 %v4838_v31, %v3707_v36 }
 0x3a0   : > { %2186 = vadd.xlane.f32.xlu2 %v2185_v32  ;;  %v1980_v32 = vpop.xlane.xlu2 %1979 }
 0x3a1   : > { %v5028_v17 = vsub.f32 %v4618_v5, %v2041_v62  ;;  %v2128_v5 = vsel %vm736_vm1, %v2088_v25, 0.0  ;;  %v2038_v46 = vmul.f32 %v1980_v32, %v3707_v36 }
 0x3a3   : > { %2207 = vadd.xlane.f32.xlu0 %v2206_v37  ;;  %6024 = vst [vmem:[#allocation13_spill] sm:$0xff] %v5028_v17  ;;  %v1935_v37 = vpop.xlane.xlu0 %1934 }
 0x3a4   : > { %v2023_v31 = vmul.f32 %v1935_v37, %v3707_v36 }
 0x3a6   : > { %v5042_v30 = vsub.f32 %v4768_v35, %v2023_v31  ;;  %v5056_v35 = vsub.f32 %v4795_v12, %v2038_v46 }
 0x3a7   : > { %2192 = vadd.xlane.f32.xlu1 %v2191_v41  ;;  %v2103_v41 = vmul.f32 %v5036_v4, %v5036_v4 }
 0x3a8   : > { %2132 = vadd.xlane.f32.xlu2 %v2131_v24  ;;  %v2105_v24 = vmul.f32 %v5028_v17, %v5028_v17  ;;  %v1929_v51 = vpop.xlane.xlu2 %1928  ;;  %6026 = vst [vmem:[#allocation15_spill] sm:$0xff] %v5042_v30  ;;  %v2087_v26 = vmul.f32 %v5042_v30, %v5042_v30  ;;  %v2102_v7 = vmul.f32 %v5056_v35, %v5056_v35 }
 0x3a9   : > { %v2021_v34 = vmul.f32 %v1929_v51, %v3707_v36  ;;  %v2173_v23 = vsel %vm736_vm1, %v2103_v41, 0.0  ;;  %6028 = vst [vmem:[#allocation17_spill] sm:$0xff] %v5056_v35 }
 0x3aa   : > { %v2179_v16 = vsel %vm736_vm1, %v2105_v24, 0.0  ;;  %v2170_v12 = vsel %vm736_vm1, %v2102_v7, 0.0 }
 0x3ab   : > { %2144 = vadd.xlane.f32.xlu0 %v2143_v57  ;;  %v5050_v27 = vsub.f32 %v4809_v48, %v2021_v34  ;;  %v2125_v57 = vsel %vm736_vm1, %v2087_v26, 0.0 }
 0x3ad   : > { %6027 = vst [vmem:[#allocation16_spill] sm:$0xff] %v5050_v27  ;;  %v2085_v44 = vmul.f32 %v5050_v27, %v5050_v27 }
 0x3af   : > { %2138 = vadd.xlane.f32.xlu1 %v2137_v59  ;;  %v2119_v48 = vsel %vm736_vm1, %v2085_v44, 0.0 }
 0x3b0   : > { %2177 = vadd.xlane.f32.xlu2 %v2176_v14  ;;  %v1926_v14 = vpop.xlane.xlu0 %1925 }
 0x3b1   : > { %v2020_v52 = vmul.f32 %v1926_v14, %v3707_v36 }
 0x3b3   : > { %2189 = vadd.xlane.f32.xlu0 %v2188_v19  ;;  %v5066_v59 = vsub.f32 %v4779_v39, %v2020_v52 }
 0x3b5   : > { %6029 = vst [vmem:[#allocation18_spill] sm:$0xff] %v5066_v59  ;;  %v2084_v20 = vmul.f32 %v5066_v59, %v5066_v59 }
 0x3b7   : > { %2183 = vadd.xlane.f32.xlu1 %v2182_v33  ;;  %v2151_v50 = vpop.xlane.xlu2 %2150  ;;  %v2116_v19 = vsel %vm736_vm1, %v2084_v20, 0.0 }
 0x3b8   : > { %2123 = vadd.xlane.f32.xlu2 %v2122_v13  ;;  %v2223_v32 = vmul.f32 %v2151_v50, %v3707_v36 }
 0x3ba   : > { %v2255_v62 = vadd.f32 1e-05, %v2223_v32 }
 0x3bb   : > { %2135 = vadd.xlane.f32.xlu0 %v2134_v9 }
 0x3bc   : > { %3362 = vrsqrt.f32 %v2255_v62  ;;  %vm2392_vm14 = vweird.f32 %v2255_v62 }
 0x3bf   : > { %2129 = vadd.xlane.f32.xlu1 %v2128_v5 }
 0x3c2   : > { %v5080_v9 = vpop.eup %3362 }
 0x3c3   : > { %2180 = vadd.xlane.f32.xlu0 %v2179_v16  ;;  %v2387_v24 = vmul.f32 %v5080_v9, %v2255_v62  ;;  %vm2393_vm13 = vweird.f32 %v5080_v9 }
 0x3c4   : > { %vm5123_vm15 = vmor %vm2392_vm14, %vm2393_vm13 }
 0x3c5   : > { %v2388_v16 = vmul.f32 %v5080_v9, %v2387_v24 }
 0x3c7   : > { %2174 = vadd.xlane.f32.xlu1 %v2173_v23  ;;  %v2202_v0 = vpop.xlane.xlu2 %2201  ;;  %v2389_v52 = vmul.f32 0.5, %v2388_v16 }
 0x3c8   : > { %v2240_v13 = vmul.f32 %v2202_v0, %v3707_v36 }
 0x3ca   : > { %v5074_v33 = vadd.f32 1e-05, %v2240_v13 }
 0x3cb   : > { %2126 = vadd.xlane.f32.xlu0 %v2125_v57 }
 0x3cc   : > { %3364 = vrsqrt.f32 %v5074_v33  ;;  %vm2562_vm3 = vweird.f32 %v5074_v33 }
 0x3cf   : > { %2120 = vadd.xlane.f32.xlu1 %v2119_v48 }
 0x3d2   : > { %v5083_v31 = vpop.eup %3364 }
 0x3d3   : > { %2171 = vadd.xlane.f32.xlu0 %v2170_v12  ;;  %v2557_v34 = vmul.f32 %v5083_v31, %v5074_v33  ;;  %vm2563_vm2 = vweird.f32 %v5083_v31 }
 0x3d4   : > { %vm5138_vm5 = vmor %vm2562_vm3, %vm2563_vm2 }
 0x3d5   : > { %v2558_v44 = vmul.f32 %v5083_v31, %v2557_v34 }
 0x3d7   : > { %v2559_v50 = vmul.f32 0.5, %v2558_v44 }
 0x3d9   : > { %v2560_v24 = vsub.f32 1.5, %v2559_v50 }
 0x3db   : > { %2117 = vadd.xlane.f32.xlu0 %v2116_v19  ;;  %v2390_v19 = vsub.f32 1.5, %v2389_v52 }
 0x3eb   : > { %v2160_v22 = vpop.xlane.xlu2 %2159 }
 0x3ec   : > { %v2226_v39 = vmul.f32 %v2160_v22, %v3707_v36 }
 0x3ee   : > { %v5078_v47 = vadd.f32 1e-05, %v2226_v39 }
 0x3f0   : > { %3366 = vrsqrt.f32 %v5078_v47  ;;  %vm2422_vm9 = vweird.f32 %v5078_v47 }
 0x3f2   : > { %v1974_v25 = vpop.xlane.xlu1 %1973 }
 0x3f3   : > { %v2036_v37 = vmul.f32 %v1974_v25, %v3707_v36 }
 0x3f5   : > { %v5088_v5 = vsub.f32 %v4863_v10, %v2036_v37 }
 0x3f6   : > { %v5097_v57 = vpop.eup %3366 }
 0x3f7   : > { %6030 = vst [vmem:[#allocation19_spill] sm:$0xff] %v5088_v5  ;;  %v2100_v51 = vmul.f32 %v5088_v5, %v5088_v5  ;;  %v2417_v48 = vmul.f32 %v5097_v57, %v5078_v47  ;;  %vm2423_vm7 = vweird.f32 %v5097_v57 }
 0x3f8   : > { %vm5171_vm10 = vmor %vm2422_vm9, %vm2423_vm7 }
 0x3f9   : > { %v2164_v46 = vsel %vm736_vm1, %v2100_v51, 0.0  ;;  %v2418_v13 = vmul.f32 %v5097_v57, %v2417_v48  ;;  %v2391_v51 = vmul.f32 %v5080_v9, %v2390_v19  ;;  %v2561_v48 = vmul.f32 %v5083_v31, %v2560_v24 }
 0x3fa   : > { %v2154_v26 = vpop.xlane.xlu1 %2153  ;;  %2165 = vadd.xlane.f32.xlu1 %v2164_v46 }
 0x3fb   : > { %v2211_v41 = vpop.xlane.xlu2 %2210  ;;  %v2224_v10 = vmul.f32 %v2154_v26, %v3707_v36  ;;  %v2565_v24 = vsel %vm5138_vm5, %v5083_v31, %v2561_v48 }
 0x3fc   : > { %v2243_v23 = vmul.f32 %v2211_v41, %v3707_v36  ;;  %v2419_v41 = vmul.f32 0.5, %v2418_v13 }
 0x3fd   : > { %v5103_v7 = vadd.f32 1e-05, %v2224_v10 }
 0x3fe   : > { %v2275_v14 = vadd.f32 1e-05, %v2243_v23  ;;  %v1977_v12 = vpop.xlane.xlu0 %1976  ;;  %v2420_v19 = vsub.f32 1.5, %v2419_v41 }
 0x3ff   : > { %v2037_v20 = vmul.f32 %v1977_v12, %v3707_v36  ;;  %v2395_v12 = vsel %vm5123_vm15, %v5080_v9, %v2391_v51  ;;  %v3431_v51 = vld [vmem:[%s5962_s5] sm:$0xff]  ;;  %vm2402_vm11 = vweird.f32 %v5103_v7 }
 0x400   : > { %3368 = vrsqrt.f32 %v2275_v14  ;;  %vm2592_vm6 = vweird.f32 %v2275_v14  ;;  %v2421_v41 = vmul.f32 %v5097_v57, %v2420_v19 }
 0x401   : > { %v5107_v0 = vsub.f32 %v4891_v63, %v2037_v20  ;;  %3370 = vrsqrt.f32 %v5103_v7 }
 0x402   : > { %v2205_v39 = vpop.xlane.xlu1 %2204 }
 0x403   : > { %6031 = vst [vmem:[#allocation20_spill] sm:$0xff] %v5107_v0  ;;  %v2196_v32 = vpop.xlane.xlu2 %2195  ;;  %v2101_v25 = vmul.f32 %v5107_v0, %v5107_v0  ;;  %v2241_v63 = vmul.f32 %v2205_v39, %v3707_v36 }
 0x404   : > { %v2238_v22 = vmul.f32 %v2196_v32, %v3707_v36 }
 0x405   : > { %v2167_v16 = vsel %vm736_vm1, %v2101_v25, 0.0  ;;  %v5133_v20 = vadd.f32 1e-05, %v2241_v63 }
 0x406   : > { %v3369_v37 = vpop.eup %3368  ;;  %v5118_v46 = vadd.f32 1e-05, %v2238_v22  ;;  %2168 = vadd.xlane.f32.xlu2 %v2167_v16  ;;  %v2199_v23 = vpop.xlane.xlu0 %2198  ;;  %v5181_v22 = vperm.slane %v3431_v51, 5 }
 0x407   : > { %v2587_v34 = vmul.f32 %v3369_v37, %v2275_v14  ;;  %v2239_v10 = vmul.f32 %v2199_v23, %v3707_v36  ;;  %v5121_v44 = vpop.eup %3370  ;;  %vm2593_vm4 = vweird.f32 %v3369_v37  ;;  %v2607_v23 = vmul.f32 %v2395_v12, %v4831_v42 }
 0x408   : > { %3372 = vrsqrt.f32 %v5118_v46  ;;  %v2397_v9 = vmul.f32 %v5121_v44, %v5103_v7  ;;  %vm2594_vm8 = vmor %vm2592_vm6, %vm2593_vm4  ;;  %v2425_v12 = vsel %vm5171_vm10, %v5097_v57, %v2421_v41  ;;  %vm2403_vm0 = vweird.f32 %v5121_v44 }
 0x409   : > { %v2588_v26 = vmul.f32 %v3369_v37, %v2587_v34  ;;  %v5136_v32 = vadd.f32 1e-05, %v2239_v10  ;;  %v5152_v34 = vperm.slane %v3431_v51, 4  ;;  %3374 = vrsqrt.f32 %v5133_v20  ;;  %vm5255_vm14 = vmor %vm2402_vm11, %vm2403_vm0 }
 0x40a   : > { %v2163_v13 = vpop.xlane.xlu1 %2162  ;;  %v2398_v10 = vmul.f32 %v5121_v44, %v2397_v9  ;;  %v2610_v41 = vmul.f32 %v2425_v12, %v4856_v43  ;;  %vm2542_vm15 = vweird.f32 %v5118_v46  ;;  %vm2572_vm3 = vweird.f32 %v5133_v20 }
 0x40b   : > { %v2589_v62 = vmul.f32 0.5, %v2588_v26  ;;  %v2142_v50 = vpop.xlane.xlu2 %2141  ;;  %v2227_v25 = vmul.f32 %v2163_v13, %v3707_v36  ;;  %3376 = vrsqrt.f32 %v5136_v32  ;;  %v2640_v47 = vmul.f32 %v5152_v34, %v2607_v23 }
 0x40c   : > { %v2220_v33 = vmul.f32 %v2142_v50, %v3707_v36  ;;  %vm2552_vm5 = vweird.f32 %v5136_v32 }
 0x40d   : > { %v2590_v39 = vsub.f32 1.5, %v2589_v62  ;;  %v5155_v16 = vadd.f32 1e-05, %v2227_v25  ;;  %v2624_v62 = vmul.f32 %v2565_v24, %v4842_v8  ;;  %v2399_v8 = vmul.f32 0.5, %v2398_v10 }
 0x40e   : > { %v2157_v31 = vpop.xlane.xlu0 %2156  ;;  %v5163_v52 = vadd.f32 1e-05, %v2220_v33  ;;  %v5166_v14 = vpop.eup %3372  ;;  %v5209_v50 = vadd.f32 %v5181_v22, %v2640_v47  ;;  %v2643_v47 = vmul.f32 %v5152_v34, %v2610_v41 }
 0x40f   : > { %v2591_v63 = vmul.f32 %v3369_v37, %v2590_v39  ;;  %3378 = vrsqrt.f32 %v5155_v16  ;;  %v2225_v48 = vmul.f32 %v2157_v31, %v3707_v36  ;;  %v5184_v39 = vpop.eup %3374  ;;  %v2537_v9 = vmul.f32 %v5166_v14, %v5118_v46 }
 0x410   : > { %3380 = vrsqrt.f32 %v5163_v52  ;;  %v2657_v25 = vmul.f32 %v5152_v34, %v2624_v62  ;;  %v2567_v31 = vmul.f32 %v5184_v39, %v5133_v20  ;;  %v2400_v10 = vsub.f32 1.5, %v2399_v8 }
 0x411   : > { %v2595_v26 = vsel %vm2594_vm8, %v3369_v37, %v2591_v63  ;;  %v5179_v19 = vadd.f32 1e-05, %v2225_v48  ;;  %v5190_v33 = vpop.eup %3376  ;;  %v2538_v48 = vmul.f32 %v5166_v14, %v2537_v9  ;;  %vm2543_vm13 = vweird.f32 %v5166_v14 }
 0x412   : > { %v2627_v37 = vmul.f32 %v2595_v26, %v4873_v45  ;;  %v2148_v13 = vpop.xlane.xlu1 %2147  ;;  %v2547_v62 = vmul.f32 %v5190_v33, %v5136_v32  ;;  %v2401_v5 = vmul.f32 %v5121_v44, %v2400_v10  ;;  %vm2432_vm2 = vweird.f32 %v5155_v16  ;;  %vm5329_vm11 = vmor %vm2542_vm15, %vm2543_vm13 }
 0x413   : > { %v2187_v42 = vpop.xlane.xlu2 %2186  ;;  %3382 = vrsqrt.f32 %v5179_v19  ;;  %v2222_v57 = vmul.f32 %v2148_v13, %v3707_v36  ;;  %v2539_v0 = vmul.f32 0.5, %v2538_v48  ;;  %v5243_v48 = vadd.f32 %v5181_v22, %v2643_v47 }
 0x414   : > { %v2235_v45 = vmul.f32 %v2187_v42, %v3707_v36  ;;  %v2660_v63 = vmul.f32 %v5152_v34, %v2627_v37  ;;  %v5216_v37 = vadd.f32 %v5181_v22, %v2657_v25  ;;  %vm2573_vm6 = vweird.f32 %v5184_v39 }
 0x415   : > { %v5195_v24 = vpop.eup %3378  ;;  %v5213_v43 = vadd.f32 1e-05, %v2222_v57  ;;  %v2568_v57 = vmul.f32 %v5184_v39, %v2567_v31  ;;  %v2540_v7 = vsub.f32 1.5, %v2539_v0  ;;  %vm2553_vm7 = vweird.f32 %v5190_v33  ;;  %vm5344_vm0 = vmor %vm2572_vm3, %vm2573_vm6 }
 0x416   : > { %v5197_v51 = vadd.f32 1e-05, %v2235_v45  ;;  %v2427_v23 = vmul.f32 %v5195_v24, %v5155_v16  ;;  %v2208_v26 = vpop.xlane.xlu0 %2207  ;;  %v5218_v12 = vpop.eup %3380  ;;  %v2693_v8 = vadd.f32 %v5181_v22, %v2660_v63  ;;  %vm2433_vm12 = vweird.f32 %v5195_v24 }
 0x417   : > { %v2242_v13 = vmul.f32 %v2208_v26, %v3707_v36  ;;  %v2548_v26 = vmul.f32 %v5190_v33, %v2547_v62  ;;  %v2357_v63 = vmul.f32 %v5218_v12, %v5163_v52  ;;  %vm5273_vm4 = vmor %vm2432_vm2, %vm2433_vm12  ;;  %v5297_v15 = vmul.f32 %v5166_v14, %v2540_v7 }
 0x418   : > { %v2428_v42 = vmul.f32 %v5195_v24, %v2427_v23  ;;  %3384 = vrsqrt.f32 %v5197_v51  ;;  %3106 = vmatpush.xpose.msk.msrb.mxu3 %vm736_vm1, %v2693_v8  ;;  %vm2362_vm8 = vweird.f32 %v5163_v52  ;;  %vm2363_vm9 = vweird.f32 %v5218_v12  ;;  %vm5357_vm12 = vmor %vm2552_vm5, %vm2553_vm7 }
 0x419   : > { %v5224_v45 = vpop.eup %3382  ;;  %3386 = vrsqrt.f32 %v5213_v43  ;;  %v5231_v59 = vadd.f32 1e-05, %v2242_v13  ;;  %v2549_v47 = vmul.f32 0.5, %v2548_v26  ;;  %v2358_v27 = vmul.f32 %v5218_v12, %v2357_v63  ;;  %vm5400_vm3 = vmor %vm2362_vm8, %vm2363_vm9 }
 0x41a   : > { %v2429_v23 = vmul.f32 0.5, %v2428_v42  ;;  %v2193_v25 = vpop.xlane.xlu1 %2192  ;;  %v2407_v10 = vmul.f32 %v5224_v45, %v5179_v19  ;;  %v2569_v42 = vmul.f32 0.5, %v2568_v57  ;;  %vm2412_vm10 = vweird.f32 %v5179_v19 }
 0x41b   : > { %v2133_v9 = vpop.xlane.xlu2 %2132  ;;  %v2237_v31 = vmul.f32 %v2193_v25, %v3707_v36  ;;  %3388 = vrsqrt.f32 %v5231_v59  ;;  %v2550_v26 = vsub.f32 1.5, %v2549_v47  ;;  %vm2413_vm13 = vweird.f32 %v5224_v45 }
 0x41c   : > { %v2430_v41 = vsub.f32 1.5, %v2429_v23  ;;  %v2217_v35 = vmul.f32 %v2133_v9, %v3707_v36  ;;  %v2570_v63 = vsub.f32 1.5, %v2569_v42  ;;  %v2359_v42 = vmul.f32 0.5, %v2358_v27  ;;  %vm5416_vm5 = vmor %vm2412_vm10, %vm2413_vm13 }
 0x41d   : > { %v5261_v25 = vadd.f32 1e-05, %v2237_v31  ;;  %vm2382_vm15 = vweird.f32 %v5213_v43 }
 0x41e   : > { %v5245_v62 = vpop.eup %3384  ;;  %v2431_v13 = vmul.f32 %v5195_v24, %v2430_v41  ;;  %v5249_v8 = vadd.f32 1e-05, %v2217_v35  ;;  %v2145_v9 = vpop.xlane.xlu0 %2144  ;;  %v2405_v41 = vsel %vm5255_vm14, %v5121_v44, %v2401_v5  ;;  %v2408_v5 = vmul.f32 %v5224_v45, %v2407_v10 }
 0x41f   : > { %v2221_v57 = vmul.f32 %v2145_v9, %v3707_v36  ;;  %v5264_v35 = vpop.eup %3386  ;;  %v2507_v0 = vmul.f32 %v5245_v62, %v5197_v51  ;;  %vm2512_vm14 = vweird.f32 %v5197_v51  ;;  %vm2513_vm6 = vweird.f32 %v5245_v62 }
 0x420   : > { %3390 = vrsqrt.f32 %v5249_v8  ;;  %v2435_v16 = vsel %vm5273_vm4, %v5195_v24, %v2431_v13  ;;  %v2377_v24 = vmul.f32 %v5264_v35, %v5213_v43  ;;  %v2608_v13 = vmul.f32 %v2405_v41, %v4866_v2 }
 0x421   : > { %3392 = vrsqrt.f32 %v5261_v25  ;;  %v5287_v31 = vadd.f32 1e-05, %v2221_v57  ;;  %v5290_v4 = vpop.eup %3388  ;;  %v2409_v53 = vmul.f32 0.5, %v2408_v5  ;;  %v2508_v30 = vmul.f32 %v5245_v62, %v2507_v0 }
 0x422   : > { %v2139_v23 = vpop.xlane.xlu1 %2138  ;;  %v2577_v57 = vmul.f32 %v5290_v4, %v5231_v59  ;;  %v5309_v2 = vmul.f32 %v5184_v39, %v2570_v63  ;;  %v2378_v5 = vmul.f32 %v5264_v35, %v2377_v24  ;;  %v2360_v63 = vsub.f32 1.5, %v2359_v42 }
 0x423   : > { %v2178_v44 = vpop.xlane.xlu2 %2177  ;;  %v2219_v10 = vmul.f32 %v2139_v23, %v3707_v36  ;;  %3394 = vrsqrt.f32 %v5287_v31  ;;  %v2509_v42 = vmul.f32 0.5, %v2508_v30  ;;  %v5372_v28 = vmul.f32 %v5152_v34, %v2608_v13 }
 0x424   : > { %v2232_v9 = vmul.f32 %v2178_v44, %v3707_v36  ;;  %v2611_v44 = vmul.f32 %v2435_v16, %v4909_v58  ;;  %v2578_v27 = vmul.f32 %v5290_v4, %v2577_v57  ;;  %v5319_v16 = vmul.f32 %v5190_v33, %v2550_v26 }
 0x425   : > { %v5314_v41 = vadd.f32 1e-05, %v2219_v10  ;;  %v2410_v10 = vsub.f32 1.5, %v2409_v53  ;;  %v2379_v32 = vmul.f32 0.5, %v2378_v5  ;;  %v2510_v49 = vsub.f32 1.5, %v2509_v42 }
 0x426   : > { %v5304_v47 = vadd.f32 1e-05, %v2232_v9  ;;  %v5306_v17 = vpop.eup %3390  ;;  %v2190_v58 = vpop.xlane.xlu0 %2189  ;;  %v2579_v9 = vmul.f32 0.5, %v2578_v27  ;;  %v2644_v26 = vmul.f32 %v5152_v34, %v2611_v44  ;;  %vm2583_vm2 = vweird.f32 %v5290_v4 }
 0x427   : > { %v5316_v7 = vpop.eup %3392  ;;  %v2327_v23 = vmul.f32 %v5306_v17, %v5249_v8  ;;  %v2236_v30 = vmul.f32 %v2190_v58, %v3707_v36  ;;  %v2411_v57 = vmul.f32 %v5224_v45, %v2410_v10  ;;  %v2380_v42 = vsub.f32 1.5, %v2379_v32 }
 0x428   : > { %3396 = vrsqrt.f32 %v5304_v47  ;;  %v2580_v20 = vsub.f32 1.5, %v2579_v9  ;;  %v2527_v53 = vmul.f32 %v5316_v7, %v5261_v25  ;;  %v5375_v9 = vmul.f32 %v5218_v12, %v2360_v63 }
 0x429   : > { %3398 = vrsqrt.f32 %v5314_v41  ;;  %v5364_v21 = vpop.eup %3394  ;;  %v2328_v58 = vmul.f32 %v5306_v17, %v2327_v23  ;;  %v5379_v3 = vadd.f32 1e-05, %v2236_v30  ;;  %v2677_v18 = vadd.f32 %v5181_v22, %v2644_v26 }
 0x42a   : > { %v2184_v24 = vpop.xlane.xlu1 %2183  ;;  %v2581_v63 = vmul.f32 %v5290_v4, %v2580_v20  ;;  %v2528_v23 = vmul.f32 %v5316_v7, %v2527_v53  ;;  %v2367_v26 = vmul.f32 %v5364_v21, %v5287_v31  ;;  %vm2582_vm4 = vweird.f32 %v5231_v59 }
 0x42b   : > { %v2124_v27 = vpop.xlane.xlu2 %2123  ;;  %v2234_v13 = vmul.f32 %v2184_v24, %v3707_v36  ;;  %3089 = vmatpush.xpose.msk.msrb.mxu2 %vm736_vm1, %v2677_v18  ;;  %3400 = vrsqrt.f32 %v5379_v3  ;;  %v2329_v59 = vmul.f32 0.5, %v2328_v58  ;;  %v5427_v32 = vmul.f32 %v5245_v62, %v2510_v49  ;;  %vm5431_vm7 = vmor %vm2582_vm4, %vm2583_vm2 }
 0x42c   : > { %v2214_v5 = vmul.f32 %v2124_v27, %v3707_v36  ;;  %v2415_v27 = vsel %vm5416_vm5, %v5224_v45, %v2411_v57  ;;  %v2585_v58 = vsel %vm5431_vm7, %v5290_v4, %v2581_v63  ;;  %v2529_v6 = vmul.f32 0.5, %v2528_v23  ;;  %vm5462_vm2 = vmor %vm2512_vm14, %vm2513_vm6 }
 0x42d   : > { %v5437_v56 = vadd.f32 1e-05, %v2234_v13  ;;  %v2368_v45 = vmul.f32 %v5364_v21, %v2367_v26  ;;  %v2381_v52 = vmul.f32 %v5264_v35, %v2380_v42  ;;  %vm2383_vm8 = vweird.f32 %v5264_v35 }
 0x42e   : > { %v5382_v38 = vpop.eup %3396  ;;  %v2136_v30 = vpop.xlane.xlu0 %2135  ;;  %v5435_v18 = vadd.f32 1e-05, %v2214_v5  ;;  %vm2332_vm9 = vweird.f32 %v5249_v8  ;;  %vm2333_vm10 = vweird.f32 %v5306_v17  ;;  %v2330_v4 = vsub.f32 1.5, %v2329_v59  ;;  %vm5480_vm14 = vmor %vm2382_vm15, %vm2383_vm8 }
 0x42f   : > { %v5394_v10 = vpop.eup %3398  ;;  %v2477_v20 = vmul.f32 %v5382_v38, %v5304_v47  ;;  %v2218_v49 = vmul.f32 %v2136_v30, %v3707_v36  ;;  %3090 = vmatpush.xpose.msk.msrb.mxu2 %vm736_vm1, %v5243_v48  ;;  %vm2532_vm13 = vweird.f32 %v5261_v25  ;;  %3402 = vrsqrt.f32 %v5437_v56  ;;  %vm5520_vm6 = vmor %vm2332_vm9, %vm2333_vm10 }
 0x430   : > { %v2347_v53 = vmul.f32 %v5394_v10, %v5314_v41  ;;  %3404 = vrsqrt.f32 %v5435_v18  ;;  %v2609_v26 = vmul.f32 %v2415_v27, %v4921_v61  ;;  %v2626_v30 = vmul.f32 %v2585_v58, %v4944_v1 }
 0x431   : > { %v2478_v5 = vmul.f32 %v5382_v38, %v2477_v20  ;;  %v5454_v63 = vadd.f32 1e-05, %v2218_v49  ;;  %v5456_v48 = vpop.eup %3400  ;;  %v2530_v59 = vsub.f32 1.5, %v2529_v6  ;;  %v2385_v58 = vsel %vm5480_vm14, %v5264_v35, %v2381_v52 }
 0x432   : > { %v2130_v57 = vpop.xlane.xlu1 %2129  ;;  %v2348_v13 = vmul.f32 %v5394_v10, %v2347_v53  ;;  %v2369_v53 = vmul.f32 0.5, %v2368_v45  ;;  %v2517_v51 = vmul.f32 %v5456_v48, %v5379_v3  ;;  %v2642_v27 = vmul.f32 %v5152_v34, %v2609_v26 }
 0x433   : > { %v2216_v42 = vmul.f32 %v2130_v57, %v3707_v36  ;;  %v2479_v1 = vmul.f32 0.5, %v2478_v5  ;;  %3406 = vrsqrt.f32 %v5454_v63  ;;  %v2659_v6 = vmul.f32 %v5152_v34, %v2626_v30 }
 0x434   : > { %vm2533_vm4 = vweird.f32 %v5316_v7  ;;  %v2349_v45 = vmul.f32 0.5, %v2348_v13  ;;  %v5494_v43 = vmul.f32 %v5306_v17, %v2330_v4  ;;  %vm2372_vm15 = vweird.f32 %v5287_v31 }
 0x435   : > { %v5491_v49 = vadd.f32 1e-05, %v2216_v42  ;;  %v2675_v57 = vadd.f32 %v5181_v22, %v2642_v27  ;;  %v2692_v5 = vadd.f32 %v5181_v22, %v2659_v6  ;;  %v5500_v30 = vpop.eup %3402  ;;  %v5503_v35 = vmul.f32 %v5316_v7, %v2530_v59  ;;  %vm5544_vm9 = vmor %vm2532_vm13, %vm2533_vm4 }
 0x436   : > { %v2181_v19 = vpop.xlane.xlu0 %2180  ;;  %vm2373_vm5 = vweird.f32 %v5364_v21  ;;  %vm2483_vm7 = vweird.f32 %v5382_v38  ;;  %v2518_v52 = vmul.f32 %v5456_v48, %v2517_v51  ;;  %v5509_v13 = vpop.eup %3404  ;;  %v2370_v42 = vsub.f32 1.5, %v2369_v53 }
 0x437   : > { %v2233_v26 = vmul.f32 %v2181_v19, %v3707_v36  ;;  %v2480_v61 = vsub.f32 1.5, %v2479_v1  ;;  %vm2352_vm8 = vweird.f32 %v5314_v41  ;;  %vm2353_vm14 = vweird.f32 %v5394_v10  ;;  %3091 = vmatpush.xpose.msk.msrb.mxu2 %vm736_vm1, %v2675_v57  ;;  %3107 = vmatpush.xpose.msk.msrb.mxu3 %vm736_vm1, %v2692_v5  ;;  %vm5590_vm10 = vmor %vm2372_vm15, %vm2373_vm5 }
 0x438   : > { %3408 = vrsqrt.f32 %v5491_v49  ;;  %v2350_v53 = vsub.f32 1.5, %v2349_v45  ;;  %v2497_v51 = vmul.f32 %v5500_v30, %v5437_v56  ;;  %v6060_v1 = vsel %vm5344_vm0, %v5184_v39, %v5309_v2  ;;  %vm5623_vm15 = vmor %vm2352_vm8, %vm2353_vm14 }
 0x439   : > { %v5526_v19 = vadd.f32 1e-05, %v2233_v26  ;;  %v2625_v27 = vmul.f32 %v6060_v1, %v4886_v60  ;;  %v5534_v6 = vpop.eup %3406  ;;  %v2674_v46 = vadd.f32 %v5181_v22, %v5372_v28  ;;  %v2606_v39 = vmul.f32 %v2385_v58, %v4931_v54 }
 0x43a   : > { %v2175_v4 = vpop.xlane.xlu1 %2174  ;;  %v2535_v2 = vsel %vm5544_vm9, %v5316_v7, %v5503_v35  ;;  %v2519_v57 = vmul.f32 0.5, %v2518_v52  ;;  %v2297_v25 = vmul.f32 %v5509_v13, %v5435_v18  ;;  %v2337_v5 = vmul.f32 %v5534_v6, %v5454_v63 }
 0x43b   : > { %v2231_v60 = vmul.f32 %v2175_v4, %v3707_v36  ;;  %v2371_v1 = vmul.f32 %v5364_v21, %v2370_v42  ;;  %v5562_v28 = vmul.f32 %v5382_v38, %v2480_v61  ;;  %3410 = vrsqrt.f32 %v5526_v19  ;;  %3092 = vmatpush.xpose.msk.msrb.mxu2 %vm736_vm1, %v2674_v46 }
 0x43c   : > { %v2658_v54 = vmul.f32 %v5152_v34, %v2625_v27  ;;  %v5568_v58 = vmul.f32 %v5394_v10, %v2350_v53  ;;  %vm2522_vm0 = vweird.f32 %v5379_v3  ;;  %v2498_v52 = vmul.f32 %v5500_v30, %v2497_v51 }
 0x43d   : > { %v2338_v4 = vmul.f32 %v5534_v6, %v2337_v5  ;;  %v5573_v8 = vadd.f32 1e-05, %v2231_v60  ;;  %v2639_v46 = vmul.f32 %v5152_v34, %v2606_v39  ;;  %v6063_v53 = vsel %vm5357_vm12, %v5190_v33, %v5319_v16 }
 0x43e   : > { %v2127_v26 = vpop.xlane.xlu0 %2126  ;;  %v5575_v42 = vpop.eup %3408  ;;  %v2691_v61 = vadd.f32 %v5181_v22, %v2658_v54  ;;  %v2623_v27 = vmul.f32 %v6063_v53, %v4896_v55  ;;  %v2520_v60 = vsub.f32 1.5, %v2519_v57  ;;  %v2298_v5 = vmul.f32 %v5509_v13, %v2297_v25 }
 0x43f   : > { %v2215_v20 = vmul.f32 %v2127_v26, %v3707_v36  ;;  %v2339_v26 = vmul.f32 0.5, %v2338_v4  ;;  %v2317_v39 = vmul.f32 %v5575_v42, %v5491_v49  ;;  %v2375_v33 = vsel %vm5590_vm10, %v5364_v21, %v2371_v1  ;;  %3093 = vmatpush.xpose.msk.msrb.mxu2 %vm736_vm1, %v5209_v50 }
 0x440   : > { %vm6066_vm12 = vweird.f32 %v5304_v47  ;;  %vm2523_vm4 = vweird.f32 %v5456_v48  ;;  %3108 = vmatpush.xpose.msk.msrb.mxu3 %vm736_vm1, %v2691_v61  ;;  %3412 = vrsqrt.f32 %v5573_v8  ;;  %v2499_v16 = vmul.f32 0.5, %v2498_v52 }
 0x441   : > { %vm5604_vm13 = vmor %vm6066_vm12, %vm2483_vm7  ;;  %v5613_v31 = vadd.f32 1e-05, %v2215_v20  ;;  %vm2342_vm5 = vweird.f32 %v5454_v63  ;;  %v2318_v50 = vmul.f32 %v5575_v42, %v2317_v39  ;;  %v5629_v44 = vpop.eup %3410  ;;  %v2355_v20 = vsel %vm5623_vm15, %v5394_v10, %v5568_v58 }
 0x442   : > { %v2485_v21 = vsel %vm5604_vm13, %v5382_v38, %v5562_v28  ;;  %v2672_v41 = vadd.f32 %v5181_v22, %v2639_v46  ;;  %v2656_v57 = vmul.f32 %v5152_v34, %v2623_v27  ;;  %v2121_v25 = vpop.xlane.xlu1 %2120  ;;  %v2521_v1 = vmul.f32 %v5456_v48, %v2520_v60  ;;  %vm5663_vm14 = vmor %vm2522_vm0, %vm2523_vm4  ;;  %v6106_v28 = vld [vmem:[#allocation9_spill] sm:$0xff] }
 0x443   : > { %3414 = vrsqrt.f32 %v5613_v31  ;;  %v5639_v54 = vmul.f32 0.5, %v2298_v5  ;;  %v2340_v52 = vsub.f32 1.5, %v2339_v26  ;;  %v2487_v4 = vmul.f32 %v5629_v44, %v5526_v19 }
 0x444   : > { %vm2503_vm7 = vweird.f32 %v5500_v30  ;;  %vm2343_vm8 = vweird.f32 %v5534_v6  ;;  %3109 = vmatpush.xpose.msk.msrb.mxu3 %vm736_vm1, %v5216_v37  ;;  %3094 = vmatpush.xpose.msk.msrb.mxu2 %vm736_vm1, %v2672_v41  ;;  %v2605_v10 = vmul.f32 %v2375_v33, %v4968_v40  ;;  %v6071_v58 = vsel %vm5329_vm11, %v5166_v14, %v5297_v15 }
 0x445   : > { %v2622_v46 = vmul.f32 %v6071_v58, %v4881_v11  ;;  %v2500_v53 = vsub.f32 1.5, %v2499_v16  ;;  %v2319_v27 = vmul.f32 0.5, %v2318_v50  ;;  %v2488_v51 = vmul.f32 %v5629_v44, %v2487_v4  ;;  %vm5703_vm4 = vmor %vm2342_vm5, %vm2343_vm8 }
 0x446   : > { %v2172_v61 = vpop.xlane.xlu0 %2171  ;;  %v2213_v60 = vmul.f32 %v2121_v25, %v3707_v36  ;;  %v5657_v5 = vpop.eup %3412  ;;  %vm2502_vm10 = vweird.f32 %v5437_v56  ;;  %v2689_v11 = vadd.f32 %v5181_v22, %v2656_v57  ;;  %v2638_v15 = vmul.f32 %v5152_v34, %v2605_v10  ;;  %v6077_v10 = vld [vmem:[#allocation5_spill] sm:$0xff] }
 0x447   : > { %v2655_v14 = vmul.f32 %v5152_v34, %v2622_v46  ;;  %v2230_v37 = vmul.f32 %v2172_v61, %v3707_v36  ;;  %v2525_v0 = vsel %vm5663_vm14, %v5456_v48, %v2521_v1  ;;  %v2300_v3 = vsub.f32 1.5, %v5639_v54  ;;  %v6078_v46 = vld [vmem:[#allocation7_spill] sm:$0xff]  ;;  %vm5738_vm9 = vmor %vm2502_vm10, %vm2503_vm7 }
 0x448   : > { %v2341_v26 = vmul.f32 %v5534_v6, %v2340_v52  ;;  %v2489_v39 = vmul.f32 0.5, %v2488_v51  ;;  %vm2322_vm11 = vweird.f32 %v5491_v49  ;;  %3110 = vmatpush.xpose.msk.msrb.mxu3 %vm736_vm1, %v2689_v11  ;;  %v2671_v47 = vadd.f32 %v5181_v22, %v2638_v15 }
 0x449   : > { %v5677_v33 = vpop.eup %3414  ;;  %v5682_v16 = vadd.f32 1e-05, %v2213_v60  ;;  %v5684_v50 = vadd.f32 1e-05, %v2230_v37  ;;  %v6074_v48 = vsel %vm5400_vm3, %v5218_v12, %v5375_v9  ;;  %v2320_v57 = vsub.f32 1.5, %v2319_v27 }
 0x44a   : > { %v2604_v41 = vmul.f32 %v6074_v48, %v4904_v29  ;;  %vm2323_vm0 = vweird.f32 %v5575_v42  ;;  %vm2492_vm12 = vweird.f32 %v5526_v19  ;;  %v2467_v25 = vmul.f32 %v5657_v5, %v5573_v8  ;;  %3095 = vmatpush.xpose.msk.msrb.mxu2 %vm736_vm1, %v2671_v47  ;;  %v6083_v48 = vld [vmem:[#allocation3_spill] sm:$0xff] }
 0x44b   : > { %v2307_v1 = vmul.f32 %v5677_v33, %v5613_v31  ;;  %v2501_v52 = vmul.f32 %v5500_v30, %v2500_v53  ;;  %v2490_v29 = vsub.f32 1.5, %v2489_v39  ;;  %v2688_v9 = vadd.f32 %v5181_v22, %v2655_v14  ;;  %v6079_v53 = vld [vmem:[#allocation8_spill] sm:$0xff]  ;;  %vm5767_vm8 = vmor %vm2322_vm11, %vm2323_vm0 }
 0x44c   : > { %3416 = vrsqrt.f32 %v5682_v16  ;;  %v2345_v24 = vsel %vm5703_vm4, %v5534_v6, %v2341_v26  ;;  %vm2493_vm3 = vweird.f32 %v5629_v44  ;;  %v2637_v61 = vmul.f32 %v5152_v34, %v2604_v41 }
 0x44d   : > { %v2308_v4 = vmul.f32 %v5677_v33, %v2307_v1  ;;  %3418 = vrsqrt.f32 %v5684_v50  ;;  %3111 = vmatpush.xpose.msk.msrb.mxu3 %vm736_vm1, %v2688_v9  ;;  %v2621_v58 = vmul.f32 %v2535_v2, %v6077_v10  ;;  %v2603_v6 = vmul.f32 %v2355_v20, %v6078_v46 }
 0x44e   : > { %v2118_v63 = vpop.xlane.xlu0 %2117  ;;  %v2620_v27 = vmul.f32 %v2525_v0, %v6079_v53  ;;  %v2321_v51 = vmul.f32 %v5575_v42, %v2320_v57  ;;  %v2468_v60 = vmul.f32 %v5657_v5, %v2467_v25  ;;  %vm2303_vm15 = vweird.f32 %v5509_v13  ;;  %v6082_v0 = vld [vmem:[#allocation11_spill] sm:$0xff] }
 0x44f   : > { %v2309_v40 = vmul.f32 0.5, %v2308_v4  ;;  %v2212_v11 = vmul.f32 %v2118_v63, %v3707_v36  ;;  %v2491_v15 = vmul.f32 %v5629_v44, %v2490_v29  ;;  %v2670_v45 = vadd.f32 %v5181_v22, %v2637_v61  ;;  %v6091_v61 = vld [vmem:[#allocation4_spill] sm:$0xff] }
 0x450   : > { %v2654_v7 = vmul.f32 %v5152_v34, %v2621_v58  ;;  %v2636_v35 = vmul.f32 %v5152_v34, %v2603_v6  ;;  %v2653_v14 = vmul.f32 %v5152_v34, %v2620_v27  ;;  %v2602_v26 = vmul.f32 %v2345_v24, %v6082_v0  ;;  %v6093_v58 = vld [vmem:[#allocation10_spill] sm:$0xff]  ;;  %v6109_v24 = vld [vmem:[#allocation17_spill] sm:$0xff] }
 0x451   : > { %v2310_v20 = vsub.f32 1.5, %v2309_v40  ;;  %v5743_v37 = vadd.f32 1e-05, %v2212_v11  ;;  %vm2302_vm5 = vweird.f32 %v5435_v18  ;;  %v2505_v47 = vsel %vm5738_vm9, %v5500_v30, %v2501_v52  ;;  %3096 = vmatpush.xpose.msk.msrb.mxu2 %vm736_vm1, %v2670_v45  ;;  %v6103_v30 = vld [vmem:[#allocation6_spill] sm:$0xff] }
 0x452   : > { %v5746_v39 = vpop.eup %3416  ;;  %vm2312_vm7 = vweird.f32 %v5613_v31  ;;  %v2687_v56 = vadd.f32 %v5181_v22, %v2654_v7  ;;  %v6084_v41 = vsel %vm5462_vm2, %v5245_v62, %v5427_v32  ;;  %v2469_v1 = vmul.f32 0.5, %v2468_v60  ;;  %vm5782_vm2 = vmor %vm2492_vm12, %vm2493_vm3  ;;  %v6096_v7 = vld [vmem:[#allocation15_spill] sm:$0xff] }
 0x453   : > { %v2619_v57 = vmul.f32 %v6084_v41, %v6083_v48  ;;  %v5761_v25 = vpop.eup %3418  ;;  %v2311_v52 = vmul.f32 %v5677_v33, %v2310_v20  ;;  %vm2313_vm14 = vweird.f32 %v5677_v33  ;;  %v2287_v23 = vmul.f32 %v5746_v39, %v5682_v16  ;;  %vm5834_vm0 = vmor %vm2302_vm5, %vm2303_vm15  ;;  %v6111_v41 = vld [vmem:[#allocation20_spill] sm:$0xff] }
 0x454   : > { %v2325_v62 = vsel %vm5767_vm8, %v5575_v42, %v2321_v51  ;;  %v2457_v49 = vmul.f32 %v5761_v25, %v5684_v50  ;;  %3112 = vmatpush.xpose.msk.msrb.mxu3 %vm736_vm1, %v2687_v56  ;;  %v2669_v12 = vadd.f32 %v5181_v22, %v2636_v35  ;;  %3420 = vrsqrt.f32 %v5743_v37  ;;  %vm5799_vm10 = vmor %vm2312_vm7, %vm2313_vm14 }
 0x455   : > { %v2495_v42 = vsel %vm5782_vm2, %v5629_v44, %v2491_v15  ;;  %v2288_v29 = vmul.f32 %v5746_v39, %v2287_v23  ;;  %v2686_v19 = vadd.f32 %v5181_v22, %v2653_v14  ;;  %v2635_v9 = vmul.f32 %v5152_v34, %v2602_v26 }
 0x456   : > { %v2458_v4 = vmul.f32 %v5761_v25, %v2457_v49  ;;  %3097 = vmatpush.xpose.msk.msrb.mxu2 %vm736_vm1, %v2669_v12  ;;  %v2652_v63 = vmul.f32 %v5152_v34, %v2619_v57  ;;  %v6092_v44 = vsel %vm5520_vm6, %v5306_v17, %v5494_v43  ;;  %v2618_v46 = vmul.f32 %v2505_v47, %v6093_v58  ;;  %v6094_v43 = vld [vmem:[#allocation12_spill] sm:$0xff]  ;;  %v6107_v12 = vld [vmem:[#allocation14_spill] sm:$0xff] }
 0x457   : > { %v2601_v10 = vmul.f32 %v6092_v44, %v6091_v61  ;;  %v2301_v31 = vmul.f32 %v5509_v13, %v2300_v3  ;;  %v2470_v6 = vsub.f32 1.5, %v2469_v1  ;;  %v2315_v53 = vsel %vm5799_vm10, %v5677_v33, %v2311_v52  ;;  %v6095_v3 = vld [vmem:[#allocation13_spill] sm:$0xff]  ;;  %v6110_v58 = vld [vmem:[#allocation18_spill] sm:$0xff] }
 0x458   : > { %v2289_v27 = vmul.f32 0.5, %v2288_v29  ;;  %v2459_v51 = vmul.f32 0.5, %v2458_v4  ;;  %3113 = vmatpush.xpose.msk.msrb.mxu3 %vm736_vm1, %v2686_v19  ;;  %v2668_v59 = vadd.f32 %v5181_v22, %v2635_v9  ;;  %v2600_v60 = vmul.f32 %v2325_v62, %v6094_v43  ;;  %v6108_v29 = vld [vmem:[#allocation16_spill] sm:$0xff] }
 0x459   : > { %v2634_v17 = vmul.f32 %v5152_v34, %v2601_v10  ;;  %vm2472_vm6 = vweird.f32 %v5573_v8  ;;  %vm2473_vm11 = vweird.f32 %v5657_v5  ;;  %v2617_v40 = vmul.f32 %v2495_v42, %v6095_v3 }
 0x45a   : > { %v2290_v54 = vsub.f32 1.5, %v2289_v27  ;;  %v3421_v11 = vpop.eup %3420  ;;  %v2460_v15 = vsub.f32 1.5, %v2459_v51  ;;  %3098 = vmatpush.xpose.msk.msrb.mxu2 %vm736_vm1, %v2668_v59  ;;  %v2685_v33 = vadd.f32 %v5181_v22, %v2652_v63  ;;  %v2651_v45 = vmul.f32 %v5152_v34, %v2618_v46  ;;  %vm5853_vm3 = vmor %vm2472_vm6, %vm2473_vm11 }
 0x45b   : > { %v2599_v35 = vmul.f32 %v2315_v53, %v6096_v7  ;;  %v2471_v20 = vmul.f32 %v5657_v5, %v2470_v6  ;;  %vm2293_vm12 = vweird.f32 %v5746_v39  ;;  %v2277_v0 = vmul.f32 %v3421_v11, %v5743_v37  ;;  %v2695_v7 = vld [vmem:[%s5963_s6] sm:$0xff] }
 0x45c   : > { %v2291_v14 = vmul.f32 %v5746_v39, %v2290_v54  ;;  %v2305_v26 = vsel %vm5834_vm0, %v5509_v13, %v2301_v31  ;;  %vm2292_vm4 = vweird.f32 %v5682_v16  ;;  %3114 = vmatpush.xpose.msk.msrb.mxu3 %vm736_vm1, %v2685_v33  ;;  %v2667_v18 = vadd.f32 %v5181_v22, %v2634_v17 }
 0x45d   : > { %v2633_v47 = vmul.f32 %v5152_v34, %v2600_v60  ;;  %v2461_v48 = vmul.f32 %v5761_v25, %v2460_v15  ;;  %vm2463_vm15 = vweird.f32 %v5761_v25  ;;  %v2278_v13 = vmul.f32 %v3421_v11, %v2277_v0  ;;  %vm5860_vm9 = vmor %vm2292_vm4, %vm2293_vm12  ;;  %v2694_v15 = vld [vmem:[%s5961_s4] sm:$0xff] }
 0x45e   : > { %v2650_v16 = vmul.f32 %v5152_v34, %v2617_v40  ;;  %3099 = vmatpush.xpose.msk.msrb.mxu2 %vm736_vm1, %v2667_v18  ;;  %v2684_v57 = vadd.f32 %v5181_v22, %v2651_v45  ;;  %v2632_v8 = vmul.f32 %v5152_v34, %v2599_v35  ;;  %v2616_v1 = vmul.f32 %v2485_v21, %v6103_v30 }
 0x45f   : > { %v2475_v52 = vsel %vm5853_vm3, %v5657_v5, %v2471_v20  ;;  %v2295_v23 = vsel %vm5860_vm9, %v5746_v39, %v2291_v14  ;;  %vm2462_vm5 = vweird.f32 %v5684_v50  ;;  %v2279_v62 = vmul.f32 0.5, %v2278_v13 }
 0x460   : > { %vm5880_vm7 = vmor %vm2462_vm5, %vm2463_vm15  ;;  %3115 = vmatpush.xpose.msk.msrb.mxu3 %vm736_vm1, %v2684_v57  ;;  %v2666_v38 = vadd.f32 %v5181_v22, %v2633_v47  ;;  %v2598_v55 = vmul.f32 %v2305_v26, %v6106_v28  ;;  %vm2283_vm13 = vweird.f32 %v3421_v11  ;;  %v2683_v39 = vadd.f32 %v5181_v22, %v2650_v16 }
 0x461   : > { %v2465_v21 = vsel %vm5880_vm7, %v5761_v25, %v2461_v48  ;;  %v2280_v5 = vsub.f32 1.5, %v2279_v62  ;;  %v2665_v50 = vadd.f32 %v5181_v22, %v2632_v8  ;;  %v2649_v49 = vmul.f32 %v5152_v34, %v2616_v1  ;;  %v6112_v8 = vld [vmem:[#allocation19_spill] sm:$0xff] }
 0x462   : > { %3100 = vmatpush.xpose.msk.msrb.mxu2 %vm736_vm1, %v2666_v38  ;;  %v2615_v42 = vmul.f32 %v2475_v52, %v6107_v12  ;;  %v2597_v19 = vmul.f32 %v2295_v23, %v6108_v29  ;;  %vm2282_vm8 = vweird.f32 %v5743_v37  ;;  %v2631_v25 = vmul.f32 %v5152_v34, %v2598_v55 }
 0x463   : > { %v2281_v9 = vmul.f32 %v3421_v11, %v2280_v5  ;;  %vm2284_vm14 = vmor %vm2282_vm8, %vm2283_vm13  ;;  %v2614_v4 = vmul.f32 %v2465_v21, %v6109_v24  ;;  %v2682_v61 = vadd.f32 %v5181_v22, %v2649_v49  ;;  %v3457_v35 = vmov 1  }
 0x464   : > { %3116 = vmatpush.xpose.msk.msrb.mxu3 %vm736_vm1, %v2683_v39  ;;  %v2648_v44 = vmul.f32 %v5152_v34, %v2615_v42  ;;  %v2630_v10 = vmul.f32 %v5152_v34, %v2597_v19  ;;  %v2664_v37 = vadd.f32 %v5181_v22, %v2631_v25  ;;  %3167 = vset.pattern.permute.xlu0 %v3457_v35  ;;  %v3458_v2 = vmov 0   ;;  %v2841_v39 = vld [vmem:[%s295_s17 + $0x8] sm:$0xff] }
 0x465   : > { %v2285_v63 = vsel %vm2284_vm14, %v3421_v11, %v2281_v9  ;;  %v2647_v31 = vmul.f32 %v5152_v34, %v2614_v4  ;;  %3166 = vset.pattern.permute.xlu2 %v3458_v2  ;;  %2843 = vperm.xlu0 %3167, %v2695_v7  }
 0x466   : > { %3101 = vmatpush.xpose.msk.msrb.mxu2 %vm736_vm1, %v2665_v50  ;;  %v2596_v46 = vmul.f32 %v2285_v63, %v6110_v58  ;;  %v2681_v6 = vadd.f32 %v5181_v22, %v2648_v44  ;;  %v2663_v53 = vadd.f32 %v5181_v22, %v2630_v10  ;;  %2698 = vperm.xlu2 %3166, %v2695_v7  }
 0x467   : > { %v2680_v51 = vadd.f32 %v5181_v22, %v2647_v31 }
 0x468   : > { %3117 = vmatpush.xpose.msk.msrb.mxu3 %vm736_vm1, %v2682_v61  ;;  %v2629_v27 = vmul.f32 %v5152_v34, %v2596_v46 }
 0x46a   : > { %3102 = vmatpush.xpose.msk.msrb.mxu2 %vm736_vm1, %v2664_v37  ;;  %v2662_v43 = vadd.f32 %v5181_v22, %v2629_v27 }
 0x46c   : > { %3118 = vmatpush.xpose.msk.msrb.mxu3 %vm736_vm1, %v2681_v6 }
 0x46d   : > { %v2166_v59 = vpop.xlane.xlu1 %2165 }
 0x46e   : > { %v2228_v17 = vmul.f32 %v2166_v59, %v3707_v36  ;;  %3103 = vmatpush.xpose.msk.msrb.mxu2 %vm736_vm1, %v2663_v53 }
 0x470   : > { %v2260_v60 = vadd.f32 1e-05, %v2228_v17  ;;  %3119 = vmatpush.xpose.msk.msrb.mxu3 %vm736_vm1, %v2680_v51 }
 0x472   : > { %3422 = vrsqrt.f32 %v2260_v60  ;;  %3104 = vmatpush.xpose.msk.msrb.mxu2 %vm736_vm1, %v2662_v43  ;;  %vm2442_vm10 = vweird.f32 %v2260_v60 }
 0x475   : > { %3105 = vmatmul.msk.f32.vlgmr.msrb.gmra.mxu2 %vm736_vm1, %v2694_v15 }
 0x478   : > { %v3423_v54 = vpop.eup %3422 }
 0x479   : > { %v2437_v3 = vmul.f32 %v3423_v54, %v2260_v60  ;;  %v2169_v40 = vpop.xlane.xlu2 %2168  ;;  %vm2443_vm2 = vweird.f32 %v3423_v54 }
 0x47a   : > { %v2229_v11 = vmul.f32 %v2169_v40, %v3707_v36  ;;  %vm2444_vm11 = vmor %vm2442_vm10, %vm2443_vm2 }
 0x47b   : > { %v2438_v45 = vmul.f32 %v3423_v54, %v2437_v3 }
 0x47c   : > { %v2261_v33 = vadd.f32 1e-05, %v2229_v11 }
 0x47d   : > { %v2439_v36 = vmul.f32 0.5, %v2438_v45 }
 0x47e   : > { %3424 = vrsqrt.f32 %v2261_v33  ;;  %vm2452_vm0 = vweird.f32 %v2261_v33 }
 0x47f   : > { %v2440_v14 = vsub.f32 1.5, %v2439_v36 }
 0x481   : > { %v2441_v18 = vmul.f32 %v3423_v54, %v2440_v14 }
 0x483   : > { %v2445_v48 = vsel %vm2444_vm11, %v3423_v54, %v2441_v18 }
 0x484   : > { %v3425_v20 = vpop.eup %3424  ;;  %v2612_v30 = vmul.f32 %v2445_v48, %v6112_v8 }
 0x485   : > { %v2447_v0 = vmul.f32 %v3425_v20, %v2261_v33  ;;  %vm2453_vm6 = vweird.f32 %v3425_v20 }
 0x486   : > { %vm2454_vm12 = vmor %vm2452_vm0, %vm2453_vm6  ;;  %v2645_v23 = vmul.f32 %v5152_v34, %v2612_v30 }
 0x487   : > { %v2448_v26 = vmul.f32 %v3425_v20, %v2447_v0 }
 0x488   : > { %v2678_v62 = vadd.f32 %v5181_v22, %v2645_v23 }
 0x489   : > { %v2449_v47 = vmul.f32 0.5, %v2448_v26 }
 0x48b   : > { %v2450_v56 = vsub.f32 1.5, %v2449_v47 }
 0x48d   : > { %v2451_v13 = vmul.f32 %v3425_v20, %v2450_v56 }
 0x48f   : > { %v2455_v16 = vsel %vm2454_vm12, %v3425_v20, %v2451_v13 }
 0x490   : > { %v2613_v57 = vmul.f32 %v2455_v16, %v6111_v41 }
 0x492   : > { %v2646_v1 = vmul.f32 %v5152_v34, %v2613_v57  ;;  %v2840_v34 = vld [vmem:[%s295_s17] sm:$0xff] }
 0x494   : > { %v2679_v52 = vadd.f32 %v5181_v22, %v2646_v1 }
 0x496   : > { %3120 = vmatpush.xpose.msk.msrb.mxu3 %vm736_vm1, %v2679_v52 }
 0x49a   : > { %3121 = vmatpush.xpose.msk.msrb.mxu3 %vm736_vm1, %v2678_v62 }
 0x49d   : > { %3122 = vmatmul.msk.f32.vlgmr.msrb.gmra.mxu3 %vm736_vm1, %v2694_v15 }
 0x4c0   : > { %v2699_v32 = vpop.permute.xlu2 %2698 }
 0x4d7   : > { %v2844_v22 = vpop.permute.xlu0 %2843 }
 0x4d8   : > { %v2846_v55 = vmul.f32 %v2844_v22, %v2840_v34  ;;  %v2847_v50 = vmul.f32 %v2844_v22, %v2841_v39 }
 0x4f8   : > { %v2817_v38 = vpop.f32.mrf.mxu2 }
 0x4f9   : > { %v2818_v28 = vadd.f32 %v2817_v38, %v2699_v32 }
 0x4fb   : > { %2854 = vst [vmem:[%s284_s18 + $0x10] sm:$0xff] %v2818_v28  ;;  %v2848_v21 = vadd.f32 %v2846_v55, %v2818_v28 }
 0x4fd   : > { %3426 = vtanh.f32 %v2848_v21 }
 0x502   : > { %v2882_v25 = vld [vmem:[%s284_s18 + $0x10] sm:$0xff] (%p3524_p4) }
 0x503   : > { %v3427_v5 = vpop.eup %3426  ;;  %2883 = vst [vmem:[%s2865_s21 + $0x20] sm:$0xff] (%p3524_p4), %v2882_v25 }
 0x504   : > { %2852 = vst [vmem:[%s284_s18] sm:$0xff] %v3427_v5 }
 0x50b   : > { %v2878_v19 = vld [vmem:[%s284_s18] sm:$0xff] (%p3524_p4) }
 0x50c   : > { %2879 = vst [vmem:[%s2865_s21] sm:$0xff] (%p3524_p4), %v2878_v19 }
 0x520   : > { %v2837_v49 = vpop.f32.mrf.mxu3 }
 0x521   : > { %v2838_v12 = vadd.f32 %v2837_v49, %v2699_v32 }
 0x523   : > { %2855 = vst [vmem:[%s284_s18 + $0x18] sm:$0xff] %v2838_v12  ;;  %v2849_v42 = vadd.f32 %v2847_v50, %v2838_v12 }
 0x525   : > { %3428 = vtanh.f32 %v2849_v42 }
 0x528   : > { %2862 = sbr.rel (!%p3524_p4) target bundleno = 1333 (0x535), region = 52 }
 0x52a   : > { %v2884_v24 = vld [vmem:[%s284_s18 + $0x18] sm:$0xff] (%p3524_p4) }
 0x52b   : > { %v3429_v29 = vpop.eup %3428  ;;  %2885 = vst [vmem:[%s2865_s21 + $0x28] sm:$0xff] (%p3524_p4), %v2884_v24 }
 0x52c   : > { %2853 = vst [vmem:[%s284_s18 + $0x8] sm:$0xff] %v3429_v29 }
 0x533   : > { %v2880_v9 = vld [vmem:[%s284_s18 + $0x8] sm:$0xff] }
 0x534   : > { %2881 = vst [vmem:[%s2865_s21 + $0x8] sm:$0xff] %v2880_v9 }
 0x535 PF: > { %p14_p9 = scmp.ge.s32.totalorder %s3514_s28, 4   ;;  %s6113_s24 = smov %s3450_s25 }
 0x536   : > { %s6114_s25 = smov %s3522_s8  ;;  %s6115_s26 = smov %s3514_s28 }
 0x537   :  { %16 = sbr.rel (!%p14_p9) target bundleno = 2 (0x2), region = 104 }

</bundles_post_ra>
